<compile_context>
chip_gen: v5e
topology: v5e:2x2
jax: 0.10.0
libtpu: 0.0.40
codegen_flags: <defaults>
</compile_context>

<pallas_src>
import functools

import jax
import jax.numpy as jnp
from jax import lax
from jax.experimental import pallas as pl
from jax.experimental.pallas import tpu as pltpu


_LN_EPS = 1e-5
_INV_SQRT2 = 0.7071067811865476

# Standard batched matmul: contract lhs dim 2 with rhs dim 1, batch over dim 0.
_BMM_DN = (((2,), (1,)), ((0,), (0,)))


def _gelu_exact(x):
    # torch.nn.GELU default: 0.5 * x * (1 + erf(x / sqrt(2)))
    return 0.5 * x * (1.0 + lax.erf(x * _INV_SQRT2))


def _round_up(n, m):
    return ((n + m - 1) // m) * m


def _mixer_kernel(x_ref, rowp_ref, rowh_ref, colh_ref, colp_ref,
                  w1t_ref, w2t_ref, w3_ref, w4_ref, o_ref, *, inv_c):
    bt, p, _ = x_ref.shape
    hd = w1t_ref.shape[0]

    x = x_ref[...]                               # (Bt, P, P) ~ (batch, token, channel)

    gamma = rowp_ref[0:1, :]                     # (1, P)  zero in padded lanes
    beta = rowp_ref[1:2, :]                      # (1, P)  zero in padded lanes
    cmask = rowp_ref[2:3, :]                     # (1, P)  1.0 on the C real lanes
    b4 = rowp_ref[3:4, :]                        # (1, P)  channel-mixing bias 2
    b3 = rowh_ref[...]                           # (1, H)  channel-mixing bias 1
    b1 = colh_ref[...]                           # (H, 1)  token-mixing bias 1
    b2 = colp_ref[...]                           # (P, 1)  token-mixing bias 2

    def layernorm(v):
        # LayerNorm over the C real channels (biased variance, eps=1e-5).
        vm = v * cmask
        mean = jnp.sum(vm, axis=-1, keepdims=True) * inv_c
        xc = (v - mean) * cmask
        var = jnp.sum(xc * xc, axis=-1, keepdims=True) * inv_c
        # gamma/beta are zero-padded, so padded lanes come out exactly 0.
        return xc * lax.rsqrt(var + _LN_EPS) * gamma + beta

    xn = layernorm(x)                                            # (Bt, S, C)

    # ---- token mixing (mlp1): contraction over the S tokens, no transposes ----
    w1t_b = jnp.broadcast_to(w1t_ref[...], (bt, hd, p))          # (Bt, H, S)
    h1 = lax.dot_general(w1t_b, xn, _BMM_DN,
                         preferred_element_type=jnp.float32)     # (Bt, H, C)
    h1 = _gelu_exact(h1 + b1)                                    # bias per hidden row
    w2t_b = jnp.broadcast_to(w2t_ref[...], (bt, p, hd))          # (Bt, S, H)
    y1 = lax.dot_general(w2t_b, h1, _BMM_DN,
                         preferred_element_type=jnp.float32)     # (Bt, S, C)
    x_mid = xn + y1 + b2                                         # residual on normed x

    # ---- channel mixing (mlp2): flat big-M matmuls over the C channels ----
    xn2 = layernorm(x_mid)                                       # (Bt, S, C)
    h2 = jnp.dot(xn2.reshape(bt * p, p), w3_ref[...],
                 preferred_element_type=jnp.float32) + b3        # (Bt*S, H)
    h2 = _gelu_exact(h2)
    y2 = jnp.dot(h2, w4_ref[...],
                 preferred_element_type=jnp.float32) + b4        # (Bt*S, C)

    o_ref[...] = (x_mid + y2.reshape(bt, p, p)).astype(o_ref.dtype)


def _fixed_spec(shape):
    # Whole small parameter array, VMEM-resident across all grid steps.
    nd = len(shape)
    return pl.BlockSpec(shape, lambda *_: (0,) * nd)


@functools.partial(jax.jit, static_argnames=("block_batch",))
def mixer_layer(x, gamma, beta, w1, b1, w2, b2, w3, b3, w4, b4, block_batch=64):
    B, S, C = x.shape
    H = w1.shape[1]
    dtype = x.dtype

    # Pad tokens/channels to a common multiple-of-8 extent P so every in-kernel
    # flatten is layout-trivial; pad batch to a multiple of the batch tile Bt.
    P = max(_round_up(S, 8), _round_up(C, 8))
    Bt = min(block_batch, _round_up(B, 8))
    Bp = _round_up(B, Bt)

    xp = jnp.pad(x, ((0, Bp - B), (0, P - S), (0, P - C)))

    def pad_vec(v, n):
        v = jnp.asarray(v, dtype).reshape(-1)
        return jnp.pad(v, (0, n - v.shape[0]))

    cmask = (jnp.arange(P) < C).astype(dtype)
    row_p = jnp.stack([pad_vec(gamma, P), pad_vec(beta, P), cmask,
                       pad_vec(b4, P)])                            # (4, P)
    row_h = jnp.asarray(b3, dtype).reshape(1, H)                   # (1, H)
    col_h = jnp.asarray(b1, dtype).reshape(H, 1)                   # (H, 1)
    col_p = pad_vec(b2, P).reshape(P, 1)                           # (P, 1)

    w1t = jnp.pad(jnp.asarray(w1, dtype), ((0, P - S), (0, 0))).T  # (H, P)
    w2t = jnp.pad(jnp.asarray(w2, dtype), ((0, 0), (0, P - S))).T  # (P, H)
    w3p = jnp.pad(jnp.asarray(w3, dtype), ((0, P - C), (0, 0)))    # (P, H)
    w4p = jnp.pad(jnp.asarray(w4, dtype), ((0, 0), (0, P - C)))    # (H, P)

    out = pl.pallas_call(
        functools.partial(_mixer_kernel, inv_c=1.0 / C),
        out_shape=jax.ShapeDtypeStruct((Bp, P, P), dtype),
        grid_spec=pltpu.PrefetchScalarGridSpec(
            num_scalar_prefetch=0,
            grid=(Bp // Bt,),
            in_specs=[
                pl.BlockSpec((Bt, P, P), lambda b: (b, 0, 0)),     # x block
                _fixed_spec((4, P)),                               # gamma/beta/mask/b4
                _fixed_spec((1, H)),                               # b3 row
                _fixed_spec((H, 1)),                               # b1 column
                _fixed_spec((P, 1)),                               # b2 column
                _fixed_spec((H, P)),                               # W1^T (token mix in)
                _fixed_spec((P, H)),                               # W2^T (token mix out)
                _fixed_spec((P, H)),                               # W3   (channel mix in)
                _fixed_spec((H, P)),                               # W4   (channel mix out)
            ],
            out_specs=pl.BlockSpec((Bt, P, P), lambda b: (b, 0, 0)),
        ),
        compiler_params=pltpu.CompilerParams(
            dimension_semantics=("parallel",)),
    )(xp, row_p, row_h, col_h, col_p, w1t, w2t, w3p, w4p)

    return out[:B, :S, :C]


def _reference(x, gamma, beta, w1, b1, w2, b2, w3, b3, w4, b4):
    # Pure-JAX reference mirroring the PyTorch forward.
    def ln(v):
        mean = jnp.mean(v, axis=-1, keepdims=True)
        vc = v - mean
        var = jnp.mean(vc * vc, axis=-1, keepdims=True)
        return vc * lax.rsqrt(var + _LN_EPS) * gamma + beta

    xn = ln(x)
    y1 = _gelu_exact(jnp.swapaxes(xn, 1, 2) @ w1 + b1) @ w2 + b2   # (B, C, S)
    x_mid = xn + jnp.swapaxes(y1, 1, 2)
    y2 = _gelu_exact(ln(x_mid) @ w3 + b3) @ w4 + b4
    return x_mid + y2


if __name__ == "__main__":
    patch_size = 7
    hidden_dim = 32
    patch_num = (28 // patch_size) ** 2       # 16 tokens
    channels = 14                             # hardcoded in the reference module
    batch = 4                                 # small deterministic test batch

    key = jax.random.PRNGKey(0)
    ks = jax.random.split(key, 11)
    f32 = jnp.float32

    x = jax.random.normal(ks[0], (batch, patch_num, channels), f32)

    # LayerNorm params (shared `self.norm` used twice in forward).
    gamma = 1.0 + 0.1 * jax.random.normal(ks[1], (channels,), f32)
    beta = 0.05 * jax.random.normal(ks[2], (channels,), f32)

    # Weights stored as (in, out) so y = x @ W + b.
    w1 = 0.2 * jax.random.normal(ks[3], (patch_num, hidden_dim), f32)
    b1 = 0.05 * jax.random.normal(ks[4], (hidden_dim,), f32)
    w2 = 0.2 * jax.random.normal(ks[5], (hidden_dim, patch_num), f32)
    b2 = 0.05 * jax.random.normal(ks[6], (patch_num,), f32)
    w3 = 0.2 * jax.random.normal(ks[7], (channels, hidden_dim), f32)
    b3 = 0.05 * jax.random.normal(ks[8], (hidden_dim,), f32)
    w4 = 0.2 * jax.random.normal(ks[9], (hidden_dim, channels), f32)
    b4 = 0.05 * jax.random.normal(ks[10], (channels,), f32)

    out = mixer_layer(x, gamma, beta, w1, b1, w2, b2, w3, b3, w4, b4)
    out = jax.block_until_ready(out)

    ref = _reference(x, gamma, beta, w1, b1, w2, b2, w3, b3, w4, b4)
    if not jnp.allclose(out, ref, atol=2e-3, rtol=2e-3):
        err = float(jnp.max(jnp.abs(out - ref)))
        raise AssertionError(f"Pallas kernel output mismatch (max abs err {err})")

    print("KERNEL_OK")
</pallas_src>

<mosaic_0001>
module attributes {stable_mosaic.version = 11 : i64} {
  func.func @_mixer_kernel(%arg0: i32, %arg1: memref<8x16x16xf32, #tpu.memory_space<vmem>>, %arg2: memref<4x16xf32, #tpu.memory_space<vmem>>, %arg3: memref<1x32xf32, #tpu.memory_space<vmem>>, %arg4: memref<32x1xf32, #tpu.memory_space<vmem>>, %arg5: memref<16x1xf32, #tpu.memory_space<vmem>>, %arg6: memref<32x16xf32, #tpu.memory_space<vmem>>, %arg7: memref<16x32xf32, #tpu.memory_space<vmem>>, %arg8: memref<16x32xf32, #tpu.memory_space<vmem>>, %arg9: memref<32x16xf32, #tpu.memory_space<vmem>>, %arg10: memref<8x16x16xf32, #tpu.memory_space<vmem>>) attributes {dimension_semantics = [#tpu.dimension_semantics<parallel>], iteration_bounds = array<i64: 1>, scalar_prefetch = 0 : i64, scratch_operands = 0 : i64, tpu.core_type = #tpu.core_type<tc>, window_params = [{transform_indices = @transform_0, window_bounds = array<i64: 8, 16, 16>}, {pipeline_mode = #tpu.pipeline_mode<synchronous>, transform_indices = @transform_1, window_bounds = array<i64: 4, 16>}, {pipeline_mode = #tpu.pipeline_mode<synchronous>, transform_indices = @transform_2, window_bounds = array<i64: 1, 32>}, {pipeline_mode = #tpu.pipeline_mode<synchronous>, transform_indices = @transform_3, window_bounds = array<i64: 32, 1>}, {pipeline_mode = #tpu.pipeline_mode<synchronous>, transform_indices = @transform_4, window_bounds = array<i64: 16, 1>}, {pipeline_mode = #tpu.pipeline_mode<synchronous>, transform_indices = @transform_5, window_bounds = array<i64: 32, 16>}, {pipeline_mode = #tpu.pipeline_mode<synchronous>, transform_indices = @transform_6, window_bounds = array<i64: 16, 32>}, {pipeline_mode = #tpu.pipeline_mode<synchronous>, transform_indices = @transform_7, window_bounds = array<i64: 16, 32>}, {pipeline_mode = #tpu.pipeline_mode<synchronous>, transform_indices = @transform_8, window_bounds = array<i64: 32, 16>}, {transform_indices = @transform_9, window_bounds = array<i64: 8, 16, 16>}]} {
    %c0 = arith.constant 0 : index
    %c0_0 = arith.constant 0 : index
    %c0_1 = arith.constant 0 : index
    %0 = vector.load %arg1[%c0, %c0_0, %c0_1] : memref<8x16x16xf32, #tpu.memory_space<vmem>>, vector<8x16x16xf32>
    %c0_2 = arith.constant 0 : index
    %c0_3 = arith.constant 0 : index
    %1 = vector.load %arg2[%c0_2, %c0_3] : memref<4x16xf32, #tpu.memory_space<vmem>>, vector<1x16xf32>
    %c1 = arith.constant 1 : index
    %c0_4 = arith.constant 0 : index
    %2 = vector.load %arg2[%c1, %c0_4] : memref<4x16xf32, #tpu.memory_space<vmem>>, vector<1x16xf32>
    %c2 = arith.constant 2 : index
    %c0_5 = arith.constant 0 : index
    %3 = vector.load %arg2[%c2, %c0_5] : memref<4x16xf32, #tpu.memory_space<vmem>>, vector<1x16xf32>
    %c3 = arith.constant 3 : index
    %c0_6 = arith.constant 0 : index
    %4 = vector.load %arg2[%c3, %c0_6] : memref<4x16xf32, #tpu.memory_space<vmem>>, vector<1x16xf32>
    %c0_7 = arith.constant 0 : index
    %c0_8 = arith.constant 0 : index
    %5 = vector.load %arg3[%c0_7, %c0_8] : memref<1x32xf32, #tpu.memory_space<vmem>>, vector<1x32xf32>
    %c0_9 = arith.constant 0 : index
    %c0_10 = arith.constant 0 : index
    %6 = vector.load %arg4[%c0_9, %c0_10] : memref<32x1xf32, #tpu.memory_space<vmem>>, vector<32x1xf32>
    %c0_11 = arith.constant 0 : index
    %c0_12 = arith.constant 0 : index
    %7 = vector.load %arg5[%c0_11, %c0_12] : memref<16x1xf32, #tpu.memory_space<vmem>>, vector<16x1xf32>
    %8 = vector.shape_cast %3 : vector<1x16xf32> to vector<1x1x16xf32>
    %9 = vector.broadcast %8 : vector<1x1x16xf32> to vector<8x16x16xf32>
    %10 = arith.mulf %0, %9 : vector<8x16x16xf32>
    %cst = arith.constant dense<0.000000e+00> : vector<8x16xf32>
    %11 = vector.multi_reduction <add>, %10, %cst [2] : vector<8x16x16xf32> to vector<8x16xf32>
    %12 = vector.shape_cast %11 : vector<8x16xf32> to vector<8x16x1xf32>
    %cst_13 = arith.constant 0.0714285746 : f32
    %13 = vector.broadcast %cst_13 : f32 to vector<8x16x1xf32>
    %14 = arith.mulf %12, %13 : vector<8x16x1xf32>
    %15 = vector.broadcast %14 : vector<8x16x1xf32> to vector<8x16x16xf32>
    %16 = arith.subf %0, %15 : vector<8x16x16xf32>
    %17 = vector.shape_cast %3 : vector<1x16xf32> to vector<1x1x16xf32>
    %18 = vector.broadcast %17 : vector<1x1x16xf32> to vector<8x16x16xf32>
    %19 = arith.mulf %16, %18 : vector<8x16x16xf32>
    %20 = arith.mulf %19, %19 : vector<8x16x16xf32>
    %cst_14 = arith.constant dense<0.000000e+00> : vector<8x16xf32>
    %21 = vector.multi_reduction <add>, %20, %cst_14 [2] : vector<8x16x16xf32> to vector<8x16xf32>
    %22 = vector.shape_cast %21 : vector<8x16xf32> to vector<8x16x1xf32>
    %cst_15 = arith.constant 0.0714285746 : f32
    %23 = vector.broadcast %cst_15 : f32 to vector<8x16x1xf32>
    %24 = arith.mulf %22, %23 : vector<8x16x1xf32>
    %cst_16 = arith.constant 9.99999974E-6 : f32
    %25 = vector.broadcast %cst_16 : f32 to vector<8x16x1xf32>
    %26 = arith.addf %24, %25 : vector<8x16x1xf32>
    %27 = math.rsqrt %26 : vector<8x16x1xf32>
    %28 = vector.broadcast %27 : vector<8x16x1xf32> to vector<8x16x16xf32>
    %29 = arith.mulf %19, %28 : vector<8x16x16xf32>
    %30 = vector.shape_cast %1 : vector<1x16xf32> to vector<1x1x16xf32>
    %31 = vector.broadcast %30 : vector<1x1x16xf32> to vector<8x16x16xf32>
    %32 = arith.mulf %29, %31 : vector<8x16x16xf32>
    %33 = vector.shape_cast %2 : vector<1x16xf32> to vector<1x1x16xf32>
    %34 = vector.broadcast %33 : vector<1x1x16xf32> to vector<8x16x16xf32>
    %35 = arith.addf %32, %34 : vector<8x16x16xf32>
    %c0_17 = arith.constant 0 : index
    %c0_18 = arith.constant 0 : index
    %36 = vector.load %arg6[%c0_17, %c0_18] : memref<32x16xf32, #tpu.memory_space<vmem>>, vector<32x16xf32>
    %37 = vector.shape_cast %36 : vector<32x16xf32> to vector<1x32x16xf32>
    %38 = vector.broadcast %37 : vector<1x32x16xf32> to vector<8x32x16xf32>
    %cst_19 = arith.constant dense<0.000000e+00> : vector<8x32x16xf32>
    %39 = tpu.matmul %38, %35, %cst_19 {dimension_numbers = #tpu.dot_dimension_numbers<[2], [1], [1], [2], [0, 0, 0, 1, 1, 2], [0], [0]>} : vector<8x32x16xf32>, vector<8x16x16xf32>, vector<8x32x16xf32> -> vector<8x32x16xf32>
    %40 = vector.shape_cast %6 : vector<32x1xf32> to vector<1x32x1xf32>
    %41 = vector.broadcast %40 : vector<1x32x1xf32> to vector<8x32x16xf32>
    %42 = arith.addf %39, %41 : vector<8x32x16xf32>
    %cst_20 = arith.constant 5.000000e-01 : f32
    %43 = vector.broadcast %cst_20 : f32 to vector<8x32x16xf32>
    %44 = arith.mulf %43, %42 : vector<8x32x16xf32>
    %cst_21 = arith.constant 0.707106769 : f32
    %45 = vector.broadcast %cst_21 : f32 to vector<8x32x16xf32>
    %46 = arith.mulf %42, %45 : vector<8x32x16xf32>
    %47 = math.erf %46 : vector<8x32x16xf32>
    %cst_22 = arith.constant 1.000000e+00 : f32
    %48 = vector.broadcast %cst_22 : f32 to vector<8x32x16xf32>
    %49 = arith.addf %48, %47 : vector<8x32x16xf32>
    %50 = arith.mulf %44, %49 : vector<8x32x16xf32>
    %c0_23 = arith.constant 0 : index
    %c0_24 = arith.constant 0 : index
    %51 = vector.load %arg7[%c0_23, %c0_24] : memref<16x32xf32, #tpu.memory_space<vmem>>, vector<16x32xf32>
    %52 = vector.shape_cast %51 : vector<16x32xf32> to vector<1x16x32xf32>
    %53 = vector.broadcast %52 : vector<1x16x32xf32> to vector<8x16x32xf32>
    %cst_25 = arith.constant dense<0.000000e+00> : vector<8x16x16xf32>
    %54 = tpu.matmul %53, %50, %cst_25 {dimension_numbers = #tpu.dot_dimension_numbers<[2], [1], [1], [2], [0, 0, 0, 1, 1, 2], [0], [0]>} : vector<8x16x32xf32>, vector<8x32x16xf32>, vector<8x16x16xf32> -> vector<8x16x16xf32>
    %55 = arith.addf %35, %54 : vector<8x16x16xf32>
    %56 = vector.shape_cast %7 : vector<16x1xf32> to vector<1x16x1xf32>
    %57 = vector.broadcast %56 : vector<1x16x1xf32> to vector<8x16x16xf32>
    %58 = arith.addf %55, %57 : vector<8x16x16xf32>
    %59 = vector.shape_cast %3 : vector<1x16xf32> to vector<1x1x16xf32>
    %60 = vector.broadcast %59 : vector<1x1x16xf32> to vector<8x16x16xf32>
    %61 = arith.mulf %58, %60 : vector<8x16x16xf32>
    %cst_26 = arith.constant dense<0.000000e+00> : vector<8x16xf32>
    %62 = vector.multi_reduction <add>, %61, %cst_26 [2] : vector<8x16x16xf32> to vector<8x16xf32>
    %63 = vector.shape_cast %62 : vector<8x16xf32> to vector<8x16x1xf32>
    %cst_27 = arith.constant 0.0714285746 : f32
    %64 = vector.broadcast %cst_27 : f32 to vector<8x16x1xf32>
    %65 = arith.mulf %63, %64 : vector<8x16x1xf32>
    %66 = vector.broadcast %65 : vector<8x16x1xf32> to vector<8x16x16xf32>
    %67 = arith.subf %58, %66 : vector<8x16x16xf32>
    %68 = vector.shape_cast %3 : vector<1x16xf32> to vector<1x1x16xf32>
    %69 = vector.broadcast %68 : vector<1x1x16xf32> to vector<8x16x16xf32>
    %70 = arith.mulf %67, %69 : vector<8x16x16xf32>
    %71 = arith.mulf %70, %70 : vector<8x16x16xf32>
    %cst_28 = arith.constant dense<0.000000e+00> : vector<8x16xf32>
    %72 = vector.multi_reduction <add>, %71, %cst_28 [2] : vector<8x16x16xf32> to vector<8x16xf32>
    %73 = vector.shape_cast %72 : vector<8x16xf32> to vector<8x16x1xf32>
    %cst_29 = arith.constant 0.0714285746 : f32
    %74 = vector.broadcast %cst_29 : f32 to vector<8x16x1xf32>
    %75 = arith.mulf %73, %74 : vector<8x16x1xf32>
    %cst_30 = arith.constant 9.99999974E-6 : f32
    %76 = vector.broadcast %cst_30 : f32 to vector<8x16x1xf32>
    %77 = arith.addf %75, %76 : vector<8x16x1xf32>
    %78 = math.rsqrt %77 : vector<8x16x1xf32>
    %79 = vector.broadcast %78 : vector<8x16x1xf32> to vector<8x16x16xf32>
    %80 = arith.mulf %70, %79 : vector<8x16x16xf32>
    %81 = vector.shape_cast %1 : vector<1x16xf32> to vector<1x1x16xf32>
    %82 = vector.broadcast %81 : vector<1x1x16xf32> to vector<8x16x16xf32>
    %83 = arith.mulf %80, %82 : vector<8x16x16xf32>
    %84 = vector.shape_cast %2 : vector<1x16xf32> to vector<1x1x16xf32>
    %85 = vector.broadcast %84 : vector<1x1x16xf32> to vector<8x16x16xf32>
    %86 = arith.addf %83, %85 : vector<8x16x16xf32>
    %87 = vector.shape_cast %86 : vector<8x16x16xf32> to vector<128x16xf32>
    %c0_31 = arith.constant 0 : index
    %c0_32 = arith.constant 0 : index
    %88 = vector.load %arg8[%c0_31, %c0_32] : memref<16x32xf32, #tpu.memory_space<vmem>>, vector<16x32xf32>
    %cst_33 = arith.constant dense<0.000000e+00> : vector<128x32xf32>
    %89 = tpu.matmul %87, %88, %cst_33 {dimension_numbers = #tpu.dot_dimension_numbers<[1], [0], [0], [1], [0, 0, 1, 1], [], []>} : vector<128x16xf32>, vector<16x32xf32>, vector<128x32xf32> -> vector<128x32xf32>
    %90 = vector.broadcast %5 : vector<1x32xf32> to vector<128x32xf32>
    %91 = arith.addf %89, %90 : vector<128x32xf32>
    %cst_34 = arith.constant 5.000000e-01 : f32
    %92 = vector.broadcast %cst_34 : f32 to vector<128x32xf32>
    %93 = arith.mulf %92, %91 : vector<128x32xf32>
    %cst_35 = arith.constant 0.707106769 : f32
    %94 = vector.broadcast %cst_35 : f32 to vector<128x32xf32>
    %95 = arith.mulf %91, %94 : vector<128x32xf32>
    %96 = math.erf %95 : vector<128x32xf32>
    %cst_36 = arith.constant 1.000000e+00 : f32
    %97 = vector.broadcast %cst_36 : f32 to vector<128x32xf32>
    %98 = arith.addf %97, %96 : vector<128x32xf32>
    %99 = arith.mulf %93, %98 : vector<128x32xf32>
    %c0_37 = arith.constant 0 : index
    %c0_38 = arith.constant 0 : index
    %100 = vector.load %arg9[%c0_37, %c0_38] : memref<32x16xf32, #tpu.memory_space<vmem>>, vector<32x16xf32>
    %cst_39 = arith.constant dense<0.000000e+00> : vector<128x16xf32>
    %101 = tpu.matmul %99, %100, %cst_39 {dimension_numbers = #tpu.dot_dimension_numbers<[1], [0], [0], [1], [0, 0, 1, 1], [], []>} : vector<128x32xf32>, vector<32x16xf32>, vector<128x16xf32> -> vector<128x16xf32>
    %102 = vector.broadcast %4 : vector<1x16xf32> to vector<128x16xf32>
    %103 = arith.addf %101, %102 : vector<128x16xf32>
    %104 = vector.shape_cast %103 : vector<128x16xf32> to vector<8x16x16xf32>
    %105 = arith.addf %58, %104 : vector<8x16x16xf32>
    %c0_40 = arith.constant 0 : index
    %c0_41 = arith.constant 0 : index
    %c0_42 = arith.constant 0 : index
    %106 = vector.load %arg10[%c0_40, %c0_41, %c0_42] : memref<8x16x16xf32, #tpu.memory_space<vmem>>, vector<8x16x16xf32>
    tpu.vector_store %arg10[%c0_40, %c0_41, %c0_42], %105 {strides = array<i32>} : memref<8x16x16xf32, #tpu.memory_space<vmem>>, vector<8x16x16xf32>,
    return
  }
  func.func @transform_0(%arg0: i32) -> (i32, i32, i32) {
    %c0_i32 = arith.constant 0 : i32
    %c0_i32_0 = arith.constant 0 : i32
    %c0_i32_1 = arith.constant 0 : i32
    return %arg0, %c0_i32, %c0_i32_0 : i32, i32, i32
  }
  func.func @transform_1(%arg0: i32) -> (i32, i32) {
    %c0_i32 = arith.constant 0 : i32
    %c0_i32_0 = arith.constant 0 : i32
    %c0_i32_1 = arith.constant 0 : i32
    return %c0_i32, %c0_i32_0 : i32, i32
  }
  func.func @transform_2(%arg0: i32) -> (i32, i32) {
    %c0_i32 = arith.constant 0 : i32
    %c0_i32_0 = arith.constant 0 : i32
    %c0_i32_1 = arith.constant 0 : i32
    return %c0_i32, %c0_i32_0 : i32, i32
  }
  func.func @transform_3(%arg0: i32) -> (i32, i32) {
    %c0_i32 = arith.constant 0 : i32
    %c0_i32_0 = arith.constant 0 : i32
    %c0_i32_1 = arith.constant 0 : i32
    return %c0_i32, %c0_i32_0 : i32, i32
  }
  func.func @transform_4(%arg0: i32) -> (i32, i32) {
    %c0_i32 = arith.constant 0 : i32
    %c0_i32_0 = arith.constant 0 : i32
    %c0_i32_1 = arith.constant 0 : i32
    return %c0_i32, %c0_i32_0 : i32, i32
  }
  func.func @transform_5(%arg0: i32) -> (i32, i32) {
    %c0_i32 = arith.constant 0 : i32
    %c0_i32_0 = arith.constant 0 : i32
    %c0_i32_1 = arith.constant 0 : i32
    return %c0_i32, %c0_i32_0 : i32, i32
  }
  func.func @transform_6(%arg0: i32) -> (i32, i32) {
    %c0_i32 = arith.constant 0 : i32
    %c0_i32_0 = arith.constant 0 : i32
    %c0_i32_1 = arith.constant 0 : i32
    return %c0_i32, %c0_i32_0 : i32, i32
  }
  func.func @transform_7(%arg0: i32) -> (i32, i32) {
    %c0_i32 = arith.constant 0 : i32
    %c0_i32_0 = arith.constant 0 : i32
    %c0_i32_1 = arith.constant 0 : i32
    return %c0_i32, %c0_i32_0 : i32, i32
  }
  func.func @transform_8(%arg0: i32) -> (i32, i32) {
    %c0_i32 = arith.constant 0 : i32
    %c0_i32_0 = arith.constant 0 : i32
    %c0_i32_1 = arith.constant 0 : i32
    return %c0_i32, %c0_i32_0 : i32, i32
  }
  func.func @transform_9(%arg0: i32) -> (i32, i32, i32) {
    %c0_i32 = arith.constant 0 : i32
    %c0_i32_0 = arith.constant 0 : i32
    %c0_i32_1 = arith.constant 0 : i32
    return %arg0, %c0_i32, %c0_i32_0 : i32, i32, i32
  }
}

</mosaic_0001>

<bundles_post_ra>
// kernel: mixer_layer.1
= control target key start
LH: loop header
LB: loop body
LE: loop exit
PB: predicated region body
PF: predicated region fallthrough
CT: control target
= control target key end

     0   :  { %vm76_vm0 = vcmask 130048   ;;  %s7460_s0 = inlined_call_operand.vmem [shape: f32[8,16,16], index: 0, kind: input, shape index: {}]   ;;  %s7461_s1 = inlined_call_operand.vmem [shape: f32[4,16], index: 1, kind: input, shape index: {}]   ;;  %s7462_s5 = inlined_call_operand.vmem [shape: f32[32,16], index: 5, kind: input, shape index: {}]   ;;  %s7463_s3 = inlined_call_operand.vmem [shape: f32[32,1], index: 3, kind: input, shape index: {}]   ;;  %s7464_s4 = inlined_call_operand.vmem [shape: f32[16,1], index: 4, kind: input, shape index: {}]   ;;  %s7465_s6 = inlined_call_operand.vmem [shape: f32[16,32], index: 6, kind: input, shape index: {}]   ;;  %s7466_s7 = inlined_call_operand.vmem [shape: f32[16,32], index: 7, kind: input, shape index: {}]   ;;  %s7467_s2 = inlined_call_operand.vmem [shape: f32[1,32], index: 2, kind: input, shape index: {}]   ;;  %s7468_s8 = inlined_call_operand.vmem [shape: f32[32,16], index: 8, kind: input, shape index: {}]   ;;  %s7469_s9 = inlined_call_operand.vmem [shape: f32[8,16,16], index: 9, kind: output, shape index: {}]  }
   0x1   :  { %v4145_v0 = vld [vmem:[%s7460_s0 + $0x28] sm:$0xff]  ;;  %v4150_v1 = vld [vmem:[%s7461_s1 + $0x2] ss:$0 sm:$0xff]  ;;  %v4158_v3 = vld [vmem:[%s7460_s0 + $0x18] sm:$0xff] }
   0x2   :  { %v33_v2 = vld [vmem:[%s7460_s0 + $0x8] sm:$0xff]  ;;  %v65_v4 = vmul.f32 %v4150_v1, %v4145_v0  ;;  %v63_v6 = vmul.f32 %v4150_v1, %v4158_v3  ;;  %v4168_v7 = vld [vmem:[%s7460_s0 + $0x20] sm:$0xff]  ;;  %v4181_v12 = vld [vmem:[%s7460_s0 + $0x10] sm:$0xff] }
   0x3   :  { %v61_v5 = vmul.f32 %v4150_v1, %v33_v2  ;;  %v4173_v8 = vld [vmem:[%s7460_s0] sm:$0xff]  ;;  %v64_v13 = vmul.f32 %v4150_v1, %v4168_v7  ;;  %v62_v15 = vmul.f32 %v4150_v1, %v4181_v12  ;;  %v4194_v18 = vld [vmem:[%s7460_s0 + $0x38] sm:$0xff]  ;;  %v4200_v20 = vld [vmem:[%s7460_s0 + $0x48] sm:$0xff] }
   0x4   :  { %v92_v9 = vsel %vm76_vm0, %v65_v4, 0.0  ;;  %v86_v11 = vsel %vm76_vm0, %v63_v6, 0.0  ;;  %v60_v14 = vmul.f32 %v4150_v1, %v4173_v8  ;;  %v4205_v21 = vld [vmem:[%s7460_s0 + $0x40] sm:$0xff]  ;;  %v67_v22 = vmul.f32 %v4150_v1, %v4194_v18  ;;  %v4218_v27 = vld [vmem:[%s7460_s0 + $0x30] sm:$0xff]  ;;  %v4224_v29 = vld [vmem:[%s7460_s0 + $0x58] sm:$0xff] }
   0x5   :  { %v80_v10 = vsel %vm76_vm0, %v61_v5, 0.0  ;;  %93 = vadd.xlane.f32.xlu2 %v92_v9  ;;  %87 = vadd.xlane.f32.xlu1 %v86_v11  ;;  %v89_v16 = vsel %vm76_vm0, %v64_v13, 0.0  ;;  %v83_v19 = vsel %vm76_vm0, %v62_v15, 0.0  ;;  %v69_v23 = vmul.f32 %v4150_v1, %v4200_v20  ;;  %v4234_v33 = vld [vmem:[%s7460_s0 + $0x50] sm:$0xff]  ;;  %v4243_v37 = vld [vmem:[%s7460_s0 + $0x60] sm:$0xff]  ;;  %v4251_v40 = vld [vmem:[%s7460_s0 + $0x78] sm:$0xff] }
   0x6   :  { %81 = vadd.xlane.f32.xlu0 %v80_v10  ;;  %v77_v17 = vsel %vm76_vm0, %v60_v14, 0.0  ;;  %v68_v24 = vmul.f32 %v4150_v1, %v4205_v21  ;;  %v98_v25 = vsel %vm76_vm0, %v67_v22, 0.0  ;;  %v66_v30 = vmul.f32 %v4150_v1, %v4218_v27  ;;  %v4264_v52 = vld [vmem:[%s7460_s0 + $0x68] sm:$0xff] }
   0x7   :  { %v104_v26 = vsel %vm76_vm0, %v69_v23, 0.0  ;;  %v71_v31 = vmul.f32 %v4150_v1, %v4224_v29  ;;  %v70_v35 = vmul.f32 %v4150_v1, %v4234_v33  ;;  %v72_v38 = vmul.f32 %v4150_v1, %v4243_v37 }
   0x8   :  { %v101_v28 = vsel %vm76_vm0, %v68_v24, 0.0  ;;  %v95_v32 = vsel %vm76_vm0, %v66_v30, 0.0  ;;  %v75_v41 = vmul.f32 %v4150_v1, %v4251_v40  ;;  %v73_v61 = vmul.f32 %v4150_v1, %v4264_v52  ;;  %v4307_v30 = vld [vmem:[%s7460_s0 + $0x70] sm:$0xff] }
   0x9   :  { %v110_v34 = vsel %vm76_vm0, %v71_v31, 0.0  ;;  %v107_v36 = vsel %vm76_vm0, %v70_v35, 0.0  ;;  %v113_v39 = vsel %vm76_vm0, %v72_v38, 0.0  ;;  %v74_v35 = vmul.f32 %v4150_v1, %v4307_v30 }
   0xa   :  { %v122_v42 = vsel %vm76_vm0, %v75_v41, 0.0  ;;  %v116_v5 = vsel %vm76_vm0, %v73_v61, 0.0 }
   0xb   :  { %v119_v41 = vsel %vm76_vm0, %v74_v35, 0.0 }
   0xd   :  { %90 = vadd.xlane.f32.xlu2 %v89_v16  ;;  %84 = vadd.xlane.f32.xlu1 %v83_v19 }
   0xe   :  { %78 = vadd.xlane.f32.xlu0 %v77_v17 }
  0x15   :  { %99 = vadd.xlane.f32.xlu2 %v98_v25  ;;  %102 = vadd.xlane.f32.xlu1 %v101_v28 }
  0x16   :  { %105 = vadd.xlane.f32.xlu0 %v104_v26 }
  0x1d   :  { %111 = vadd.xlane.f32.xlu1 %v110_v34 }
  0x1e   :  { %96 = vadd.xlane.f32.xlu0 %v95_v32 }
  0x26   :  { %108 = vadd.xlane.f32.xlu0 %v107_v36 }
  0x2e   :  { %114 = vadd.xlane.f32.xlu0 %v113_v39 }
  0x36   :  { %123 = vadd.xlane.f32.xlu0 %v122_v42 }
  0x78   :  { %v94_v43 = vpop.xlane.xlu2 %93  ;;  %v88_v46 = vpop.xlane.xlu1 %87 }
  0x79   :  { %v82_v44 = vpop.xlane.xlu0 %81  ;;  %v128_v57 = vmul.f32 0.071428575, %v88_v46  ;;  %v130_v9 = vmul.f32 0.071428575, %v94_v43 }
  0x7a   :  { %v126_v45 = vmul.f32 0.071428575, %v82_v44 }
  0x7b   :  { %v144_v4 = vsub.f32 %v4158_v3, %v128_v57  ;;  %v146_v19 = vsub.f32 %v4145_v0, %v130_v9 }
  0x7c   :  { %v142_v47 = vsub.f32 %v33_v2, %v126_v45 }
  0x7d   :  { %v4290_v3 = vmul.f32 %v4150_v1, %v144_v4  ;;  %v4310_v0 = vmul.f32 %v4150_v1, %v146_v19 }
  0x7e   :  { %v4257_v48 = vmul.f32 %v4150_v1, %v142_v47 }
  0x7f   :  { %v176_v23 = vmul.f32 %v4290_v3, %v4290_v3  ;;  %v178_v38 = vmul.f32 %v4310_v0, %v4310_v0 }
  0x80   :  { %v174_v49 = vmul.f32 %v4257_v48, %v4257_v48  ;;  %v91_v50 = vpop.xlane.xlu2 %90  ;;  %v85_v56 = vpop.xlane.xlu1 %84 }
  0x81   :  { %v79_v51 = vpop.xlane.xlu0 %78  ;;  %v129_v53 = vmul.f32 0.071428575, %v91_v50  ;;  %v127_v58 = vmul.f32 0.071428575, %v85_v56  ;;  %v198_v32 = vsel %vm76_vm0, %v176_v23, 0.0  ;;  %v204_v46 = vsel %vm76_vm0, %v178_v38, 0.0 }
  0x82   :  { %v125_v54 = vmul.f32 0.071428575, %v79_v51  ;;  %v192_v55 = vsel %vm76_vm0, %v174_v49, 0.0 }
  0x83   :  { %193 = vadd.xlane.f32.xlu2 %v192_v55  ;;  %v145_v59 = vsub.f32 %v4168_v7, %v129_v53  ;;  %v143_v62 = vsub.f32 %v4181_v12, %v127_v58 }
  0x84   :  { %v141_v60 = vsub.f32 %v4173_v8, %v125_v54 }
  0x85   :  { %v4273_v63 = vmul.f32 %v4150_v1, %v145_v59  ;;  %v4285_v8 = vmul.f32 %v4150_v1, %v143_v62 }
  0x86   :  { %v4276_v2 = vmul.f32 %v4150_v1, %v141_v60 }
  0x87   :  { %v177_v6 = vmul.f32 %v4273_v63, %v4273_v63  ;;  %v175_v17 = vmul.f32 %v4285_v8, %v4285_v8 }
  0x88   :  { %v173_v7 = vmul.f32 %v4276_v2, %v4276_v2  ;;  %v100_v10 = vpop.xlane.xlu2 %99  ;;  %v103_v15 = vpop.xlane.xlu1 %102 }
  0x89   :  { %v106_v11 = vpop.xlane.xlu0 %105  ;;  %v132_v12 = vmul.f32 0.071428575, %v100_v10  ;;  %v201_v13 = vsel %vm76_vm0, %v177_v6, 0.0  ;;  %v195_v24 = vsel %vm76_vm0, %v175_v17, 0.0  ;;  %v133_v26 = vmul.f32 0.071428575, %v103_v15 }
  0x8a   :  { %v189_v14 = vsel %vm76_vm0, %v173_v7, 0.0  ;;  %202 = vadd.xlane.f32.xlu0 %v201_v13  ;;  %v134_v28 = vmul.f32 0.071428575, %v106_v11 }
  0x8b   :  { %117 = vadd.xlane.f32.xlu2 %v116_v5  ;;  %v148_v16 = vsub.f32 %v4194_v18, %v132_v12  ;;  %190 = vadd.xlane.f32.xlu1 %v189_v14  ;;  %v149_v34 = vsub.f32 %v4205_v21, %v133_v26 }
  0x8c   :  { %v150_v36 = vsub.f32 %v4200_v20, %v134_v28 }
  0x8d   :  { %v4297_v22 = vmul.f32 %v4150_v1, %v148_v16  ;;  %v4322_v43 = vmul.f32 %v4150_v1, %v149_v34 }
  0x8e   :  { %v4326_v21 = vmul.f32 %v4150_v1, %v150_v36 }
  0x8f   :  { %v180_v25 = vmul.f32 %v4297_v22, %v4297_v22  ;;  %v181_v50 = vmul.f32 %v4322_v43, %v4322_v43 }
  0x90   :  { %v112_v39 = vpop.xlane.xlu1 %111  ;;  %v182_v53 = vmul.f32 %v4326_v21, %v4326_v21 }
  0x91   :  { %v97_v18 = vpop.xlane.xlu0 %96  ;;  %v210_v31 = vsel %vm76_vm0, %v180_v25, 0.0  ;;  %v136_v42 = vmul.f32 0.071428575, %v112_v39  ;;  %v213_v55 = vsel %vm76_vm0, %v181_v50, 0.0 }
  0x92   :  { %211 = vadd.xlane.f32.xlu0 %v210_v31  ;;  %v131_v44 = vmul.f32 0.071428575, %v97_v18  ;;  %v216_v57 = vsel %vm76_vm0, %v182_v53, 0.0 }
  0x93   :  { %196 = vadd.xlane.f32.xlu2 %v195_v24  ;;  %199 = vadd.xlane.f32.xlu1 %v198_v32  ;;  %v152_v49 = vsub.f32 %v4224_v29, %v136_v42 }
  0x94   :  { %v147_v51 = vsub.f32 %v4218_v27, %v131_v44 }
  0x96   :  { %v4346_v58 = vmul.f32 %v4150_v1, %v147_v51 }
  0x98   :  { %v179_v62 = vmul.f32 %v4346_v58, %v4346_v58 }
  0x99   :  { %v109_v45 = vpop.xlane.xlu0 %108 }
  0x9a   :  { %v135_v47 = vmul.f32 0.071428575, %v109_v45  ;;  %v207_v7 = vsel %vm76_vm0, %v179_v62, 0.0 }
  0x9b   :  { %120 = vadd.xlane.f32.xlu2 %v119_v41  ;;  %205 = vadd.xlane.f32.xlu1 %v204_v46 }
  0x9c   :  { %v151_v20 = vsub.f32 %v4234_v33, %v135_v47  ;;  %v4342_v33 = vmul.f32 %v4150_v1, %v152_v49 }
  0x9e   :  { %v4336_v54 = vmul.f32 %v4150_v1, %v151_v20  ;;  %v184_v61 = vmul.f32 %v4342_v33, %v4342_v33 }
  0xa0   :  { %v183_v56 = vmul.f32 %v4336_v54, %v4336_v54  ;;  %v222_v4 = vsel %vm76_vm0, %v184_v61, 0.0 }
  0xa1   :  { %v115_v29 = vpop.xlane.xlu0 %114 }
  0xa2   :  { %v137_v27 = vmul.f32 0.071428575, %v115_v29  ;;  %v219_v59 = vsel %vm76_vm0, %v183_v56, 0.0 }
  0xa3   :  { %214 = vadd.xlane.f32.xlu2 %v213_v55  ;;  %220 = vadd.xlane.f32.xlu0 %v219_v59  ;;  %v4395_v59 = vld [vmem:[%s7461_s1] ss:$0 sm:$0xff] }
  0xa4   :  { %v153_v60 = vsub.f32 %v4243_v37, %v137_v27  ;;  %217 = vadd.xlane.f32.xlu1 %v216_v57 }
  0xa6   :  { %v4356_v5 = vmul.f32 %v4150_v1, %v153_v60 }
  0xa8   :  { %v185_v37 = vmul.f32 %v4356_v5, %v4356_v5 }
  0xa9   :  { %v124_v6 = vpop.xlane.xlu0 %123 }
  0xaa   :  { %v140_v9 = vmul.f32 0.071428575, %v124_v6  ;;  %v225_v12 = vsel %vm76_vm0, %v185_v37, 0.0  ;;  %v4404_v37 = vld [vmem:[%s7461_s1 + $0x1] ss:$0 sm:$0xff] }
  0xab   :  { %223 = vadd.xlane.f32.xlu2 %v222_v4 }
  0xac   :  { %v156_v10 = vsub.f32 %v4251_v40, %v140_v9  ;;  %208 = vadd.xlane.f32.xlu1 %v207_v7 }
  0xae   :  { %v4363_v11 = vmul.f32 %v4150_v1, %v156_v10 }
  0xb0   :  { %v188_v13 = vmul.f32 %v4363_v11, %v4363_v11 }
  0xb2   :  { %v234_v14 = vsel %vm76_vm0, %v188_v13, 0.0 }
  0xb3   :  { %226 = vadd.xlane.f32.xlu2 %v225_v12  ;;  %235 = vadd.xlane.f32.xlu0 %v234_v14 }
  0xf6   :  { %v194_v15 = vpop.xlane.xlu2 %193 }
  0xf7   :  { %v238_v16 = vmul.f32 0.071428575, %v194_v15 }
  0xf9   :  { %v254_v17 = vadd.f32 1e-05, %v238_v16 }
  0xfb   :  { %3925 = vrsqrt.f32 %v254_v17  ;;  %vm285_vm2 = vweird.f32 %v254_v17 }
  0xfd   :  { %v203_v19 = vpop.xlane.xlu0 %202 }
  0xfe   :  { %v118_v40 = vpop.xlane.xlu2 %117  ;;  %v191_v24 = vpop.xlane.xlu1 %190  ;;  %v241_v25 = vmul.f32 0.071428575, %v203_v19 }
  0xff   :  { %v138_v23 = vmul.f32 0.071428575, %v118_v40  ;;  %v237_v26 = vmul.f32 0.071428575, %v191_v24 }
 0x100   :  { %v4370_v31 = vadd.f32 1e-05, %v241_v25 }
 0x101   :  { %v3926_v28 = vpop.eup %3925  ;;  %v154_v18 = vsub.f32 %v4264_v52, %v138_v23  ;;  %v253_v34 = vadd.f32 1e-05, %v237_v26 }
 0x102   :  { %v280_v32 = vmul.f32 %v3926_v28, %v254_v17  ;;  %3927 = vrsqrt.f32 %v4370_v31  ;;  %vm286_vm1 = vweird.f32 %v3926_v28  ;;  %vm315_vm8 = vweird.f32 %v4370_v31 }
 0x103   :  { %v4374_v35 = vmul.f32 %v4150_v1, %v154_v18  ;;  %3929 = vrsqrt.f32 %v253_v34  ;;  %vm287_vm3 = vmor %vm285_vm2, %vm286_vm1  ;;  %vm275_vm4 = vweird.f32 %v253_v34 }
 0x104   :  { %v281_v36 = vmul.f32 %v3926_v28, %v280_v32 }
 0x105   :  { %v186_v38 = vmul.f32 %v4374_v35, %v4374_v35  ;;  %v212_v42 = vpop.xlane.xlu0 %211 }
 0x106   :  { %v282_v39 = vmul.f32 0.5, %v281_v36  ;;  %v197_v41 = vpop.xlane.xlu2 %196  ;;  %v200_v45 = vpop.xlane.xlu1 %199  ;;  %v244_v52 = vmul.f32 0.071428575, %v212_v42 }
 0x107   :  { %v239_v44 = vmul.f32 0.071428575, %v197_v41  ;;  %v228_v46 = vsel %vm76_vm0, %v186_v38, 0.0  ;;  %v240_v20 = vmul.f32 0.071428575, %v200_v45 }
 0x108   :  { %v283_v47 = vsub.f32 1.5, %v282_v39  ;;  %229 = vadd.xlane.f32.xlu1 %v228_v46  ;;  %v4379_v49 = vpop.eup %3927  ;;  %v4383_v51 = vadd.f32 1e-05, %v244_v52 }
 0x109   :  { %v4381_v50 = vadd.f32 1e-05, %v239_v44  ;;  %v3930_v53 = vpop.eup %3929  ;;  %v310_v56 = vmul.f32 %v4379_v49, %v4370_v31  ;;  %v4387_v29 = vadd.f32 1e-05, %v240_v20  ;;  %vm316_vm9 = vweird.f32 %v4379_v49 }
 0x10a   :  { %v284_v55 = vmul.f32 %v3926_v28, %v283_v47  ;;  %v270_v57 = vmul.f32 %v3930_v53, %v253_v34  ;;  %vm276_vm5 = vweird.f32 %v3930_v53  ;;  %vm345_vm7 = vweird.f32 %v4383_v51 }
 0x10b   :  { %3931 = vrsqrt.f32 %v4381_v50  ;;  %v311_v27 = vmul.f32 %v4379_v49, %v310_v56  ;;  %vm4413_vm6 = vmor %vm275_vm4, %vm276_vm5  ;;  %vm305_vm13 = vweird.f32 %v4387_v29  ;;  %vm295_vm15 = vweird.f32 %v4381_v50 }
 0x10c   :  { %3933 = vrsqrt.f32 %v4387_v29  ;;  %v271_v60 = vmul.f32 %v3930_v53, %v270_v57  ;;  %v288_v61 = vsel %vm287_vm3, %v3926_v28, %v284_v55  ;;  %vm4500_vm3 = vmor %vm315_vm8, %vm316_vm9 }
 0x10d   :  { %3935 = vrsqrt.f32 %v4383_v51  ;;  %v430_v4 = vmul.f32 %v288_v61, %v4257_v48  ;;  %v4399_v7 = vmul.f32 0.5, %v311_v27 }
 0x10e   :  { %v121_v62 = vpop.xlane.xlu2 %120  ;;  %v272_v6 = vmul.f32 0.5, %v271_v60  ;;  %v206_v10 = vpop.xlane.xlu1 %205 }
 0x10f   :  { %v139_v9 = vmul.f32 0.071428575, %v121_v62  ;;  %v242_v12 = vmul.f32 0.071428575, %v206_v10  ;;  %v447_v13 = vmul.f32 %v4395_v59, %v430_v4  ;;  %v313_v25 = vsub.f32 1.5, %v4399_v7 }
 0x110   :  { %v273_v15 = vsub.f32 1.5, %v272_v6 }
 0x111   :  { %v4407_v14 = vpop.eup %3931  ;;  %v155_v16 = vsub.f32 %v4307_v30, %v139_v9  ;;  %v4420_v19 = vadd.f32 1e-05, %v242_v12  ;;  %v4430_v26 = vadd.f32 %v4404_v37, %v447_v13  ;;  %v4467_v9 = vld [vmem:[%s7462_s5] sm:$0xff] }
 0x112   :  { %v4410_v48 = vpop.eup %3933  ;;  %v290_v40 = vmul.f32 %v4407_v14, %v4381_v50  ;;  %v274_v24 = vmul.f32 %v3930_v53, %v273_v15  ;;  %vm296_vm10 = vweird.f32 %v4407_v14 }
 0x113   :  { %v4422_v23 = vpop.eup %3935  ;;  %v300_v30 = vmul.f32 %v4410_v48, %v4387_v29  ;;  %7498 = vst [vmem:[#allocation2_spill] sm:$0xff] %v4430_v26  ;;  %3937 = vrsqrt.f32 %v4420_v19  ;;  %vm306_vm11 = vweird.f32 %v4410_v48  ;;  %529 = vmatpush.msra.mxu0 %v4430_v26  ;;  %v4441_v34 = vmul.f32 %v4150_v1, %v155_v16  ;;  %vm297_vm2 = vmor %vm295_vm15, %vm296_vm10 }
 0x114   :  { %v291_v28 = vmul.f32 %v4407_v14, %v290_v40  ;;  %v340_v18 = vmul.f32 %v4422_v23, %v4383_v51  ;;  %v278_v36 = vsel %vm4413_vm6, %v3930_v53, %v274_v24  ;;  %vm346_vm12 = vweird.f32 %v4422_v23  ;;  %vm307_vm1 = vmor %vm305_vm13, %vm306_vm11 }
 0x115   :  { %v301_v32 = vmul.f32 %v4410_v48, %v300_v30  ;;  %v429_v44 = vmul.f32 %v278_v36, %v4276_v2  ;;  %v187_v1 = vmul.f32 %v4441_v34, %v4441_v34  ;;  %vm4475_vm14 = vmor %vm345_vm7, %vm346_vm12  ;;  %v314_v51 = vmul.f32 %v4379_v49, %v313_v25 }
 0x116   :  { %v292_v38 = vmul.f32 0.5, %v291_v28  ;;  %v341_v39 = vmul.f32 %v4422_v23, %v340_v18  ;;  %v215_v41 = vpop.xlane.xlu2 %214  ;;  %v221_v42 = vpop.xlane.xlu0 %220  ;;  %vm325_vm4 = vweird.f32 %v4420_v19 }
 0x117   :  { %v302_v45 = vmul.f32 0.5, %v301_v32  ;;  %v245_v52 = vmul.f32 0.071428575, %v215_v41  ;;  %v218_v46 = vpop.xlane.xlu1 %217  ;;  %v247_v47 = vmul.f32 0.071428575, %v221_v42  ;;  %v446_v53 = vmul.f32 %v4395_v59, %v429_v44  ;;  %v4534_v44 = vld [vmem:[%s7462_s5 + $0x8] sm:$0xff] }
 0x118   :  { %v293_v20 = vsub.f32 1.5, %v292_v38  ;;  %v342_v55 = vmul.f32 0.5, %v341_v39  ;;  %v246_v56 = vmul.f32 0.071428575, %v218_v46  ;;  %v231_v61 = vsel %vm76_vm0, %v187_v1, 0.0 }
 0x119   :  { %v303_v57 = vsub.f32 1.5, %v302_v45  ;;  %v4451_v27 = vadd.f32 1e-05, %v245_v52  ;;  %v4453_v60 = vadd.f32 1e-05, %v247_v47  ;;  %v4456_v2 = vpop.eup %3937  ;;  %232 = vadd.xlane.f32.xlu1 %v231_v61  ;;  %v4462_v7 = vadd.f32 %v4404_v37, %v446_v53 }
 0x11a   :  { %v294_v62 = vmul.f32 %v4407_v14, %v293_v20  ;;  %v343_v4 = vsub.f32 1.5, %v342_v55  ;;  %v4459_v6 = vadd.f32 1e-05, %v246_v56  ;;  %v320_v13 = vmul.f32 %v4456_v2, %v4420_v19 }
 0x11b   :  { %7499 = vst [vmem:[#allocation3_spill] sm:$0xff] %v4462_v7  ;;  %v304_v10 = vmul.f32 %v4410_v48, %v303_v57  ;;  %3939 = vrsqrt.f32 %v4451_v27  ;;  %530 = vmatpush.msra.mxu0 %v4462_v7  ;;  %vm326_vm5 = vweird.f32 %v4456_v2  ;;  %vm355_vm7 = vweird.f32 %v4451_v27 }
 0x11c   :  { %v344_v29 = vmul.f32 %v4422_v23, %v343_v4  ;;  %3941 = vrsqrt.f32 %v4459_v6  ;;  %v321_v15 = vmul.f32 %v4456_v2, %v320_v13  ;;  %3782 = vmatmul.msk.f32.vlgmr.msra.gmra.mxu0 %vm76_vm0, %v4467_v9  ;;  %v298_v25 = vsel %vm297_vm2, %v4407_v14, %v294_v62  ;;  %vm4544_vm6 = vmor %vm325_vm4, %vm326_vm5  ;;  %v55_v13 = vld [vmem:[%s7463_s3 + $0x10] sm:$0xff] }
 0x11d   :  { %3943 = vrsqrt.f32 %v4453_v60  ;;  %v308_v50 = vsel %vm307_vm1, %v4410_v48, %v304_v10  ;;  %v431_v31 = vmul.f32 %v298_v25, %v4285_v8  ;;  %vm365_vm8 = vweird.f32 %v4459_v6 }
 0x11e   :  { %v224_v17 = vpop.xlane.xlu2 %223  ;;  %v432_v40 = vmul.f32 %v308_v50, %v4290_v3  ;;  %v348_v24 = vsel %vm4475_vm14, %v4422_v23, %v344_v29  ;;  %v322_v30 = vmul.f32 0.5, %v321_v15  ;;  %vm375_vm13 = vweird.f32 %v4453_v60 }
 0x11f   :  { %v248_v28 = vmul.f32 0.071428575, %v224_v17  ;;  %v209_v48 = vpop.xlane.xlu1 %208  ;;  %v436_v18 = vmul.f32 %v348_v24, %v4297_v22  ;;  %v318_v22 = vsel %vm4500_vm3, %v4379_v49, %v314_v51  ;;  %v448_v45 = vmul.f32 %v4395_v59, %v431_v31 }
 0x120   :  { %v243_v32 = vmul.f32 0.071428575, %v209_v48  ;;  %v449_v3 = vmul.f32 %v4395_v59, %v432_v40  ;;  %v323_v38 = vsub.f32 1.5, %v322_v30  ;;  %v433_v19 = vmul.f32 %v318_v22, %v4273_v63  ;;  %v4609_v30 = vld [vmem:[%s7462_s5 + $0x10] sm:$0xff] }
 0x121   :  { %v4514_v36 = vpop.eup %3939  ;;  %v4516_v23 = vadd.f32 1e-05, %v248_v28  ;;  %v453_v14 = vmul.f32 %v4395_v59, %v436_v18  ;;  %v4568_v61 = vadd.f32 %v4404_v37, %v448_v45  ;;  %v4091_v17 = vmov 0  }
 0x122   :  { %v4522_v39 = vpop.eup %3941  ;;  %v350_v8 = vmul.f32 %v4514_v36, %v4451_v27  ;;  %v4526_v41 = vadd.f32 1e-05, %v243_v32  ;;  %v4529_v42 = vadd.f32 %v4404_v37, %v449_v3  ;;  %v324_v49 = vmul.f32 %v4456_v2, %v323_v38  ;;  %3918 = vset.pattern.permute.xlu0 %v4091_v17  ;;  %3919 = vset.pattern.permute.xlu1 %v4091_v17 }
 0x123   :  { %v4537_v52 = vpop.eup %3943  ;;  %v360_v47 = vmul.f32 %v4522_v39, %v4459_v6  ;;  %3945 = vrsqrt.f32 %v4516_v23  ;;  %vm356_vm9 = vweird.f32 %v4514_v36  ;;  %v4562_v56 = vadd.f32 %v4404_v37, %v453_v14  ;;  %7508 = vst [vmem:[#allocation6_spill] sm:$0xff] %v4568_v61  ;;  %495 = vperm.xlu0 %3918, %v55_v13   ;;  %3917 = vset.pattern.permute.xlu2 %v4091_v17 }
 0x124   :  { %7504 = vst [vmem:[#allocation4_spill] sm:$0xff] %v4529_v42  ;;  %v351_v1 = vmul.f32 %v4514_v36, %v350_v8  ;;  %v370_v20 = vmul.f32 %v4537_v52, %v4453_v60  ;;  %558 = vmatpush.msra.mxu1 %v4529_v42  ;;  %3947 = vrsqrt.f32 %v4526_v41  ;;  %3783 = vmatmul.msk.f32.gmra.mxu0 %vm76_vm0, %v4534_v44  ;;  %vm366_vm10 = vweird.f32 %v4522_v39  ;;  %vm4586_vm11 = vmor %vm355_vm7, %vm356_vm9  ;;  %v54_v60 = vld [vmem:[%s7463_s3 + $0x8] sm:$0xff] }
 0x125   :  { %v361_v55 = vmul.f32 %v4522_v39, %v360_v47  ;;  %7507 = vst [vmem:[#allocation5_spill] sm:$0xff] %v4562_v56  ;;  %v328_v63 = vsel %vm4544_vm6, %v4456_v2, %v324_v49  ;;  %616 = vmatpush.msra.mxu3 %v4562_v56  ;;  %vm4600_vm12 = vmor %vm365_vm8, %vm366_vm10  ;;  %v450_v6 = vmul.f32 %v4395_v59, %v433_v19  ;;  %vm376_vm14 = vweird.f32 %v4537_v52 }
 0x126   :  { %v352_v53 = vmul.f32 0.5, %v351_v1  ;;  %v371_v57 = vmul.f32 %v4537_v52, %v370_v20  ;;  %v236_v62 = vpop.xlane.xlu0 %235  ;;  %v434_v12 = vmul.f32 %v328_v63, %v4310_v0  ;;  %559 = vmatpush.msra.mxu1 %v4568_v61  ;;  %vm4634_vm15 = vmor %vm375_vm13, %vm376_vm14  ;;  %vm385_vm1 = vweird.f32 %v4516_v23 }
 0x127   :  { %v362_v4 = vmul.f32 0.5, %v361_v55  ;;  %v252_v10 = vmul.f32 0.071428575, %v236_v62  ;;  %3786 = vmatmul.msk.f32.vlgmr.msra.gmra.mxu1 %vm76_vm0, %v4467_v9  ;;  %vm335_vm3 = vweird.f32 %v4526_v41  ;;  %v4675_v62 = vld [vmem:[%s7462_s5 + $0x18] sm:$0xff] }
 0x128   :  { %v353_v29 = vsub.f32 1.5, %v352_v53  ;;  %v372_v51 = vmul.f32 0.5, %v371_v57  ;;  %v451_v16 = vmul.f32 %v4395_v59, %v434_v12 }
 0x129   :  { %v4580_v15 = vpop.eup %3945  ;;  %v363_v50 = vsub.f32 1.5, %v362_v4  ;;  %v4592_v0 = vadd.f32 1e-05, %v252_v10 }
 0x12a   :  { %v354_v40 = vmul.f32 %v4514_v36, %v353_v29  ;;  %v373_v24 = vsub.f32 1.5, %v372_v51  ;;  %v380_v25 = vmul.f32 %v4580_v15, %v4516_v23  ;;  %v3948_v28 = vpop.eup %3947  ;;  %v4620_v3 = vadd.f32 %v4404_v37, %v451_v16  ;;  %v56_v51 = vld [vmem:[%s7463_s3 + $0x18] sm:$0xff] }
 0x12b   :  { %v364_v48 = vmul.f32 %v4522_v39, %v363_v50  ;;  %v330_v32 = vmul.f32 %v3948_v28, %v4526_v41  ;;  %3949 = vrsqrt.f32 %v4592_v0  ;;  %vm386_vm2 = vweird.f32 %v4580_v15  ;;  %500 = vperm.xlu2 %3917, %v56_v51  }
 0x12c   :  { %v374_v18 = vmul.f32 %v4537_v52, %v373_v24  ;;  %v381_v31 = vmul.f32 %v4580_v15, %v380_v25  ;;  %7513 = vst [vmem:[#allocation7_spill] sm:$0xff] %v4620_v3  ;;  %3784 = vmatmul.msk.f32.gmra.mxu0 %vm76_vm0, %v4609_v30  ;;  %v358_v14 = vsel %vm4586_vm11, %v4514_v36, %v354_v40  ;;  %vm336_vm4 = vweird.f32 %v3948_v28  ;;  %vm4654_vm5 = vmor %vm385_vm1, %vm386_vm2  ;;  %v53_v40 = vld [vmem:[%s7463_s3] sm:$0xff] }
 0x12d   :  { %v368_v38 = vsel %vm4600_vm12, %v4522_v39, %v364_v48  ;;  %v331_v8 = vmul.f32 %v3948_v28, %v330_v32  ;;  %v437_v49 = vmul.f32 %v358_v14, %v4322_v43  ;;  %587 = vmatpush.msra.mxu2 %v4620_v3  ;;  %v4643_v36 = vadd.f32 %v4404_v37, %v450_v6  ;;  %vm4665_vm6 = vmor %vm335_vm3, %vm336_vm4 }
 0x12e   :  { %v382_v22 = vmul.f32 0.5, %v381_v31  ;;  %v438_v45 = vmul.f32 %v368_v38, %v4326_v21  ;;  %v378_v19 = vsel %vm4634_vm15, %v4537_v52, %v374_v18  ;;  %vm425_vm7 = vweird.f32 %v4592_v0 }
 0x12f   :  { %7516 = vst [vmem:[#allocation8_spill] sm:$0xff] %v4643_v36  ;;  %v332_v39 = vmul.f32 0.5, %v331_v8  ;;  %588 = vmatpush.msra.mxu2 %v4643_v36  ;;  %3787 = vmatmul.msk.f32.gmra.mxu1 %vm76_vm0, %v4534_v44  ;;  %v454_v23 = vmul.f32 %v4395_v59, %v437_v49  ;;  %v439_v10 = vmul.f32 %v378_v19, %v4336_v54 }
 0x130   :  { %v383_v21 = vsub.f32 1.5, %v382_v22  ;;  %v455_v43 = vmul.f32 %v4395_v59, %v438_v45  ;;  %3790 = vmatmul.msk.f32.vlgmr.msra.gmra.mxu2 %vm76_vm0, %v4467_v9 }
 0x131   :  { %v333_v20 = vsub.f32 1.5, %v332_v39  ;;  %v3950_v55 = vpop.eup %3949  ;;  %v4680_v41 = vadd.f32 %v4404_v37, %v454_v23  ;;  %v456_v50 = vmul.f32 %v4395_v59, %v439_v10  ;;  %v58_v23 = vld [vmem:[%s7464_s4 + $0x8] sm:$0xff] }
 0x132   :  { %v384_v47 = vmul.f32 %v4580_v15, %v383_v21  ;;  %v4670_v57 = vadd.f32 %v4404_v37, %v455_v43  ;;  %490 = vperm.xlu1 %3919, %v54_v60   ;;  %v420_v4 = vmul.f32 %v3950_v55, %v4592_v0  ;;  %vm426_vm8 = vweird.f32 %v3950_v55 }
 0x133   :  { %v334_v63 = vmul.f32 %v3948_v28, %v333_v20  ;;  %7522 = vst [vmem:[#allocation10_spill] sm:$0xff] %v4680_v41  ;;  %vm427_vm9 = vmor %vm425_vm7, %vm426_vm8  ;;  %v4716_v27 = vadd.f32 %v4404_v37, %v456_v50  ;;  %485 = vperm.xlu2 %3917, %v53_v40  }
 0x134   :  { %7521 = vst [vmem:[#allocation9_spill] sm:$0xff] %v4670_v57  ;;  %645 = vmatpush.msrb.mxu0 %v4670_v57  ;;  %v388_v52 = vsel %vm4654_vm5, %v4580_v15, %v384_v47  ;;  %v421_v12 = vmul.f32 %v3950_v55, %v420_v4 }
 0x135   :  { %3785 = vmatmul.msk.f32.gmra.mxu0 %vm76_vm0, %v4675_v62  ;;  %v338_v13 = vsel %vm4665_vm6, %v3948_v28, %v334_v63  ;;  %v440_v29 = vmul.f32 %v388_v52, %v4342_v33  ;;  %7525 = vst [vmem:[#allocation13_spill] sm:$0xff] %v4716_v27 }
 0x136   :  { %646 = vmatpush.msrb.mxu0 %v4680_v41  ;;  %v435_v2 = vmul.f32 %v338_v13, %v4346_v58  ;;  %v422_v15 = vmul.f32 0.5, %v421_v12 }
 0x137   :  { %v457_v54 = vmul.f32 %v4395_v59, %v440_v29  ;;  %3788 = vmatmul.msk.f32.gmra.mxu1 %vm76_vm0, %v4609_v30 }
 0x138   :  { %v452_v33 = vmul.f32 %v4395_v59, %v435_v2  ;;  %v423_v16 = vsub.f32 1.5, %v422_v15  ;;  %3791 = vmatmul.msk.f32.gmra.mxu2 %vm76_vm0, %v4534_v44 }
 0x139   :  { %v4705_v58 = vadd.f32 %v4404_v37, %v457_v54  ;;  %v57_v54 = vld [vmem:[%s7464_s4] sm:$0xff] }
 0x13a   :  { %v4708_v0 = vadd.f32 %v4404_v37, %v452_v33  ;;  %v424_v17 = vmul.f32 %v3950_v55, %v423_v16  ;;  %2371 = vperm.xlu1 %3919, %v58_v23  }
 0x13b   :  { %7523 = vst [vmem:[#allocation11_spill] sm:$0xff] %v4705_v58  ;;  %674 = vmatpush.msrb.mxu1 %v4705_v58  ;;  %2366 = vperm.xlu2 %3917, %v57_v54  }
 0x13c   :  { %7524 = vst [vmem:[#allocation12_spill] sm:$0xff] %v4708_v0  ;;  %617 = vmatpush.msra.mxu3 %v4708_v0  ;;  %v428_v24 = vsel %vm427_vm9, %v3950_v55, %v424_v17 }
 0x13d   :  { %3794 = vmatmul.msk.f32.vlgmr.msra.gmra.mxu3 %vm76_vm0, %v4467_v9  ;;  %3798 = vmatmul.msk.f32.vlgmr.msrb.gmra.mxu0 %vm76_vm0, %v4467_v9  ;;  %v444_v25 = vmul.f32 %v428_v24, %v4363_v11  ;;  %v227_v11 = vpop.xlane.xlu2 %226 }
 0x13e   :  { %675 = vmatpush.msrb.mxu1 %v4716_v27  ;;  %v249_v6 = vmul.f32 0.071428575, %v227_v11 }
 0x13f   :  { %3789 = vmatmul.msk.f32.gmra.mxu1 %vm76_vm0, %v4675_v62  ;;  %v461_v28 = vmul.f32 %v4395_v59, %v444_v25 }
 0x140   :  { %3792 = vmatmul.msk.f32.gmra.mxu2 %vm76_vm0, %v4609_v30  ;;  %v265_v18 = vadd.f32 1e-05, %v249_v6 }
 0x141   :  { %v4730_v48 = vadd.f32 %v4404_v37, %v461_v28 }
 0x142   :  { %3951 = vrsqrt.f32 %v265_v18  ;;  %vm395_vm10 = vweird.f32 %v265_v18 }
 0x143   :  { %7526 = vst [vmem:[#allocation14_spill] sm:$0xff] %v4730_v48  ;;  %732 = vmatpush.msrb.mxu3 %v4730_v48 }
 0x145   :  { %3795 = vmatmul.msk.f32.gmra.mxu3 %vm76_vm0, %v4534_v44  ;;  %3799 = vmatmul.msk.f32.gmra.mxu0 %vm76_vm0, %v4534_v44 }
 0x147   :  { %3802 = vmatmul.msk.f32.vlgmr.msrb.gmra.mxu1 %vm76_vm0, %v4467_v9 }
 0x148   :  { %3793 = vmatmul.msk.f32.gmra.mxu2 %vm76_vm0, %v4675_v62  ;;  %v3952_v31 = vpop.eup %3951 }
 0x149   :  { %v390_v32 = vmul.f32 %v3952_v31, %v265_v18  ;;  %vm396_vm11 = vweird.f32 %v3952_v31 }
 0x14a   :  { %vm397_vm12 = vmor %vm395_vm10, %vm396_vm11 }
 0x14b   :  { %v391_v22 = vmul.f32 %v3952_v31, %v390_v32 }
 0x14d   :  { %3796 = vmatmul.msk.f32.gmra.mxu3 %vm76_vm0, %v4609_v30  ;;  %3800 = vmatmul.msk.f32.gmra.mxu0 %vm76_vm0, %v4609_v30  ;;  %v392_v45 = vmul.f32 0.5, %v391_v22 }
 0x14f   :  { %3803 = vmatmul.msk.f32.gmra.mxu1 %vm76_vm0, %v4534_v44  ;;  %v393_v49 = vsub.f32 1.5, %v392_v45 }
 0x151   :  { %v394_v39 = vmul.f32 %v3952_v31, %v393_v49 }
 0x153   :  { %v398_v20 = vsel %vm397_vm12, %v3952_v31, %v394_v39 }
 0x154   :  { %v441_v63 = vmul.f32 %v398_v20, %v4356_v5 }
 0x155   :  { %3797 = vmatmul.msk.f32.gmra.mxu3 %vm76_vm0, %v4675_v62  ;;  %3801 = vmatmul.msk.f32.gmra.mxu0 %vm76_vm0, %v4675_v62 }
 0x156   :  { %v458_v12 = vmul.f32 %v4395_v59, %v441_v63 }
 0x157   :  { %3804 = vmatmul.msk.f32.gmra.mxu1 %vm76_vm0, %v4609_v30 }
 0x158   :  { %v4767_v51 = vadd.f32 %v4404_v37, %v458_v12 }
 0x15a   :  { %7528 = vst [vmem:[#allocation16_spill] sm:$0xff] %v4767_v51 }
 0x15f   :  { %3805 = vmatmul.msk.f32.gmra.mxu1 %vm76_vm0, %v4675_v62 }
 0x17b   :  { %v230_v38 = vpop.xlane.xlu1 %229 }
 0x17c   :  { %v250_v14 = vmul.f32 0.071428575, %v230_v38 }
 0x17e   :  { %v266_v8 = vadd.f32 1e-05, %v250_v14 }
 0x180   :  { %3953 = vrsqrt.f32 %v266_v8  ;;  %vm405_vm14 = vweird.f32 %v266_v8 }
 0x186   :  { %v3954_v46 = vpop.eup %3953 }
 0x187   :  { %v400_v21 = vmul.f32 %v3954_v46, %v266_v8  ;;  %vm406_vm13 = vweird.f32 %v3954_v46 }
 0x188   :  { %vm407_vm15 = vmor %vm405_vm14, %vm406_vm13 }
 0x189   :  { %v401_v43 = vmul.f32 %v3954_v46, %v400_v21 }
 0x18b   :  { %v402_v60 = vmul.f32 0.5, %v401_v43 }
 0x18c   :  { %v233_v1 = vpop.xlane.xlu1 %232 }
 0x18d   :  { %v403_v47 = vsub.f32 1.5, %v402_v60  ;;  %v251_v19 = vmul.f32 0.071428575, %v233_v1 }
 0x18f   :  { %v404_v55 = vmul.f32 %v3954_v46, %v403_v47  ;;  %v267_v53 = vadd.f32 1e-05, %v251_v19 }
 0x191   :  { %v408_v4 = vsel %vm407_vm15, %v3954_v46, %v404_v55  ;;  %3955 = vrsqrt.f32 %v267_v53  ;;  %vm415_vm2 = vweird.f32 %v267_v53 }
 0x192   :  { %v442_v52 = vmul.f32 %v408_v4, %v4374_v35 }
 0x194   :  { %v459_v10 = vmul.f32 %v4395_v59, %v442_v52 }
 0x196   :  { %v4763_v13 = vadd.f32 %v4404_v37, %v459_v10 }
 0x197   :  { %v3956_v29 = vpop.eup %3955 }
 0x198   :  { %7527 = vst [vmem:[#allocation15_spill] sm:$0xff] %v4763_v13  ;;  %703 = vmatpush.msrb.mxu2 %v4763_v13  ;;  %v410_v2 = vmul.f32 %v3956_v29, %v267_v53  ;;  %vm416_vm1 = vweird.f32 %v3956_v29 }
 0x199   :  { %v4769_v15 = vpop.f32.mrf.mxu0  ;;  %vm417_vm3 = vmor %vm415_vm2, %vm416_vm1 }
 0x19a   :  { %704 = vmatpush.msrb.mxu2 %v4767_v51  ;;  %v411_v5 = vmul.f32 %v3956_v29, %v410_v2 }
 0x19b   :  { %3806 = vmatmul.msk.f32.vlgmr.msrb.gmra.mxu2 %vm76_vm0, %v4467_v9 }
 0x19c   :  { %v412_v35 = vmul.f32 0.5, %v411_v5 }
 0x19e   :  { %v413_v33 = vsub.f32 1.5, %v412_v35 }
 0x1a0   :  { %v414_v50 = vmul.f32 %v3956_v29, %v413_v33 }
 0x1a1   :  { %v4777_v16 = vpop.f32.mrf.mxu0 }
 0x1a2   :  { %v418_v17 = vsel %vm417_vm3, %v3956_v29, %v414_v50 }
 0x1a3   :  { %3807 = vmatmul.msk.f32.gmra.mxu2 %vm76_vm0, %v4534_v44  ;;  %v443_v40 = vmul.f32 %v418_v17, %v4441_v34  ;;  %v4797_v34 = vpop.permute.xlu2 %500 }
 0x1a4   :  { %v4782_v24 = vpop.f32.mrf.mxu1  ;;  %7530 = vst [vmem:[#allocation18_spill] sm:$0xff] %v4797_v34  ;;  %v4817_v22 = vpop.permute.xlu1 %490 }
 0x1a5   :  { %v460_v25 = vmul.f32 %v4395_v59, %v443_v40  ;;  %7531 = vst [vmem:[#allocation19_spill] sm:$0xff] %v4817_v22 }
 0x1a7   :  { %v4786_v28 = vadd.f32 %v4404_v37, %v460_v25 }
 0x1a9   :  { %7529 = vst [vmem:[#allocation17_spill] sm:$0xff] %v4786_v28  ;;  %733 = vmatpush.msrb.mxu3 %v4786_v28  ;;  %v4789_v11 = vpop.f32.mrf.mxu0 }
 0x1aa   :  { %3810 = vmatmul.msk.f32.vlgmr.msrb.gmra.mxu3 %vm76_vm0, %v4467_v9 }
 0x1ab   :  { %3808 = vmatmul.msk.f32.gmra.mxu2 %vm76_vm0, %v4609_v30  ;;  %v4837_v63 = vpop.permute.xlu2 %485 }
 0x1ac   :  { %v4795_v6 = vpop.f32.mrf.mxu1 }
 0x1b2   :  { %v541_v18 = vpop.f32.mrf.mxu0  ;;  %3811 = vmatmul.msk.f32.gmra.mxu3 %vm76_vm0, %v4534_v44 }
 0x1b3   :  { %3809 = vmatmul.msk.f32.gmra.mxu2 %vm76_vm0, %v4675_v62  ;;  %v4804_v59 = vadd.f32 %v541_v18, %v4797_v34  ;;  %v4806_v37 = vpop.f32.mrf.mxu2 }
 0x1b4   :  { %v4811_v31 = vpop.f32.mrf.mxu1 }
 0x1b5   :  { %v4809_v9 = vmul.f32 0.70710677, %v4804_v59 }
 0x1b7   :  { %v931_v32 = vmul.f32 %v4809_v9, %v4809_v9 }
 0x1b9   :  { %v932_v38 = vmin.f32 %v931_v32, 16.0 }
 0x1ba   :  { %3812 = vmatmul.msk.f32.gmra.mxu3 %vm76_vm0, %v4609_v30  ;;  %v648_v52 = vpop.f32.mrf.mxu0 }
 0x1bb   :  { %v933_v44 = vmul.f32 2.1237322e-06, %v932_v38  ;;  %v944_v14 = vmul.f32 3.8918573e-05, %v932_v38  ;;  %v593_v8 = vpop.f32.mrf.mxu2  ;;  %v4842_v10 = vadd.f32 %v648_v52, %v4837_v63 }
 0x1bc   :  { %v4820_v46 = vadd.f32 %v593_v8, %v4817_v22  ;;  %v570_v21 = vpop.f32.mrf.mxu1 }
 0x1bd   :  { %v934_v45 = vadd.f32 0.00028619796, %v933_v44  ;;  %v945_v49 = vadd.f32 0.001143296, %v944_v14  ;;  %v4823_v39 = vadd.f32 %v570_v21, %v4797_v34  ;;  %v4848_v35 = vmul.f32 0.70710677, %v4842_v10 }
 0x1be   :  { %v4826_v23 = vmul.f32 0.70710677, %v4820_v46 }
 0x1bf   :  { %v935_v43 = vmul.f32 %v934_v45, %v932_v38  ;;  %v946_v60 = vmul.f32 %v945_v49, %v932_v38  ;;  %v4829_v30 = vmul.f32 0.70710677, %v4823_v39  ;;  %v1451_v50 = vmul.f32 %v4848_v35, %v4848_v35 }
 0x1c0   :  { %v1171_v20 = vmul.f32 %v4826_v23, %v4826_v23 }
 0x1c1   :  { %v936_v47 = vadd.f32 0.0036580483, %v935_v43  ;;  %v947_v1 = vadd.f32 0.014752088, %v946_v60  ;;  %v1091_v19 = vmul.f32 %v4829_v30, %v4829_v30  ;;  %v4855_v44 = vmin.f32 %v1451_v50, 16.0 }
 0x1c2   :  { %3813 = vmatmul.msk.f32.gmra.mxu3 %vm76_vm0, %v4675_v62  ;;  %v4839_v4 = vmin.f32 %v1171_v20, 16.0 }
 0x1c3   :  { %v937_v55 = vmul.f32 %v936_v47, %v932_v38  ;;  %v948_v53 = vmul.f32 %v947_v1, %v932_v38  ;;  %v4844_v12 = vmin.f32 %v1091_v19, 16.0  ;;  %v1464_v45 = vmul.f32 3.8918573e-05, %v4855_v44 }
 0x1c4   :  { %v1184_v2 = vmul.f32 3.8918573e-05, %v4839_v4  ;;  %v1173_v43 = vmul.f32 2.1237322e-06, %v4839_v4 }
 0x1c5   :  { %v949_v29 = vadd.f32 0.112945676, %v948_v53  ;;  %v938_v5 = vadd.f32 0.05243302, %v937_v55  ;;  %v1093_v33 = vmul.f32 2.1237322e-06, %v4844_v12 }
 0x1c6   :  { %v1185_v54 = vadd.f32 0.001143296, %v1184_v2  ;;  %v1104_v17 = vmul.f32 3.8918573e-05, %v4844_v12  ;;  %v1465_v20 = vadd.f32 0.001143296, %v1464_v45 }
 0x1c7   :  { %v950_v62 = vmul.f32 %v949_v29, %v932_v38  ;;  %v1094_v18 = vadd.f32 0.00028619796, %v1093_v33  ;;  %v939_v32 = vmul.f32 %v938_v5, %v932_v38  ;;  %v4864_v5 = vpop.permute.xlu0 %495 }
 0x1c8   :  { %v1186_v25 = vmul.f32 %v1185_v54, %v4839_v4  ;;  %v1105_v14 = vadd.f32 0.001143296, %v1104_v17  ;;  %v1466_v53 = vmul.f32 %v1465_v20, %v4855_v44  ;;  %7532 = vst [vmem:[#allocation20_spill] sm:$0xff] %v4864_v5  ;;  %v1453_v54 = vmul.f32 2.1237322e-06, %v4855_v44  ;;  %v619_v17 = vpop.f32.mrf.mxu3 }
 0x1c9   :  { %v951_v40 = vadd.f32 0.4994258, %v950_v62  ;;  %v1095_v49 = vmul.f32 %v1094_v18, %v4844_v12  ;;  %v940_v1 = vadd.f32 0.18741608, %v939_v32  ;;  %v1174_v62 = vadd.f32 0.00028619796, %v1173_v43 }
 0x1ca   :  { %v1187_v60 = vadd.f32 0.014752088, %v1186_v25  ;;  %v1106_v47 = vmul.f32 %v1105_v14, %v4844_v12  ;;  %v1467_v33 = vadd.f32 0.014752088, %v1466_v53  ;;  %v4869_v25 = vadd.f32 %v619_v17, %v4837_v63 }
 0x1cb   :  { %v952_v8 = vmul.f32 %v951_v40, %v932_v38  ;;  %v1096_v19 = vadd.f32 0.0036580483, %v1095_v49  ;;  %v941_v2 = vmul.f32 %v940_v1, %v932_v38  ;;  %v596_v40 = vpop.f32.mrf.mxu2 }
 0x1cc   :  { %v1188_v55 = vmul.f32 %v1187_v60, %v4839_v4  ;;  %v1107_v29 = vadd.f32 0.014752088, %v1106_v47  ;;  %v4872_v18 = vadd.f32 %v596_v40, %v4864_v5  ;;  %v1468_v38 = vmul.f32 %v1467_v33, %v4855_v44 }
 0x1cd   :  { %v953_v21 = vadd.f32 1.0, %v952_v8  ;;  %v1097_v52 = vmul.f32 %v1096_v19, %v4844_v12  ;;  %v942_v49 = vadd.f32 1.1283791, %v941_v2  ;;  %v1175_v60 = vmul.f32 %v1174_v62, %v4839_v4 }
 0x1ce   :  { %v1108_v50 = vmul.f32 %v1107_v29, %v4844_v12  ;;  %v1189_v14 = vadd.f32 0.112945676, %v1188_v55  ;;  %v1454_v47 = vadd.f32 0.00028619796, %v1453_v54  ;;  %v1469_v20 = vadd.f32 0.112945676, %v1468_v38 }
 0x1cf   :  { %3957 = vrcp.f32 %v953_v21  ;;  %v1098_v8 = vadd.f32 0.05243302, %v1097_v52  ;;  %vm959_vm4 = vweird.f32 %v953_v21  ;;  %v965_v1 = vand.u32 2147483648, %v953_v21 }
 0x1d0   :  { %v1109_v45 = vadd.f32 0.112945676, %v1108_v50  ;;  %v963_v29 = vand.u32 2147483647, %v953_v21  ;;  %v4878_v17 = vmul.f32 0.70710677, %v4869_v25  ;;  %v1190_v55 = vmul.f32 %v1189_v14, %v4839_v4 }
 0x1d1   :  { %v1099_v52 = vmul.f32 %v1098_v8, %v4844_v12  ;;  %v1470_v62 = vmul.f32 %v1469_v20, %v4855_v44  ;;  %v4884_v54 = vmul.f32 0.70710677, %v4872_v18  ;;  %v943_v50 = vmul.f32 %v942_v49, %v4809_v9 }
 0x1d2   :  { %v1110_v19 = vmul.f32 %v1109_v45, %v4844_v12  ;;  %v966_v40 = vor.u32 1.1754944e-38, %v965_v1  ;;  %v1176_v38 = vadd.f32 0.0036580483, %v1175_v60  ;;  %vm964_vm7 = vcmp.eq.f32.partialorder %v963_v29, 8.507059e+37 }
 0x1d3   :  { %v1455_v14 = vmul.f32 %v1454_v47, %v4855_v44  ;;  %v1291_v8 = vmul.f32 %v4878_v17, %v4878_v17  ;;  %v1100_v20 = vadd.f32 0.18741608, %v1099_v52  ;;  %v1471_v56 = vadd.f32 0.4994258, %v1470_v62  ;;  %v651_v62 = vpop.f32.mrf.mxu0 }
 0x1d4   :  { %v1111_v2 = vadd.f32 0.4994258, %v1110_v19  ;;  %v1191_v19 = vadd.f32 0.4994258, %v1190_v55  ;;  %v1211_v29 = vmul.f32 %v4884_v54, %v4884_v54  ;;  %v750_v55 = vmul.f32 0.5, %v4804_v59 }
 0x1d5   :  { %v3958_v32 = vpop.eup %3957  ;;  %v1456_v49 = vadd.f32 0.0036580483, %v1455_v14  ;;  %v4893_v60 = vmin.f32 %v1291_v8, 16.0  ;;  %v1101_v47 = vmul.f32 %v1100_v20, %v4844_v12 }
 0x1d6   :  { %v955_v43 = vmul.f32 %v3958_v32, %v953_v21  ;;  %vm960_vm5 = vweird.f32 %v3958_v32  ;;  %v1112_v45 = vmul.f32 %v1111_v2, %v4844_v12  ;;  %v1177_v21 = vmul.f32 %v1176_v38, %v4839_v4 }
 0x1d7   :  { %vm961_vm6 = vmor %vm959_vm4, %vm960_vm5  ;;  %v1192_v1 = vmul.f32 %v1191_v19, %v4839_v4  ;;  %v1102_v38 = vadd.f32 1.1283791, %v1101_v47  ;;  %v4905_v12 = vmin.f32 %v1211_v29, 16.0  ;;  %v1293_v19 = vmul.f32 2.1237322e-06, %v4893_v60 }
 0x1d8   :  { %v956_v53 = vsub.f32 1.0, %v955_v43  ;;  %v1178_v2 = vadd.f32 0.05243302, %v1177_v21 }
 0x1d9   :  { %v1224_v21 = vmul.f32 3.8918573e-05, %v4905_v12  ;;  %v1213_v29 = vmul.f32 2.1237322e-06, %v4905_v12 }
 0x1da   :  { %v957_v33 = vmul.f32 %v3958_v32, %v956_v53  ;;  %v1113_v53 = vadd.f32 1.0, %v1112_v45  ;;  %v4908_v45 = vadd.f32 %v651_v62, %v4817_v22  ;;  %v1294_v62 = vadd.f32 0.00028619796, %v1293_v19 }
 0x1dc   :  { %v958_v43 = vadd.f32 %v3958_v32, %v957_v33  ;;  %3959 = vrcp.f32 %v1113_v53  ;;  %v1304_v33 = vmul.f32 3.8918573e-05, %v4893_v60  ;;  %v1123_v14 = vand.u32 2147483647, %v1113_v53 }
 0x1dd   :  { %vm1119_vm8 = vweird.f32 %v1113_v53  ;;  %v1125_v8 = vand.u32 2147483648, %v1113_v53 }
 0x1de   :  { %v962_v48 = vsel %vm961_vm6, %v3958_v32, %v958_v43  ;;  %v1472_v32 = vmul.f32 %v1471_v56, %v4855_v44  ;;  %v1305_v20 = vadd.f32 0.001143296, %v1304_v33  ;;  %vm4928_vm11 = vcmp.eq.f32.partialorder %v1123_v14, 8.507059e+37 }
 0x1df   :  { %v967_v28 = vsel %vm964_vm7, %v966_v40, %v962_v48  ;;  %v4903_v40 = vadd.f32 1.0, %v1192_v1  ;;  %v1179_v1 = vmul.f32 %v1178_v2, %v4839_v4  ;;  %v1126_v2 = vor.u32 1.1754944e-38, %v1125_v8 }
 0x1e0   :  { %v968_v9 = vmul.f32 %v967_v28, %v943_v50  ;;  %v1457_v28 = vmul.f32 %v1456_v49, %v4855_v44  ;;  %v4910_v43 = vadd.f32 1.0, %v1472_v32  ;;  %v4915_v49 = vmul.f32 0.70710677, %v4908_v45 }
 0x1e1   :  { %3961 = vrcp.f32 %v4903_v40  ;;  %v1306_v47 = vmul.f32 %v1305_v20, %v4893_v60  ;;  %vm1199_vm12 = vweird.f32 %v4903_v40 }
 0x1e2   :  { %v3817_v52 = vclamps-f32 %v968_v9, 1.0  ;;  %v3960_v50 = vpop.eup %3959  ;;  %3963 = vrcp.f32 %v4910_v43  ;;  %v1491_v0 = vmul.f32 %v4915_v49, %v4915_v49  ;;  %vm1479_vm15 = vweird.f32 %v4910_v43 }
 0x1e3   :  { %v1115_v56 = vmul.f32 %v3960_v50, %v1113_v53  ;;  %vm1120_vm9 = vweird.f32 %v3960_v50 }
 0x1e4   :  { %v2094_v48 = vadd.f32 1.0, %v3817_v52  ;;  %v1103_v52 = vmul.f32 %v1102_v38, %v4829_v30  ;;  %vm4924_vm10 = vmor %vm1119_vm8, %vm1120_vm9  ;;  %v1214_v38 = vadd.f32 0.00028619796, %v1213_v29 }
 0x1e5   :  { %v1116_v9 = vsub.f32 1.0, %v1115_v56  ;;  %v677_v56 = vpop.f32.mrf.mxu1 }
 0x1e6   :  { %v2126_v59 = vmul.f32 %v2094_v48, %v750_v55  ;;  %v1458_v55 = vadd.f32 0.05243302, %v1457_v28  ;;  %v1225_v28 = vadd.f32 0.001143296, %v1224_v21  ;;  %v4935_v30 = vadd.f32 %v677_v56, %v4837_v63 }
 0x1e7   :  { %v1117_v32 = vmul.f32 %v3960_v50, %v1116_v9  ;;  %v1180_v9 = vadd.f32 0.18741608, %v1179_v1  ;;  %v4941_v19 = vpop.eup %3961  ;;  %v4949_v1 = vmin.f32 %v1491_v0, 16.0 }
 0x1e8   :  { %2176 = vmatpush.msra.mxu0 %v2126_v59  ;;  %v1307_v59 = vadd.f32 0.014752088, %v1306_v47  ;;  %7537 = vst [vmem:[#allocation21_spill] sm:$0xff] %v4935_v30  ;;  %v1226_v8 = vmul.f32 %v1225_v28, %v4905_v12  ;;  %v1459_v47 = vmul.f32 %v1458_v55, %v4855_v44  ;;  %v4947_v3 = vpop.eup %3963  ;;  %v754_v55 = vmul.f32 0.5, %v4823_v39 }
 0x1e9   :  { %v1118_v20 = vadd.f32 %v3960_v50, %v1117_v32  ;;  %v1295_v32 = vmul.f32 %v1294_v62, %v4893_v60  ;;  %v1493_v62 = vmul.f32 2.1237322e-06, %v4949_v1  ;;  %v4960_v28 = vmul.f32 0.5, %v4820_v46 }
 0x1ea   :  { %v1308_v53 = vmul.f32 %v1307_v59, %v4893_v60  ;;  %v1227_v29 = vadd.f32 0.014752088, %v1226_v8  ;;  %v1181_v0 = vmul.f32 %v1180_v9, %v4839_v4  ;;  %v1504_v46 = vmul.f32 3.8918573e-05, %v4949_v1 }
 0x1eb   :  { %v1122_v14 = vsel %vm4924_vm10, %v3960_v50, %v1118_v20  ;;  %v4952_v50 = vmul.f32 0.70710677, %v4935_v30  ;;  %v1215_v20 = vmul.f32 %v1214_v38, %v4905_v12  ;;  %v1475_v38 = vmul.f32 %v4947_v3, %v4910_v43 }
 0x1ec   :  { %v1127_v21 = vsel %vm4928_vm11, %v1126_v2, %v1122_v14  ;;  %v1309_v56 = vadd.f32 0.112945676, %v1308_v53  ;;  %v1228_v2 = vmul.f32 %v1227_v29, %v4905_v12  ;;  %v1460_v14 = vadd.f32 0.18741608, %v1459_v47 }
 0x1ed   :  { %v1128_v59 = vmul.f32 %v1127_v21, %v1103_v52  ;;  %v1195_v52 = vmul.f32 %v4941_v19, %v4903_v40  ;;  %v1296_v21 = vadd.f32 0.0036580483, %v1295_v32  ;;  %v1611_v39 = vmul.f32 %v4952_v50, %v4952_v50 }
 0x1ee   :  { %v1310_v48 = vmul.f32 %v1309_v56, %v4893_v60  ;;  %v4972_v4 = vmul.f32 0.5, %v4842_v10  ;;  %v1229_v29 = vadd.f32 0.112945676, %v1228_v2  ;;  %v1203_v32 = vand.u32 2147483647, %v4903_v40 }
 0x1ef   :  { %v3821_v33 = vclamps-f32 %v1128_v59, 1.0  ;;  %v1216_v59 = vadd.f32 0.0036580483, %v1215_v20  ;;  %v1196_v47 = vsub.f32 1.0, %v1195_v52  ;;  %v4977_v13 = vmin.f32 %v1611_v39, 16.0 }
 0x1f0   :  { %v1311_v53 = vadd.f32 0.4994258, %v1310_v48  ;;  %7538 = vst [vmem:[#allocation22_spill] sm:$0xff] %v4972_v4  ;;  %v1494_v48 = vadd.f32 0.00028619796, %v1493_v62  ;;  %v1461_v51 = vmul.f32 %v1460_v14, %v4855_v44  ;;  %v1297_v20 = vmul.f32 %v1296_v21, %v4893_v60  ;;  %v622_v62 = vpop.f32.mrf.mxu3 }
 0x1f1   :  { %v2098_v8 = vadd.f32 1.0, %v3821_v33  ;;  %v1182_v36 = vadd.f32 1.1283791, %v1181_v0  ;;  %v1205_v10 = vand.u32 2147483648, %v4903_v40  ;;  %v1217_v2 = vmul.f32 %v1216_v59, %v4905_v12 }
 0x1f2   :  { %v1312_v56 = vmul.f32 %v1311_v53, %v4893_v60  ;;  %v1505_v53 = vadd.f32 0.001143296, %v1504_v46  ;;  %v1230_v52 = vmul.f32 %v1229_v29, %v4905_v12  ;;  %v4988_v44 = vadd.f32 %v622_v62, %v4817_v22 }
 0x1f3   :  { %v2130_v9 = vmul.f32 %v2098_v8, %v754_v55  ;;  %v1476_v55 = vsub.f32 1.0, %v1475_v38  ;;  %v1495_v8 = vmul.f32 %v1494_v48, %v4949_v1  ;;  %v1197_v14 = vmul.f32 %v4941_v19, %v1196_v47 }
 0x1f4   :  { %v4975_v33 = vadd.f32 1.0, %v1312_v56  ;;  %v1506_v0 = vmul.f32 %v1505_v53, %v4949_v1  ;;  %vm4991_vm13 = vcmp.eq.f32.partialorder %v1203_v32, 8.507059e+37  ;;  %v1624_v39 = vmul.f32 3.8918573e-05, %v4977_v13 }
 0x1f5   :  { %2199 = vmatpush.msra.mxu1 %v2130_v9  ;;  %vm1200_vm14 = vweird.f32 %v4941_v19  ;;  %v1462_v38 = vadd.f32 1.1283791, %v1461_v51  ;;  %v1298_v56 = vadd.f32 0.05243302, %v1297_v20  ;;  %v1613_v59 = vmul.f32 2.1237322e-06, %v4977_v13 }
 0x1f6   :  { %3965 = vrcp.f32 %v4975_v33  ;;  %v1477_v46 = vmul.f32 %v4947_v3, %v1476_v55  ;;  %v1218_v9 = vadd.f32 0.05243302, %v1217_v2  ;;  %v1507_v29 = vadd.f32 0.014752088, %v1506_v0  ;;  %vm5012_vm2 = vmor %vm1199_vm12, %vm1200_vm14 }
 0x1f7   :  { %v1625_v48 = vadd.f32 0.001143296, %v1624_v39  ;;  %v1183_v47 = vmul.f32 %v1182_v36, %v4826_v23  ;;  %v1231_v32 = vadd.f32 0.4994258, %v1230_v52  ;;  %v1496_v53 = vadd.f32 0.0036580483, %v1495_v8 }
 0x1f8   :  { %v5002_v62 = vmul.f32 0.70710677, %v4988_v44  ;;  %v1198_v42 = vadd.f32 %v4941_v19, %v1197_v14  ;;  %vm1480_vm1 = vweird.f32 %v4947_v3  ;;  %v1508_v51 = vmul.f32 %v1507_v29, %v4949_v1 }
 0x1f9   :  { %v1206_v36 = vor.u32 1.1754944e-38, %v1205_v10  ;;  %v1485_v23 = vand.u32 2147483648, %v4910_v43  ;;  %v1614_v55 = vadd.f32 0.00028619796, %v1613_v59  ;;  %v1626_v2 = vmul.f32 %v1625_v48, %v4977_v13  ;;  %vm5023_vm3 = vmor %vm1479_vm15, %vm1480_vm1 }
 0x1fa   :  { %v1478_v8 = vadd.f32 %v4947_v3, %v1477_v46  ;;  %v1483_v0 = vand.u32 2147483647, %v4910_v43  ;;  %v1299_v14 = vmul.f32 %v1298_v56, %v4893_v60  ;;  %v1509_v39 = vadd.f32 0.112945676, %v1508_v51 }
 0x1fb   :  { %v1219_v10 = vmul.f32 %v1218_v9, %v4905_v12  ;;  %v1232_v29 = vmul.f32 %v1231_v32, %v4905_v12  ;;  %v1497_v59 = vmul.f32 %v1496_v53, %v4949_v1  ;;  %v1331_v48 = vmul.f32 %v5002_v62, %v5002_v62  ;;  %v599_v53 = vpop.f32.mrf.mxu2 }
 0x1fc   :  { %v5018_v52 = vpop.eup %3965  ;;  %v1202_v43 = vsel %vm5012_vm2, %v4941_v19, %v1198_v42  ;;  %v1463_v56 = vmul.f32 %v1462_v38, %v4848_v35  ;;  %v1510_v46 = vmul.f32 %v1509_v39, %v4949_v1  ;;  %v1627_v51 = vadd.f32 0.014752088, %v1626_v2 }
 0x1fd   :  { %v1486_v58 = vor.u32 1.1754944e-38, %v1485_v23  ;;  %v1315_v9 = vmul.f32 %v5018_v52, %v4975_v33  ;;  %v1615_v32 = vmul.f32 %v1614_v55, %v4977_v13  ;;  %v5040_v27 = vmin.f32 %v1331_v48, 16.0 }
 0x1fe   :  { %v1482_v61 = vsel %vm5023_vm3, %v4947_v3, %v1478_v8  ;;  %vm1484_vm4 = vcmp.eq.f32.partialorder %v1483_v0, 8.507059e+37  ;;  %v1300_v42 = vadd.f32 0.18741608, %v1299_v14  ;;  %v1511_v19 = vadd.f32 0.4994258, %v1510_v46 }
 0x1ff   :  { %v1207_v35 = vsel %vm4991_vm13, %v1206_v36, %v1202_v43  ;;  %v1220_v38 = vadd.f32 0.18741608, %v1219_v10  ;;  %v5047_v20 = vadd.f32 1.0, %v1232_v29  ;;  %v1498_v23 = vadd.f32 0.05243302, %v1497_v59 }
 0x200   :  { %v1512_v2 = vmul.f32 %v1511_v19, %v4949_v1  ;;  %v1628_v55 = vmul.f32 %v1627_v51, %v4977_v13  ;;  %v1344_v39 = vmul.f32 3.8918573e-05, %v5040_v27  ;;  %v5053_v48 = vadd.f32 %v599_v53, %v4797_v34 }
 0x201   :  { %v1487_v3 = vsel %vm1484_vm4, %v1486_v58, %v1482_v61  ;;  %v1316_v8 = vsub.f32 1.0, %v1315_v9  ;;  %v1616_v0 = vadd.f32 0.0036580483, %v1615_v32  ;;  %v1333_v14 = vmul.f32 2.1237322e-06, %v5040_v27  ;;  %v654_v9 = vpop.f32.mrf.mxu0 }
 0x202   :  { %v5057_v21 = vmul.f32 0.5, %v4869_v25  ;;  %v1301_v36 = vmul.f32 %v1300_v42, %v4893_v60  ;;  %v5061_v40 = vmul.f32 0.5, %v4872_v18  ;;  %v1345_v10 = vadd.f32 0.001143296, %v1344_v39 }
 0x203   :  { %v5063_v29 = vmul.f32 %v1207_v35, %v1183_v47  ;;  %3967 = vrcp.f32 %v5047_v20  ;;  %v5067_v59 = vmul.f32 0.5, %v4908_v45  ;;  %v1499_v61 = vmul.f32 %v1498_v23, %v4949_v1 }
 0x204   :  { %7545 = vst [vmem:[#allocation23_spill] sm:$0xff] %v5057_v21  ;;  %v5070_v58 = vmul.f32 %v1487_v3, %v1463_v56  ;;  %v5072_v43 = vadd.f32 1.0, %v1512_v2  ;;  %v1629_v25 = vadd.f32 0.112945676, %v1628_v55  ;;  %v5075_v60 = vmul.f32 0.70710677, %v5053_v48 }
 0x205   :  { %7546 = vst [vmem:[#allocation24_spill] sm:$0xff] %v5067_v59  ;;  %v1317_v18 = vmul.f32 %v5018_v52, %v1316_v8  ;;  %v1221_v47 = vmul.f32 %v1220_v38, %v4905_v12  ;;  %v1617_v46 = vmul.f32 %v1616_v0, %v4977_v13  ;;  %v1334_v51 = vadd.f32 0.00028619796, %v1333_v14 }
 0x206   :  { %v1302_v45 = vadd.f32 1.1283791, %v1301_v36  ;;  %vm1319_vm5 = vweird.f32 %v4975_v33  ;;  %v1346_v56 = vmul.f32 %v1345_v10, %v5040_v27  ;;  %v5083_v32 = vadd.f32 %v654_v9, %v4864_v5 }
 0x207   :  { %vm1320_vm6 = vweird.f32 %v5018_v52  ;;  %v1323_v53 = vand.u32 2147483647, %v4975_v33  ;;  %v1325_v42 = vand.u32 2147483648, %v4975_v33  ;;  %v1500_v19 = vadd.f32 0.18741608, %v1499_v61 }
 0x208   :  { %3969 = vrcp.f32 %v5072_v43  ;;  %v1630_v12 = vmul.f32 %v1629_v25, %v4977_v13  ;;  %v1347_v35 = vadd.f32 0.014752088, %v1346_v56  ;;  %v1251_v38 = vmul.f32 %v5075_v60, %v5075_v60  ;;  %vm5099_vm7 = vmor %vm1319_vm5, %vm1320_vm6 }
 0x209   :  { %v5092_v23 = vpop.eup %3967  ;;  %v1318_v2 = vadd.f32 %v5018_v52, %v1317_v18  ;;  %v1222_v55 = vadd.f32 1.1283791, %v1221_v47  ;;  %v1618_v39 = vadd.f32 0.05243302, %v1617_v46  ;;  %v1335_v3 = vmul.f32 %v1334_v51, %v5040_v27 }
 0x20a   :  { %v1303_v8 = vmul.f32 %v1302_v45, %v4878_v17  ;;  %v1348_v14 = vmul.f32 %v1347_v35, %v5040_v27  ;;  %v5104_v36 = vmin.f32 %v1251_v38, 16.0  ;;  %v5107_v10 = vmul.f32 0.70710677, %v5083_v32  ;;  %v680_v38 = vpop.f32.mrf.mxu1 }
 0x20b   :  { %vm5109_vm8 = vcmp.eq.f32.partialorder %v1323_v53, 8.507059e+37  ;;  %v1326_v25 = vor.u32 1.1754944e-38, %v1325_v42  ;;  %v1245_v17 = vand.u32 2147483648, %v5047_v20  ;;  %v1501_v33 = vmul.f32 %v1500_v19, %v4949_v1 }
 0x20c   :  { %v1235_v18 = vmul.f32 %v5092_v23, %v5047_v20  ;;  %v1631_v47 = vadd.f32 0.4994258, %v1630_v12  ;;  %v1253_v46 = vmul.f32 2.1237322e-06, %v5104_v36  ;;  %v1264_v51 = vmul.f32 3.8918573e-05, %v5104_v36 }
 0x20d   :  { %v1322_v9 = vsel %vm5099_vm7, %v5018_v52, %v1318_v2  ;;  %v5123_v45 = vmul.f32 %v1222_v55, %v4884_v54  ;;  %v1619_v56 = vmul.f32 %v1618_v39, %v4977_v13  ;;  %v1336_v53 = vadd.f32 0.0036580483, %v1335_v3 }
 0x20e   :  { %v5126_v42 = vpop.eup %3969  ;;  %v1349_v1 = vadd.f32 0.112945676, %v1348_v14  ;;  %v1254_v19 = vadd.f32 0.00028619796, %v1253_v46  ;;  %v1265_v35 = vadd.f32 0.001143296, %v1264_v51  ;;  %v1531_v12 = vmul.f32 %v5107_v10, %v5107_v10 }
 0x20f   :  { %vm1239_vm9 = vweird.f32 %v5047_v20  ;;  %v1243_v0 = vand.u32 2147483647, %v5047_v20  ;;  %v5132_v52 = vor.u32 1.1754944e-38, %v1245_v17  ;;  %v5135_v54 = vadd.f32 %v680_v38, %v4817_v22 }
 0x210   :  { %v1327_v2 = vsel %vm5109_vm8, %v1326_v25, %v1322_v9  ;;  %v1236_v55 = vsub.f32 1.0, %v1235_v18  ;;  %v1502_v39 = vadd.f32 1.1283791, %v1501_v33  ;;  %v1632_v3 = vmul.f32 %v1631_v47, %v4977_v13 }
 0x211   :  { %7551 = vst [vmem:[#allocation25_spill] sm:$0xff] %v5135_v54  ;;  %v1515_v14 = vmul.f32 %v5126_v42, %v5072_v43  ;;  %v1337_v46 = vmul.f32 %v1336_v53, %v5040_v27  ;;  %v1255_v51 = vmul.f32 %v1254_v19, %v5104_v36  ;;  %v1266_v17 = vmul.f32 %v1265_v35, %v5104_v36 }
 0x212   :  { %v1620_v26 = vadd.f32 0.18741608, %v1619_v56  ;;  %v5146_v38 = vmul.f32 0.5, %v4988_v44  ;;  %v1350_v61 = vmul.f32 %v1349_v1, %v5040_v27  ;;  %v5149_v25 = vmin.f32 %v1531_v12, 16.0  ;;  %v683_v59 = vpop.f32.mrf.mxu1 }
 0x213   :  { %vm1240_vm10 = vweird.f32 %v5092_v23  ;;  %v1256_v33 = vadd.f32 0.0036580483, %v1255_v51  ;;  %v1267_v18 = vadd.f32 0.014752088, %v1266_v17  ;;  %v5153_v47 = vmul.f32 0.70710677, %v5135_v54 }
 0x214   :  { %7552 = vst [vmem:[#allocation26_spill] sm:$0xff] %v5146_v38  ;;  %v5155_v9 = vmul.f32 %v1327_v2, %v1303_v8  ;;  %v1237_v53 = vmul.f32 %v5092_v23, %v1236_v55  ;;  %v5159_v56 = vmul.f32 %v1502_v39, %v4915_v49  ;;  %v5161_v44 = vadd.f32 1.0, %v1632_v3  ;;  %v625_v39 = vpop.f32.mrf.mxu3  ;;  %vm5185_vm13 = vmor %vm1239_vm9, %vm1240_vm10 }
 0x215   :  { %vm5163_vm11 = vcmp.eq.f32.partialorder %v1243_v0, 8.507059e+37  ;;  %v1516_v19 = vsub.f32 1.0, %v1515_v14  ;;  %v1338_v35 = vadd.f32 0.05243302, %v1337_v46  ;;  %v1257_v12 = vmul.f32 %v1256_v33, %v5104_v36 }
 0x216   :  { %7553 = vst [vmem:[#allocation27_spill] sm:$0xff] %v5155_v9  ;;  %v1268_v51 = vmul.f32 %v1267_v18, %v5104_v36  ;;  %v1621_v8 = vmul.f32 %v1620_v26, %v4977_v13  ;;  %v1351_v2 = vadd.f32 0.4994258, %v1350_v61  ;;  %v1533_v55 = vmul.f32 2.1237322e-06, %v5149_v25 }
 0x217   :  { %v1544_v49 = vmul.f32 3.8918573e-05, %v5149_v25  ;;  %v1258_v3 = vadd.f32 0.05243302, %v1257_v12  ;;  %v1651_v0 = vmul.f32 %v5153_v47, %v5153_v47  ;;  %v5175_v14 = vadd.f32 %v625_v39, %v4864_v5 }
 0x218   :  { %v1269_v17 = vadd.f32 0.112945676, %v1268_v51  ;;  %v1238_v46 = vadd.f32 %v5092_v23, %v1237_v53  ;;  %vm1519_vm12 = vweird.f32 %v5072_v43  ;;  %v1523_v26 = vand.u32 2147483647, %v5072_v43 }
 0x219   :  { %3971 = vrcp.f32 %v5161_v44  ;;  %v1517_v61 = vmul.f32 %v5126_v42, %v1516_v19  ;;  %v1525_v33 = vand.u32 2147483648, %v5072_v43  ;;  %v1339_v18 = vmul.f32 %v1338_v35, %v5040_v27 }
 0x21a   :  { %v1270_v53 = vmul.f32 %v1269_v17, %v5104_v36  ;;  %v1352_v12 = vmul.f32 %v1351_v2, %v5040_v27  ;;  %v1534_v51 = vadd.f32 0.00028619796, %v1533_v55  ;;  %v1545_v39 = vadd.f32 0.001143296, %v1544_v49 }
 0x21b   :  { %v5194_v57 = vmin.f32 %v1651_v0, 16.0  ;;  %v1622_v41 = vadd.f32 1.1283791, %v1621_v8  ;;  %v1259_v20 = vmul.f32 %v1258_v3, %v5104_v36  ;;  %v5198_v30 = vmul.f32 0.70710677, %v5175_v14 }
 0x21c   :  { %v1271_v7 = vadd.f32 0.4994258, %v1270_v53  ;;  %v1242_v19 = vsel %vm5185_vm13, %v5092_v23, %v1238_v46  ;;  %vm1520_vm14 = vweird.f32 %v5126_v42  ;;  %v1546_v35 = vmul.f32 %v1545_v39, %v5149_v25 }
 0x21d   :  { %v1664_v2 = vmul.f32 3.8918573e-05, %v5194_v57  ;;  %vm5206_vm15 = vcmp.eq.f32.partialorder %v1523_v26, 8.507059e+37  ;;  %v1340_v8 = vadd.f32 0.18741608, %v1339_v18  ;;  %v5211_v49 = vmul.f32 0.5, %v5053_v48  ;;  %vm5222_vm1 = vmor %vm1519_vm12, %vm1520_vm14 }
 0x21e   :  { %v1272_v3 = vmul.f32 %v1271_v7, %v5104_v36  ;;  %v1518_v23 = vadd.f32 %v5126_v42, %v1517_v61  ;;  %v5217_v0 = vadd.f32 1.0, %v1352_v12  ;;  %v1535_v46 = vmul.f32 %v1534_v51, %v5149_v25 }
 0x21f   :  { %v5214_v17 = vpop.eup %3971  ;;  %v1547_v13 = vadd.f32 0.014752088, %v1546_v35  ;;  %v1260_v18 = vadd.f32 0.18741608, %v1259_v20  ;;  %v1665_v53 = vadd.f32 0.001143296, %v1664_v2  ;;  %v1371_v7 = vmul.f32 %v5198_v30, %v5198_v30 }
 0x220   :  { %v5226_v48 = vadd.f32 1.0, %v1272_v3  ;;  %v1247_v61 = vsel %vm5163_vm11, %v5132_v52, %v1242_v19  ;;  %v1526_v12 = vor.u32 1.1754944e-38, %v1525_v33  ;;  %v1653_v43 = vmul.f32 2.1237322e-06, %v5194_v57  ;;  %v657_v19 = vpop.f32.mrf.mxu0 }
 0x221   :  { %v1548_v51 = vmul.f32 %v1547_v13, %v5149_v25  ;;  %v5236_v39 = vmul.f32 %v1622_v41, %v4952_v50  ;;  %v1635_v20 = vmul.f32 %v5214_v17, %v5161_v44  ;;  %v1645_v35 = vand.u32 2147483648, %v5161_v44 }
 0x222   :  { %3973 = vrcp.f32 %v5226_v48  ;;  %v1522_v1 = vsel %vm5222_vm1, %v5126_v42, %v1518_v23  ;;  %v1341_v52 = vmul.f32 %v1340_v8, %v5040_v27  ;;  %v1261_v41 = vmul.f32 %v1260_v18, %v5104_v36 }
 0x223   :  { %3975 = vrcp.f32 %v5217_v0  ;;  %v1549_v33 = vadd.f32 0.112945676, %v1548_v51  ;;  %v1536_v50 = vadd.f32 0.0036580483, %v1535_v46  ;;  %v1666_v2 = vmul.f32 %v1665_v53, %v5194_v57 }
 0x224   :  { %v5249_v3 = vmin.f32 %v1371_v7, 16.0  ;;  %v5252_v13 = vmul.f32 %v1247_v61, %v5123_v45  ;;  %v1643_v54 = vand.u32 2147483647, %v5161_v44  ;;  %v1654_v23 = vadd.f32 0.00028619796, %v1653_v43 }
 0x225   :  { %v1550_v42 = vmul.f32 %v1549_v33, %v5149_v25  ;;  %vm1639_vm2 = vweird.f32 %v5161_v44  ;;  %vm1640_vm3 = vweird.f32 %v5214_v17  ;;  %v5258_v27 = vor.u32 1.1754944e-38, %v1645_v35 }
 0x226   :  { %v1667_v36 = vadd.f32 0.014752088, %v1666_v2  ;;  %v5261_v8 = vadd.f32 %v657_v19, %v4797_v34  ;;  %v1527_v46 = vsel %vm5206_vm15, %v1526_v12, %v1522_v1  ;;  %v1636_v45 = vsub.f32 1.0, %v1635_v20  ;;  %vm5310_vm9 = vmor %vm1639_vm2, %vm1640_vm3 }
 0x227   :  { %v1342_v26 = vadd.f32 1.1283791, %v1341_v52  ;;  %v1551_v18 = vadd.f32 0.4994258, %v1550_v42  ;;  %v1262_v7 = vadd.f32 1.1283791, %v1261_v41  ;;  %v1537_v61 = vmul.f32 %v1536_v50, %v5149_v25 }
 0x228   :  { %v3974_v53 = vpop.eup %3973  ;;  %v1668_v51 = vmul.f32 %v1667_v36, %v5194_v57  ;;  %v1384_v43 = vmul.f32 3.8918573e-05, %v5249_v3  ;;  %vm1279_vm4 = vweird.f32 %v5226_v48  ;;  %v1285_v55 = vand.u32 2147483648, %v5226_v48 }
 0x229   :  { %v5268_v35 = vpop.eup %3975  ;;  %v1275_v33 = vmul.f32 %v3974_v53, %v5226_v48  ;;  %v1655_v12 = vmul.f32 %v1654_v23, %v5194_v57  ;;  %v1552_v20 = vmul.f32 %v1551_v18, %v5149_v25  ;;  %v5276_v19 = vmul.f32 0.70710677, %v5261_v8 }
 0x22a   :  { %v1669_v1 = vadd.f32 0.112945676, %v1668_v51  ;;  %v1385_v52 = vadd.f32 0.001143296, %v1384_v43  ;;  %vm1280_vm5 = vweird.f32 %v3974_v53  ;;  %v1283_v50 = vand.u32 2147483647, %v5226_v48 }
 0x22b   :  { %v1276_v41 = vsub.f32 1.0, %v1275_v33  ;;  %v1373_v2 = vmul.f32 2.1237322e-06, %v5249_v3  ;;  %v1637_v42 = vmul.f32 %v5214_v17, %v1636_v45  ;;  %v1355_v36 = vmul.f32 %v5268_v35, %v5217_v0  ;;  %vm5296_vm7 = vmor %vm1279_vm4, %vm1280_vm5 }
 0x22c   :  { %v1538_v21 = vadd.f32 0.05243302, %v1537_v61  ;;  %v1386_v23 = vmul.f32 %v1385_v52, %v5249_v3  ;;  %vm5284_vm6 = vcmp.eq.f32.partialorder %v1643_v54, 8.507059e+37  ;;  %v5289_v51 = vmul.f32 %v1342_v26, %v5002_v62 }
 0x22d   :  { %v1263_v43 = vmul.f32 %v1262_v7, %v5075_v60  ;;  %v1277_v33 = vmul.f32 %v3974_v53, %v1276_v41  ;;  %v1571_v38 = vmul.f32 %v5276_v19, %v5276_v19  ;;  %v1286_v61 = vor.u32 1.1754944e-38, %v1285_v55 }
 0x22e   :  { %v5300_v54 = vadd.f32 1.0, %v1552_v20  ;;  %v1656_v52 = vadd.f32 0.0036580483, %v1655_v12  ;;  %v1670_v4 = vmul.f32 %v1669_v1, %v5194_v57  ;;  %vm1284_vm8 = vcmp.eq.f32.partialorder %v1283_v50, 8.507059e+37 }
 0x22f   :  { %v1278_v62 = vadd.f32 %v3974_v53, %v1277_v33  ;;  %v1374_v26 = vadd.f32 0.00028619796, %v1373_v2  ;;  %v1387_v60 = vadd.f32 0.014752088, %v1386_v23  ;;  %v1638_v7 = vadd.f32 %v5214_v17, %v1637_v42 }
 0x230   :  { %v1356_v41 = vsub.f32 1.0, %v1355_v36  ;;  %v1363_v9 = vand.u32 2147483647, %v5217_v0  ;;  %v1539_v48 = vmul.f32 %v1538_v21, %v5149_v25  ;;  %v5317_v1 = vmin.f32 %v1571_v38, 16.0 }
 0x231   :  { %v1282_v12 = vsel %vm5296_vm7, %v3974_v53, %v1278_v62  ;;  %v1388_v20 = vmul.f32 %v1387_v60, %v5249_v3  ;;  %v5320_v50 = vadd.f32 %v683_v59, %v4864_v5  ;;  %3977 = vrcp.f32 %v5300_v54 }
 0x232   :  { %v1287_v21 = vsel %vm1284_vm8, %v1286_v61, %v1282_v12  ;;  %v1657_v2 = vmul.f32 %v1656_v52, %v5194_v57  ;;  %v1671_v44 = vadd.f32 0.4994258, %v1670_v4  ;;  %v1375_v36 = vmul.f32 %v1374_v26, %v5249_v3 }
 0x233   :  { %7568 = vst [vmem:[#allocation28_spill] sm:$0xff] %v5320_v50  ;;  %v1288_v42 = vmul.f32 %v1287_v21, %v1263_v43  ;;  %v1389_v23 = vadd.f32 0.112945676, %v1388_v20  ;;  %v1584_v33 = vmul.f32 3.8918573e-05, %v5317_v1  ;;  %v5327_v53 = vmul.f32 %v1527_v46, %v5159_v56 }
 0x234   :  { %v1642_v59 = vsel %vm5310_vm9, %v5214_v17, %v1638_v7  ;;  %v1357_v38 = vmul.f32 %v5268_v35, %v1356_v41  ;;  %vm1359_vm10 = vweird.f32 %v5217_v0  ;;  %vm1360_vm11 = vweird.f32 %v5268_v35 }
 0x235   :  { %v3825_v4 = vclamps-f32 %v1288_v42, 1.0  ;;  %v1540_v43 = vadd.f32 0.18741608, %v1539_v48  ;;  %v5336_v45 = vmul.f32 0.70710677, %v5320_v50  ;;  %v1672_v52 = vmul.f32 %v1671_v44, %v5194_v57  ;;  %vm5357_vm13 = vmor %vm1359_vm10, %vm1360_vm11 }
 0x236   :  { %v1658_v61 = vadd.f32 0.05243302, %v1657_v2  ;;  %v1390_v56 = vmul.f32 %v1389_v23, %v5249_v3  ;;  %v1585_v46 = vadd.f32 0.001143296, %v1584_v33  ;;  %vm5340_vm12 = vcmp.eq.f32.partialorder %v1363_v9, 8.507059e+37 }
 0x237   :  { %v1365_v17 = vand.u32 2147483648, %v5217_v0  ;;  %v2102_v26 = vadd.f32 1.0, %v3825_v4  ;;  %v1376_v60 = vadd.f32 0.0036580483, %v1375_v36  ;;  %v5345_v7 = vpop.eup %3977  ;;  %v1647_v41 = vsel %vm5284_vm6, %v5258_v27, %v1642_v59 }
 0x238   :  { %v1358_v48 = vadd.f32 %v5268_v35, %v1357_v38  ;;  %v1573_v55 = vmul.f32 2.1237322e-06, %v5317_v1  ;;  %v1586_v12 = vmul.f32 %v1585_v46, %v5317_v1  ;;  %v1541_v21 = vmul.f32 %v1540_v43, %v5149_v25  ;;  %v628_v25 = vpop.f32.mrf.mxu3  ;;  %v686_v46 = vpop.f32.mrf.mxu1 }
 0x239   :  { %v2134_v20 = vmul.f32 %v2102_v26, %v5211_v49  ;;  %v1391_v18 = vadd.f32 0.4994258, %v1390_v56  ;;  %v1691_v27 = vmul.f32 %v5336_v45, %v5336_v45  ;;  %v5366_v2 = vmul.f32 0.5, %v5083_v32 }
 0x23a   :  { %v1659_v44 = vmul.f32 %v1658_v61, %v5194_v57  ;;  %v5369_v42 = vadd.f32 1.0, %v1672_v52  ;;  %v1587_v0 = vadd.f32 0.014752088, %v1586_v12  ;;  %v1366_v36 = vor.u32 1.1754944e-38, %v1365_v17 }
 0x23b   :  { %v1555_v23 = vmul.f32 %v5345_v7, %v5300_v54  ;;  %v1377_v49 = vmul.f32 %v1376_v60, %v5249_v3  ;;  %v5374_v33 = vmin.f32 %v1691_v27, 16.0  ;;  %2222 = vmatpush.msra.mxu2 %v2134_v20  ;;  %v5377_v59 = vmul.f32 %v1647_v41, %v5236_v39 }
 0x23c   :  { %v1362_v32 = vsel %vm5357_vm13, %v5268_v35, %v1358_v48  ;;  %v1574_v38 = vadd.f32 0.00028619796, %v1573_v55  ;;  %v1588_v4 = vmul.f32 %v1587_v0, %v5317_v1  ;;  %v1542_v43 = vadd.f32 1.1283791, %v1541_v21 }
 0x23d   :  { %7573 = vst [vmem:[#allocation29_spill] sm:$0xff] %v5377_v59  ;;  %v1392_v61 = vmul.f32 %v1391_v18, %v5249_v3  ;;  %v1693_v52 = vmul.f32 2.1237322e-06, %v5374_v33  ;;  %v1704_v56 = vmul.f32 3.8918573e-05, %v5374_v33  ;;  %3979 = vrcp.f32 %v5369_v42 }
 0x23e   :  { %v1660_v17 = vadd.f32 0.18741608, %v1659_v44  ;;  %v5388_v39 = vmul.f32 0.5, %v5175_v14  ;;  %v5391_v26 = vadd.f32 %v628_v25, %v4797_v34  ;;  %v1367_v35 = vsel %vm5340_vm12, %v1366_v36, %v1362_v32 }
 0x23f   :  { %v1556_v60 = vsub.f32 1.0, %v1555_v23  ;;  %v1378_v41 = vadd.f32 0.05243302, %v1377_v49  ;;  %v1589_v48 = vadd.f32 0.112945676, %v1588_v4  ;;  %v1575_v55 = vmul.f32 %v1574_v38, %v5317_v1 }
 0x240   :  { %7574 = vst [vmem:[#allocation30_spill] sm:$0xff] %v5388_v39  ;;  %v1694_v12 = vadd.f32 0.00028619796, %v1693_v52  ;;  %v1705_v9 = vadd.f32 0.001143296, %v1704_v56  ;;  %v5397_v20 = vadd.f32 %v686_v46, %v4797_v34  ;;  %v5400_v21 = vmul.f32 %v1542_v43, %v5107_v10 }
 0x241   :  { %v1563_v14 = vand.u32 2147483647, %v5300_v54  ;;  %v5403_v18 = vadd.f32 1.0, %v1392_v61  ;;  %v1590_v62 = vmul.f32 %v1589_v48, %v5317_v1  ;;  %v5407_v27 = vmul.f32 %v1367_v35, %v5289_v51 }
 0x242   :  { %7575 = vst [vmem:[#allocation31_spill] sm:$0xff] %v5397_v20  ;;  %v1661_v44 = vmul.f32 %v1660_v17, %v5194_v57  ;;  %v1706_v0 = vmul.f32 %v1705_v9, %v5374_v33  ;;  %v5412_v36 = vmul.f32 0.70710677, %v5391_v26  ;;  %v1557_v23 = vmul.f32 %v5345_v7, %v1556_v60 }
 0x243   :  { %7576 = vst [vmem:[#allocation32_spill] sm:$0xff] %v5407_v27  ;;  %v1379_v10 = vmul.f32 %v1378_v41, %v5249_v3  ;;  %v1591_v49 = vadd.f32 0.4994258, %v1590_v62  ;;  %v5417_v25 = vmul.f32 0.70710677, %v5397_v20  ;;  %v5419_v32 = vpop.eup %3979  ;;  %vm1559_vm14 = vweird.f32 %v5300_v54 }
 0x244   :  { %v1576_v51 = vadd.f32 0.0036580483, %v1575_v55  ;;  %v1695_v57 = vmul.f32 %v1694_v12, %v5374_v33  ;;  %v1707_v38 = vadd.f32 0.014752088, %v1706_v0  ;;  %vm1560_vm15 = vweird.f32 %v5345_v7 }
 0x245   :  { %vm5424_vm1 = vcmp.eq.f32.partialorder %v1563_v14, 8.507059e+37  ;;  %v1565_v43 = vand.u32 2147483648, %v5300_v54  ;;  %3981 = vrcp.f32 %v5403_v18  ;;  %v1662_v61 = vadd.f32 1.1283791, %v1661_v44  ;;  %vm5441_vm2 = vmor %vm1559_vm14, %vm1560_vm15 }
 0x246   :  { %v1592_v52 = vmul.f32 %v1591_v49, %v5317_v1  ;;  %v1708_v56 = vmul.f32 %v1707_v38, %v5374_v33  ;;  %v1411_v46 = vmul.f32 %v5412_v36, %v5412_v36  ;;  %v1558_v17 = vadd.f32 %v5345_v7, %v1557_v23 }
 0x247   :  { %v1675_v35 = vmul.f32 %v5419_v32, %v5369_v42  ;;  %v1380_v60 = vadd.f32 0.18741608, %v1379_v10  ;;  %v1731_v41 = vmul.f32 %v5417_v25, %v5417_v25  ;;  %v1577_v55 = vmul.f32 %v1576_v51, %v5317_v1 }
 0x248   :  { %v5446_v12 = vadd.f32 1.0, %v1592_v52  ;;  %v1696_v9 = vadd.f32 0.0036580483, %v1695_v57  ;;  %v5448_v14 = vmin.f32 %v1411_v46, 16.0  ;;  %v1566_v62 = vor.u32 1.1754944e-38, %v1565_v43 }
 0x249   :  { %v5451_v44 = vmul.f32 0.5, %v5261_v8  ;;  %v1709_v0 = vadd.f32 0.112945676, %v1708_v56  ;;  %v5455_v23 = vadd.f32 %v4789_v11, %v4864_v5  ;;  %v5458_v54 = vmul.f32 %v1662_v61, %v5153_v47 }
 0x24a   :  { %v1685_v10 = vand.u32 2147483648, %v5369_v42  ;;  %3983 = vrcp.f32 %v5446_v12  ;;  %v5462_v49 = vmin.f32 %v1731_v41, 16.0  ;;  %v1562_v8 = vsel %vm5441_vm2, %v5345_v7, %v1558_v17 }
 0x24b   :  { %v5464_v51 = vpop.eup %3981  ;;  %vm1679_vm3 = vweird.f32 %v5369_v42  ;;  %v1683_v11 = vand.u32 2147483647, %v5369_v42  ;;  %v1381_v57 = vmul.f32 %v1380_v60, %v5249_v3  ;;  %v1413_v47 = vmul.f32 2.1237322e-06, %v5448_v14 }
 0x24c   :  { %v1676_v38 = vsub.f32 1.0, %v1675_v35  ;;  %v1578_v43 = vadd.f32 0.05243302, %v1577_v55  ;;  %v1697_v61 = vmul.f32 %v1696_v9, %v5374_v33  ;;  %v1424_v52 = vmul.f32 3.8918573e-05, %v5448_v14 }
 0x24d   :  { %v1710_v56 = vmul.f32 %v1709_v0, %v5374_v33  ;;  %v1414_v46 = vadd.f32 0.00028619796, %v1413_v47  ;;  %v1733_v41 = vmul.f32 2.1237322e-06, %v5462_v49  ;;  %v5478_v7 = vmul.f32 0.70710677, %v5455_v23 }
 0x24e   :  { %v5480_v17 = vor.u32 1.1754944e-38, %v1685_v10  ;;  %v1395_v3 = vmul.f32 %v5464_v51, %v5403_v18  ;;  %v1425_v60 = vadd.f32 0.001143296, %v1424_v52  ;;  %v1744_v35 = vmul.f32 3.8918573e-05, %v5462_v49 }
 0x24f   :  { %v1567_v48 = vsel %vm5424_vm1, %v1566_v62, %v1562_v8  ;;  %v1382_v55 = vadd.f32 1.1283791, %v1381_v57  ;;  %v1403_v9 = vand.u32 2147483647, %v5403_v18  ;;  %v1415_v0 = vmul.f32 %v1414_v46, %v5448_v14 }
 0x250   :  { %v5489_v47 = vpop.eup %3983  ;;  %v1677_v34 = vmul.f32 %v5419_v32, %v1676_v38  ;;  %v1698_v10 = vadd.f32 0.05243302, %v1697_v61  ;;  %v1426_v59 = vmul.f32 %v1425_v60, %v5448_v14  ;;  %v1745_v50 = vadd.f32 0.001143296, %v1744_v35 }
 0x251   :  { %v1579_v52 = vmul.f32 %v1578_v43, %v5317_v1  ;;  %v1711_v20 = vadd.f32 0.4994258, %v1710_v56  ;;  %v1734_v39 = vadd.f32 0.00028619796, %v1733_v41  ;;  %v891_v4 = vmul.f32 %v5478_v7, %v5478_v7 }
 0x252   :  { %v1396_v62 = vsub.f32 1.0, %v1395_v3  ;;  %v1595_v8 = vmul.f32 %v5489_v47, %v5446_v12  ;;  %v1416_v57 = vadd.f32 0.0036580483, %v1415_v0  ;;  %v1427_v46 = vadd.f32 0.014752088, %v1426_v59 }
 0x253   :  { %v5499_v27 = vmul.f32 %v1567_v48, %v5400_v21  ;;  %vm1680_vm4 = vweird.f32 %v5419_v32  ;;  %v5503_v38 = vmul.f32 %v1382_v55, %v5198_v30  ;;  %v1746_v43 = vmul.f32 %v1745_v50, %v5462_v49 }
 0x254   :  { %vm5506_vm5 = vcmp.eq.f32.partialorder %v1683_v11, 8.507059e+37  ;;  %v1405_v56 = vand.u32 2147483648, %v5403_v18  ;;  %v1699_v41 = vmul.f32 %v1698_v10, %v5374_v33  ;;  %v1417_v59 = vmul.f32 %v1416_v57, %v5448_v14  ;;  %vm5521_vm6 = vmor %vm1679_vm3, %vm1680_vm4 }
 0x255   :  { %v1428_v21 = vmul.f32 %v1427_v46, %v5448_v14  ;;  %v1678_v3 = vadd.f32 %v5419_v32, %v1677_v34  ;;  %v1712_v60 = vmul.f32 %v1711_v20, %v5374_v33  ;;  %v1735_v30 = vmul.f32 %v1734_v39, %v5462_v49 }
 0x256   :  { %v5517_v35 = vmin.f32 %v891_v4, 16.0  ;;  %v1397_v11 = vmul.f32 %v5464_v51, %v1396_v62  ;;  %vm5526_vm7 = vcmp.eq.f32.partialorder %v1403_v9, 8.507059e+37  ;;  %v1580_v55 = vadd.f32 0.18741608, %v1579_v52 }
 0x257   :  { %v1596_v34 = vsub.f32 1.0, %v1595_v8  ;;  %v1429_v0 = vadd.f32 0.112945676, %v1428_v21  ;;  %vm1399_vm8 = vweird.f32 %v5403_v18  ;;  %v1418_v39 = vadd.f32 0.05243302, %v1417_v59 }
 0x258   :  { %v1747_v20 = vadd.f32 0.014752088, %v1746_v43  ;;  %v893_v10 = vmul.f32 2.1237322e-06, %v5517_v35  ;;  %vm1400_vm9 = vweird.f32 %v5464_v51  ;;  %v1406_v42 = vor.u32 1.1754944e-38, %v1405_v56 }
 0x259   :  { %v1700_v4 = vadd.f32 0.18741608, %v1699_v41  ;;  %v1430_v57 = vmul.f32 %v1429_v0, %v5448_v14  ;;  %v1682_v9 = vsel %vm5521_vm6, %v5419_v32, %v1678_v3  ;;  %v5537_v62 = vadd.f32 1.0, %v1712_v60  ;;  %vm5545_vm11 = vmor %vm1399_vm8, %vm1400_vm9 }
 0x25a   :  { %v1736_v52 = vadd.f32 0.0036580483, %v1735_v30  ;;  %v894_v8 = vadd.f32 0.00028619796, %v893_v10  ;;  %v1398_v46 = vadd.f32 %v5464_v51, %v1397_v11  ;;  %v1581_v43 = vmul.f32 %v1580_v55, %v5317_v1 }
 0x25b   :  { %v1597_v59 = vmul.f32 %v5489_v47, %v1596_v34  ;;  %vm1599_vm10 = vweird.f32 %v5446_v12  ;;  %v1603_v32 = vand.u32 2147483647, %v5446_v12  ;;  %v1419_v41 = vmul.f32 %v1418_v39, %v5448_v14 }
 0x25c   :  { %v1431_v21 = vadd.f32 0.4994258, %v1430_v57  ;;  %v1748_v3 = vmul.f32 %v1747_v20, %v5462_v49  ;;  %vm1600_vm12 = vweird.f32 %v5489_v47  ;;  %v1701_v1 = vmul.f32 %v1700_v4, %v5374_v33 }
 0x25d   :  { %v895_v60 = vmul.f32 %v894_v8, %v5517_v35  ;;  %v904_v30 = vmul.f32 3.8918573e-05, %v5517_v35  ;;  %v1605_v18 = vand.u32 2147483648, %v5446_v12  ;;  %3985 = vrcp.f32 %v5537_v62  ;;  %vm5571_vm13 = vmor %vm1599_vm10, %vm1600_vm12 }
 0x25e   :  { %v1432_v50 = vmul.f32 %v1431_v21, %v5448_v14  ;;  %v1737_v11 = vmul.f32 %v1736_v52, %v5462_v49  ;;  %v1402_v55 = vsel %vm5545_vm11, %v5464_v51, %v1398_v46  ;;  %v1598_v34 = vadd.f32 %v5489_v47, %v1597_v59 }
 0x25f   :  { %v896_v0 = vadd.f32 0.0036580483, %v895_v60  ;;  %v905_v33 = vadd.f32 0.001143296, %v904_v30  ;;  %v5567_v39 = vsel %vm5506_vm5, %v5480_v17, %v1682_v9  ;;  %v1420_v10 = vadd.f32 0.18741608, %v1419_v41 }
 0x260   :  { %v1433_v4 = vadd.f32 1.0, %v1432_v50  ;;  %v1749_v57 = vadd.f32 0.112945676, %v1748_v3  ;;  %v1582_v52 = vadd.f32 1.1283791, %v1581_v43  ;;  %v1407_v61 = vsel %vm5526_vm7, %v1406_v42, %v1402_v55 }
 0x261   :  { %v1702_v51 = vadd.f32 1.1283791, %v1701_v1  ;;  %v897_v8 = vmul.f32 %v896_v0, %v5517_v35  ;;  %v906_v46 = vmul.f32 %v905_v33, %v5517_v35  ;;  %v1725_v17 = vand.u32 2147483648, %v5537_v62 }
 0x262   :  { %3987 = vrcp.f32 %v1433_v4  ;;  %v1738_v12 = vadd.f32 0.05243302, %v1737_v11  ;;  %v1602_v9 = vsel %vm5571_vm13, %v5489_v47, %v1598_v34  ;;  %vm5583_vm14 = vcmp.eq.f32.partialorder %v1603_v32, 8.507059e+37 }
 0x263   :  { %v1606_v43 = vor.u32 1.1754944e-38, %v1605_v18  ;;  %v5588_v56 = vmul.f32 0.5, %v5391_v26  ;;  %v5590_v41 = vpop.eup %3985  ;;  %v1421_v48 = vmul.f32 %v1420_v10, %v5448_v14  ;;  %v1750_v42 = vmul.f32 %v1749_v57, %v5462_v49 }
 0x264   :  { %v898_v21 = vadd.f32 0.05243302, %v897_v8  ;;  %v907_v3 = vadd.f32 0.014752088, %v906_v46  ;;  %v5595_v1 = vmul.f32 %v1407_v61, %v5503_v38  ;;  %v1583_v47 = vmul.f32 %v1582_v52, %v5276_v19 }
 0x265   :  { %v5599_v32 = vmul.f32 %v1702_v51, %v5336_v45  ;;  %v5602_v26 = vor.u32 1.1754944e-38, %v1725_v17  ;;  %v1739_v30 = vmul.f32 %v1738_v12, %v5462_v49  ;;  %v1607_v50 = vsel %vm5583_vm14, %v1606_v43, %v1602_v9 }
 0x266   :  { %v899_v14 = vmul.f32 %v898_v21, %v5517_v35  ;;  %v908_v18 = vmul.f32 %v907_v3, %v5517_v35  ;;  %v5611_v38 = vmul.f32 %v5590_v41, %v5537_v62  ;;  %v5615_v19 = vadd.f32 %v4777_v16, %v4817_v22 }
 0x267   :  { %7593 = vst [vmem:[#allocation33_spill] sm:$0xff] %v5599_v32  ;;  %v5619_v45 = vadd.f32 %v4769_v15, %v4837_v63  ;;  %v1422_v55 = vadd.f32 1.1283791, %v1421_v48  ;;  %v1751_v34 = vadd.f32 0.4994258, %v1750_v42  ;;  %v5623_v33 = vadd.f32 %v4811_v31, %v4864_v5 }
 0x268   :  { %v3988_v11 = vpop.eup %3987  ;;  %v909_v0 = vadd.f32 0.112945676, %v908_v18  ;;  %v1443_v10 = vand.u32 2147483647, %v1433_v4  ;;  %v5626_v57 = vmul.f32 0.70710677, %v5615_v19  ;;  %vm1439_vm15 = vweird.f32 %v1433_v4 }
 0x269   :  { %v1435_v20 = vmul.f32 %v3988_v11, %v1433_v4  ;;  %v5629_v16 = vmul.f32 0.70710677, %v5619_v45  ;;  %v1445_v52 = vand.u32 2147483648, %v1433_v4  ;;  %v900_v15 = vadd.f32 0.18741608, %v899_v14 }
 0x26a   :  { %v910_v51 = vmul.f32 %v909_v0, %v5517_v35  ;;  %vm1440_vm1 = vweird.f32 %v3988_v11  ;;  %v851_v46 = vmul.f32 %v5626_v57, %v5626_v57  ;;  %v1423_v61 = vmul.f32 %v1422_v55, %v5412_v36 }
 0x26b   :  { %v1436_v8 = vsub.f32 1.0, %v1435_v20  ;;  %v811_v31 = vmul.f32 %v5629_v16, %v5629_v16  ;;  %v1752_v17 = vmul.f32 %v1751_v34, %v5462_v49  ;;  %v5639_v9 = vmul.f32 0.70710677, %v5623_v33  ;;  %vm5650_vm3 = vmor %vm1439_vm15, %vm1440_vm1 }
 0x26c   :  { %v911_v12 = vadd.f32 0.4994258, %v910_v51  ;;  %vm5641_vm2 = vcmp.eq.f32.partialorder %v1443_v10, 8.507059e+37  ;;  %v5645_v48 = vmin.f32 %v851_v46, 16.0  ;;  %v1446_v36 = vor.u32 1.1754944e-38, %v1445_v52 }
 0x26d   :  { %v1437_v59 = vmul.f32 %v3988_v11, %v1436_v8  ;;  %v5647_v42 = vmin.f32 %v811_v31, 16.0  ;;  %v901_v3 = vmul.f32 %v900_v15, %v5517_v35  ;;  %v5658_v18 = vadd.f32 %v4795_v6, %v4817_v22 }
 0x26e   :  { %v912_v14 = vmul.f32 %v911_v12, %v5517_v35  ;;  %v853_v34 = vmul.f32 2.1237322e-06, %v5645_v48  ;;  %v864_v0 = vmul.f32 3.8918573e-05, %v5645_v48  ;;  %v5663_v20 = vmul.f32 %v1607_v50, %v1583_v47 }
 0x26f   :  { %v1438_v55 = vadd.f32 %v3988_v11, %v1437_v59  ;;  %v813_v4 = vmul.f32 2.1237322e-06, %v5647_v42  ;;  %v824_v52 = vmul.f32 3.8918573e-05, %v5647_v42  ;;  %v1051_v15 = vmul.f32 %v5639_v9, %v5639_v9 }
 0x270   :  { %v913_v10 = vadd.f32 1.0, %v912_v14  ;;  %v854_v6 = vadd.f32 0.00028619796, %v853_v34  ;;  %v865_v51 = vadd.f32 0.001143296, %v864_v0  ;;  %v5672_v12 = vadd.f32 1.0, %v1752_v17 }
 0x271   :  { %v1442_v35 = vsel %vm5650_vm3, %v3988_v11, %v1438_v55  ;;  %v814_v8 = vadd.f32 0.00028619796, %v813_v4  ;;  %v1740_v31 = vadd.f32 0.18741608, %v1739_v30  ;;  %v902_v50 = vadd.f32 1.1283791, %v901_v3 }
 0x272   :  { %v1447_v46 = vsel %vm5641_vm2, %v1446_v36, %v1442_v35  ;;  %3989 = vrcp.f32 %v913_v10  ;;  %v855_v59 = vmul.f32 %v854_v6, %v5645_v48  ;;  %v5676_v14 = vmul.f32 0.70710677, %v5658_v18 }
 0x273   :  { %v1448_v47 = vmul.f32 %v1447_v46, %v1423_v61  ;;  %v1716_v21 = vsub.f32 1.0, %v5611_v38  ;;  %v866_v11 = vmul.f32 %v865_v51, %v5645_v48  ;;  %v815_v55 = vmul.f32 %v814_v8, %v5647_v42 }
 0x274   :  { %v825_v34 = vadd.f32 0.001143296, %v824_v52  ;;  %v923_v17 = vand.u32 2147483647, %v913_v10  ;;  %v5682_v36 = vmin.f32 %v1051_v15, 16.0  ;;  %3991 = vrcp.f32 %v5672_v12 }
 0x275   :  { %v3829_v30 = vclamps-f32 %v1448_v47, 1.0  ;;  %v856_v61 = vadd.f32 0.0036580483, %v855_v59  ;;  %v867_v3 = vadd.f32 0.014752088, %v866_v11  ;;  %v903_v35 = vmul.f32 %v902_v50, %v5478_v7 }
 0x276   :  { %v816_v0 = vadd.f32 0.0036580483, %v815_v55  ;;  %v826_v38 = vmul.f32 %v825_v34, %v5647_v42  ;;  %v1011_v6 = vmul.f32 %v5676_v14, %v5676_v14  ;;  %v1053_v46 = vmul.f32 2.1237322e-06, %v5682_v36 }
 0x277   :  { %v2106_v4 = vadd.f32 1.0, %v3829_v30  ;;  %v857_v51 = vmul.f32 %v856_v61, %v5645_v48  ;;  %v868_v8 = vmul.f32 %v867_v3, %v5645_v48  ;;  %vm919_vm4 = vweird.f32 %v913_v10 }
 0x278   :  { %v3990_v52 = vpop.eup %3989  ;;  %v817_v15 = vmul.f32 %v816_v0, %v5647_v42  ;;  %v1064_v7 = vmul.f32 3.8918573e-05, %v5682_v36  ;;  %vm5695_vm5 = vcmp.eq.f32.partialorder %v923_v17, 8.507059e+37  ;;  %v925_v11 = vand.u32 2147483648, %v913_v10 }
 0x279   :  { %v2138_v47 = vmul.f32 %v2106_v4, %v5588_v56  ;;  %v915_v59 = vmul.f32 %v3990_v52, %v913_v10  ;;  %v858_v55 = vadd.f32 0.05243302, %v857_v51  ;;  %v869_v34 = vadd.f32 0.112945676, %v868_v8 }
 0x27a   :  { %vm920_vm6 = vweird.f32 %v3990_v52  ;;  %v818_v61 = vadd.f32 0.05243302, %v817_v15  ;;  %v827_v3 = vadd.f32 0.014752088, %v826_v38  ;;  %v5699_v0 = vpop.eup %3991  ;;  %v1054_v60 = vadd.f32 0.00028619796, %v1053_v46 }
 0x27b   :  { %v916_v30 = vsub.f32 1.0, %v915_v59  ;;  %2245 = vmatpush.msra.mxu3 %v2138_v47  ;;  %v859_v56 = vmul.f32 %v858_v55, %v5645_v48  ;;  %v870_v4 = vmul.f32 %v869_v34, %v5645_v48  ;;  %v5703_v43 = vmin.f32 %v1011_v6, 16.0  ;;  %vm5708_vm7 = vmor %vm919_vm4, %vm920_vm6 }
 0x27c   :  { %v819_v5 = vmul.f32 %v818_v61, %v5647_v42  ;;  %v828_v51 = vmul.f32 %v827_v3, %v5647_v42  ;;  %v1065_v8 = vadd.f32 0.001143296, %v1064_v7  ;;  %v926_v38 = vor.u32 1.1754944e-38, %v925_v11 }
 0x27d   :  { %v917_v17 = vmul.f32 %v3990_v52, %v916_v30  ;;  %v871_v47 = vadd.f32 0.4994258, %v870_v4  ;;  %v1055_v59 = vmul.f32 %v1054_v60, %v5682_v36  ;;  %v1013_v55 = vmul.f32 2.1237322e-06, %v5703_v43 }
 0x27e   :  { %v860_v6 = vadd.f32 0.18741608, %v859_v56  ;;  %v829_v34 = vadd.f32 0.112945676, %v828_v51  ;;  %v1066_v30 = vmul.f32 %v1065_v8, %v5682_v36  ;;  %v1717_v61 = vmul.f32 %v5590_v41, %v1716_v21 }
 0x27f   :  { %v918_v46 = vadd.f32 %v3990_v52, %v917_v17  ;;  %v1741_v7 = vmul.f32 %v1740_v31, %v5462_v49  ;;  %v5719_v10 = vmul.f32 %v5699_v0, %v5672_v12  ;;  %v872_v11 = vmul.f32 %v871_v47, %v5645_v48 }
 0x280   :  { %v820_v3 = vadd.f32 0.18741608, %v819_v5  ;;  %v830_v4 = vmul.f32 %v829_v34, %v5647_v42  ;;  %v1056_v56 = vadd.f32 0.0036580483, %v1055_v59  ;;  %v1067_v21 = vadd.f32 0.014752088, %v1066_v30 }
 0x281   :  { %v922_v60 = vsel %vm5708_vm7, %v3990_v52, %v918_v46  ;;  %v873_v51 = vadd.f32 1.0, %v872_v11  ;;  %v1014_v8 = vadd.f32 0.00028619796, %v1013_v55  ;;  %v749_v49 = vmul.f32 0.5, %v5455_v23 }
 0x282   :  { %v927_v17 = vsel %vm5695_vm5, %v926_v38, %v922_v60  ;;  %v861_v22 = vmul.f32 %v860_v6, %v5645_v48  ;;  %v831_v32 = vadd.f32 0.4994258, %v830_v4  ;;  %v7602_v47 = vclamps-f32 %v5663_v20, 1.0 }
 0x283   :  { %v928_v31 = vmul.f32 %v927_v17, %v903_v35  ;;  %v5732_v5 = vadd.f32 %v5590_v41, %v1717_v61  ;;  %v5734_v52 = vadd.f32 1.1283791, %v1741_v7  ;;  %3993 = vrcp.f32 %v873_v51 }
 0x284   :  { %v2110_v15 = vadd.f32 1.0, %v7602_v47  ;;  %v1756_v50 = vsub.f32 1.0, %v5719_v10  ;;  %v5738_v59 = vmul.f32 0.5, %v5615_v19  ;;  %v832_v23 = vmul.f32 %v831_v32, %v5647_v42 }
 0x285   :  { %v3816_v38 = vclamps-f32 %v928_v31, 1.0  ;;  %v821_v48 = vmul.f32 %v820_v3, %v5647_v42  ;;  %v1057_v35 = vmul.f32 %v1056_v56, %v5682_v36  ;;  %v1068_v20 = vmul.f32 %v1067_v21, %v5682_v36 }
 0x286   :  { %v1015_v55 = vmul.f32 %v1014_v8, %v5703_v43  ;;  %v862_v6 = vadd.f32 1.1283791, %v861_v22  ;;  %v883_v34 = vand.u32 2147483647, %v873_v51  ;;  %v833_v30 = vadd.f32 1.0, %v832_v23 }
 0x287   :  { %v2093_v46 = vadd.f32 1.0, %v3816_v38  ;;  %v5746_v61 = vmul.f32 %v2110_v15, %v5451_v44  ;;  %v1058_v7 = vadd.f32 0.05243302, %v1057_v35  ;;  %v1069_v19 = vadd.f32 0.112945676, %v1068_v20 }
 0x288   :  { %v1016_v11 = vadd.f32 0.0036580483, %v1015_v55  ;;  %v5749_v32 = vmul.f32 0.5, %v5619_v45  ;;  %3995 = vrcp.f32 %v833_v30  ;;  %v1024_v42 = vmul.f32 3.8918573e-05, %v5703_v43 }
 0x289   :  { %v2125_v60 = vmul.f32 %v2093_v46, %v749_v49  ;;  %v3994_v3 = vpop.eup %3993  ;;  %v885_v4 = vand.u32 2147483648, %v873_v51  ;;  %v1059_v56 = vmul.f32 %v1058_v7, %v5682_v36  ;;  %v1070_v22 = vmul.f32 %v1069_v19, %v5682_v36 }
 0x28a   :  { %v5756_v44 = vadd.f32 %v4782_v24, %v4837_v63  ;;  %v863_v17 = vmul.f32 %v862_v6, %v5626_v57  ;;  %v875_v21 = vmul.f32 %v3994_v3, %v873_v51  ;;  %v822_v8 = vadd.f32 1.1283791, %v821_v48 }
 0x28b   :  { %2177 = vmatpush.msra.mxu0 %v2125_v60  ;;  %v1017_v45 = vmul.f32 %v1016_v11, %v5703_v43  ;;  %vm879_vm8 = vweird.f32 %v873_v51  ;;  %vm5760_vm9 = vcmp.eq.f32.partialorder %v883_v34, 8.507059e+37  ;;  %v1060_v31 = vadd.f32 0.18741608, %v1059_v56 }
 0x28c   :  { %v1071_v47 = vadd.f32 0.4994258, %v1070_v22  ;;  %v876_v15 = vsub.f32 1.0, %v875_v21  ;;  %vm880_vm10 = vweird.f32 %v3994_v3  ;;  %v1025_v23 = vadd.f32 0.001143296, %v1024_v42 }
 0x28d   :  { %v1018_v38 = vadd.f32 0.05243302, %v1017_v45  ;;  %v886_v24 = vor.u32 1.1754944e-38, %v885_v4  ;;  %v1061_v35 = vmul.f32 %v1060_v31, %v5682_v36  ;;  %v5767_v48 = vmul.f32 0.70710677, %v5756_v44  ;;  %vm5775_vm11 = vmor %vm879_vm8, %vm880_vm10 }
 0x28e   :  { %v1072_v57 = vmul.f32 %v1071_v47, %v5682_v36  ;;  %v3996_v20 = vpop.eup %3995  ;;  %v877_v55 = vmul.f32 %v3994_v3, %v876_v15  ;;  %v843_v46 = vand.u32 2147483647, %v833_v30  ;;  %v1026_v6 = vmul.f32 %v1025_v23, %v5703_v43 }
 0x28f   :  { %v5772_v34 = vadd.f32 %v4806_v37, %v4837_v63  ;;  %v835_v19 = vmul.f32 %v3996_v20, %v833_v30  ;;  %v845_v11 = vand.u32 2147483648, %v833_v30  ;;  %v1019_v60 = vmul.f32 %v1018_v38, %v5703_v43 }
 0x290   :  { %v5779_v36 = vadd.f32 1.0, %v1072_v57  ;;  %v878_v42 = vadd.f32 %v3994_v3, %v877_v55  ;;  %v1062_v4 = vadd.f32 1.1283791, %v1061_v35  ;;  %v1027_v56 = vadd.f32 0.014752088, %v1026_v6 }
 0x291   :  { %v971_v22 = vmul.f32 %v5767_v48, %v5767_v48  ;;  %vm1719_vm12 = vweird.f32 %v5537_v62  ;;  %vm1720_vm13 = vweird.f32 %v5590_v41  ;;  %v836_v37 = vsub.f32 1.0, %v835_v19 }
 0x292   :  { %vm839_vm14 = vweird.f32 %v833_v30  ;;  %vm840_vm15 = vweird.f32 %v3996_v20  ;;  %3997 = vrcp.f32 %v5779_v36  ;;  %v882_v51 = vsel %vm5775_vm11, %v3994_v3, %v878_v42  ;;  %vm5834_vm5 = vmor %vm1719_vm12, %vm1720_vm13 }
 0x293   :  { %v823_v21 = vmul.f32 %v822_v8, %v5629_v16  ;;  %vm5790_vm1 = vcmp.eq.f32.partialorder %v843_v46, 8.507059e+37  ;;  %v5795_v31 = vmul.f32 0.70710677, %v5772_v34  ;;  %v887_v47 = vsel %vm5760_vm9, %v886_v24, %v882_v51  ;;  %vm5802_vm2 = vmor %vm839_vm14, %vm840_vm15 }
 0x294   :  { %v837_v15 = vmul.f32 %v3996_v20, %v836_v37  ;;  %v1028_v30 = vmul.f32 %v1027_v56, %v5703_v43  ;;  %v5800_v38 = vmin.f32 %v971_v22, 16.0  ;;  %v888_v23 = vmul.f32 %v887_v47, %v863_v17 }
 0x295   :  { %v846_v16 = vor.u32 1.1754944e-38, %v845_v11  ;;  %v5807_v8 = vmul.f32 %v1062_v4, %v5639_v9  ;;  %v5809_v35 = vadd.f32 0.18741608, %v1019_v60  ;;  %vm1079_vm3 = vweird.f32 %v5779_v36 }
 0x296   :  { %v838_v57 = vadd.f32 %v3996_v20, %v837_v15  ;;  %v1029_v55 = vadd.f32 0.112945676, %v1028_v30  ;;  %v973_v49 = vmul.f32 2.1237322e-06, %v5800_v38  ;;  %v984_v24 = vmul.f32 3.8918573e-05, %v5800_v38 }
 0x297   :  { %v3815_v46 = vclamps-f32 %v888_v23, 1.0  ;;  %v1083_v17 = vand.u32 2147483647, %v5779_v36  ;;  %v1131_v6 = vmul.f32 %v5795_v31, %v5795_v31  ;;  %v1085_v22 = vand.u32 2147483648, %v5779_v36 }
 0x298   :  { %v3998_v7 = vpop.eup %3997  ;;  %v842_v9 = vsel %vm5802_vm2, %v3996_v20, %v838_v57  ;;  %v1030_v19 = vmul.f32 %v1029_v55, %v5703_v43  ;;  %v974_v11 = vadd.f32 0.00028619796, %v973_v49  ;;  %v985_v60 = vadd.f32 0.001143296, %v984_v24 }
 0x299   :  { %v2092_v42 = vadd.f32 1.0, %v3815_v46  ;;  %v847_v4 = vsel %vm5790_vm1, %v846_v16, %v842_v9  ;;  %v1075_v56 = vmul.f32 %v3998_v7, %v5779_v36  ;;  %vm1080_vm4 = vweird.f32 %v3998_v7 }
 0x29a   :  { %v848_v37 = vmul.f32 %v847_v4, %v823_v21  ;;  %v1031_v51 = vadd.f32 0.4994258, %v1030_v19  ;;  %v975_v47 = vmul.f32 %v974_v11, %v5800_v38  ;;  %v986_v15 = vmul.f32 %v985_v60, %v5800_v38  ;;  %vm5842_vm6 = vmor %vm1079_vm3, %vm1080_vm4 }
 0x29b   :  { %v2124_v20 = vmul.f32 %v2092_v42, %v5738_v59  ;;  %v1076_v30 = vsub.f32 1.0, %v1075_v56  ;;  %v5827_v23 = vmin.f32 %v1131_v6, 16.0  ;;  %v1086_v59 = vor.u32 1.1754944e-38, %v1085_v22  ;;  %v5858_v22 = vld [vmem:[%s7465_s6] sm:$0xff] }
 0x29c   :  { %v3814_v3 = vclamps-f32 %v848_v37, 1.0  ;;  %v1032_v45 = vmul.f32 %v1031_v51, %v5703_v43  ;;  %v976_v16 = vadd.f32 0.0036580483, %v975_v47  ;;  %v987_v57 = vadd.f32 0.014752088, %v986_v15 }
 0x29d   :  { %2178 = vmatpush.msra.mxu0 %v2124_v20  ;;  %v1077_v55 = vmul.f32 %v3998_v7, %v1076_v30  ;;  %v1133_v49 = vmul.f32 2.1237322e-06, %v5827_v23  ;;  %v1144_v24 = vmul.f32 3.8918573e-05, %v5827_v23  ;;  %vm1084_vm7 = vcmp.eq.f32.partialorder %v1083_v17, 8.507059e+37 }
 0x29e   :  { %v2091_v46 = vadd.f32 1.0, %v3814_v3  ;;  %v5846_v9 = vadd.f32 1.0, %v1032_v45  ;;  %v977_v19 = vmul.f32 %v976_v16, %v5800_v38  ;;  %v988_v11 = vmul.f32 %v987_v57, %v5800_v38 }
 0x29f   :  { %v1078_v60 = vadd.f32 %v3998_v7, %v1077_v55  ;;  %v1134_v42 = vadd.f32 0.00028619796, %v1133_v49  ;;  %v1145_v4 = vadd.f32 0.001143296, %v1144_v24  ;;  %v1722_v56 = vsel %vm5834_vm5, %v5590_v41, %v5732_v5 }
 0x2a0   :  { %v2123_v36 = vmul.f32 %v2091_v46, %v5749_v32  ;;  %vm2157_vm8 = vcmask 261120   ;;  %3999 = vrcp.f32 %v5846_v9  ;;  %v5863_v17 = vmul.f32 %v5734_v52, %v5417_v25 }
 0x2a1   :  { %v1757_v37 = vmul.f32 %v5699_v0, %v1756_v50  ;;  %v1082_v51 = vsel %vm5842_vm6, %v3998_v7, %v1078_v60  ;;  %v989_v32 = vadd.f32 0.112945676, %v988_v11  ;;  %v978_v15 = vadd.f32 0.05243302, %v977_v19  ;;  %v5901_v11 = vld [vmem:[%s7465_s6 + $0x8] sm:$0xff] }
 0x2a2   :  { %2179 = vmatpush.msra.mxu0 %v2123_v36  ;;  %v1087_v47 = vsel %vm1084_vm7, %v1086_v59, %v1082_v51  ;;  %v1135_v20 = vmul.f32 %v1134_v42, %v5827_v23  ;;  %v1146_v30 = vmul.f32 %v1145_v4, %v5827_v23  ;;  %v1763_v3 = vand.u32 2147483647, %v5672_v12 }
 0x2a3   :  { %3846 = vmatmul.msk.f32.vlgmr.msra.gmra.mxu0 %vm2157_vm8, %v5858_v22  ;;  %v1088_v25 = vmul.f32 %v1087_v47, %v5807_v8  ;;  %v1021_v10 = vmul.f32 %v5809_v35, %v5703_v43  ;;  %v990_v52 = vmul.f32 %v989_v32, %v5800_v38  ;;  %v7615_v50 = vand.u32 2147483647, %v5537_v62 }
 0x2a4   :  { %vm1759_vm10 = vweird.f32 %v5672_v12  ;;  %v1765_v45 = vand.u32 2147483648, %v5672_v12  ;;  %v1136_v16 = vadd.f32 0.0036580483, %v1135_v20  ;;  %v1147_v57 = vadd.f32 0.014752088, %v1146_v30  ;;  %2268 = vmatpush.msrb.mxu0 %v5746_v61  ;;  %v7626_v30 = vld [vmem:[#allocation27_spill] sm:$0xff] }
 0x2a5   :  { %vm5881_vm9 = vcmp.eq.f32.partialorder %v7615_v50, 8.507059e+37  ;;  %vm1760_vm11 = vweird.f32 %v5699_v0  ;;  %v753_v43 = vmul.f32 0.5, %v5623_v33  ;;  %v3820_v8 = vclamps-f32 %v1088_v25, 1.0 }
 0x2a6   :  { %v991_v35 = vadd.f32 0.4994258, %v990_v52  ;;  %v4000_v55 = vpop.eup %3999  ;;  %v1758_v62 = vadd.f32 %v5699_v0, %v1757_v37  ;;  %v979_v59 = vmul.f32 %v978_v15, %v5800_v38  ;;  %v1137_v49 = vmul.f32 %v1136_v16, %v5827_v23  ;;  %vm5912_vm14 = vmor %vm1759_vm10, %vm1760_vm11 }
 0x2a7   :  { %v1148_v24 = vmul.f32 %v1147_v57, %v5827_v23  ;;  %v2097_v46 = vadd.f32 1.0, %v3820_v8  ;;  %v1022_v6 = vadd.f32 1.1283791, %v1021_v10  ;;  %v1035_v19 = vmul.f32 %v4000_v55, %v5846_v9 }
 0x2a8   :  { %vm1039_vm12 = vweird.f32 %v5846_v9  ;;  %v1043_v61 = vand.u32 2147483647, %v5846_v9  ;;  %v1045_v33 = vand.u32 2147483648, %v5846_v9  ;;  %v992_v60 = vmul.f32 %v991_v35, %v5800_v38 }
 0x2a9   :  { %v1149_v42 = vadd.f32 0.112945676, %v1148_v24  ;;  %v2129_v4 = vmul.f32 %v2097_v46, %v753_v43  ;;  %v1036_v36 = vsub.f32 1.0, %v1035_v19  ;;  %vm1040_vm13 = vweird.f32 %v4000_v55 }
 0x2aa   :  { %v3824_v37 = vclamps-f32 %v5252_v13, 1.0  ;;  %v980_v51 = vadd.f32 0.18741608, %v979_v59  ;;  %v5905_v32 = vadd.f32 1.0, %v992_v60  ;;  %v1138_v47 = vadd.f32 0.05243302, %v1137_v49  ;;  %vm5927_vm1 = vmor %vm1039_vm12, %vm1040_vm13 }
 0x2ab   :  { %v1150_v15 = vmul.f32 %v1149_v42, %v5827_v23  ;;  %vm5916_vm15 = vcmp.eq.f32.partialorder %v1763_v3, 8.507059e+37  ;;  %2200 = vmatpush.msra.mxu1 %v2129_v4  ;;  %v1037_v13 = vmul.f32 %v4000_v55, %v1036_v36  ;;  %3847 = vmatmul.msk.f32.gmra.mxu0 %vm2157_vm8, %v5901_v11  ;;  %v3823_v10 = vclamps-f32 %v5063_v29, 1.0 }
 0x2ac   :  { %v2101_v25 = vadd.f32 1.0, %v3824_v37  ;;  %v1766_v52 = vor.u32 1.1754944e-38, %v1765_v45  ;;  %v1023_v50 = vmul.f32 %v1022_v6, %v5676_v14  ;;  %v1046_v3 = vor.u32 1.1754944e-38, %v1045_v33  ;;  %v7624_v33 = vld [vmem:[#allocation24_spill] sm:$0xff] }
 0x2ad   :  { %4001 = vrcp.f32 %v5905_v32  ;;  %v1038_v16 = vadd.f32 %v4000_v55, %v1037_v13  ;;  %vm1044_vm2 = vcmp.eq.f32.partialorder %v1043_v61, 8.507059e+37  ;;  %v2100_v43 = vadd.f32 1.0, %v3823_v10 }
 0x2ae   :  { %v2133_v57 = vmul.f32 %v2101_v25, %v5061_v40  ;;  %v1762_v29 = vsel %vm5912_vm14, %v5699_v0, %v1758_v62  ;;  %v981_v14 = vmul.f32 %v980_v51, %v5800_v38  ;;  %v1139_v9 = vmul.f32 %v1138_v47, %v5827_v23  ;;  %v7627_v25 = vld [vmem:[#allocation33_spill] sm:$0xff] }
 0x2af   :  { %v1151_v45 = vadd.f32 0.4994258, %v1150_v15  ;;  %v1727_v8 = vsel %vm5881_vm9, %v5602_v26, %v1722_v56  ;;  %v1042_v40 = vsel %vm5927_vm1, %v4000_v55, %v1038_v16  ;;  %v2132_v0 = vmul.f32 %v2100_v43, %v4960_v28  ;;  %v7625_v15 = vld [vmem:[#allocation32_spill] sm:$0xff] }
 0x2b0   :  { %2223 = vmatpush.msra.mxu2 %v2133_v57  ;;  %v3832_v38 = vclamps-f32 %v5499_v27, 1.0  ;;  %v1047_v35 = vsel %vm1044_vm2, %v1046_v3, %v1042_v40  ;;  %v3831_v21 = vclamps-f32 %v5327_v53, 1.0  ;;  %v3830_v59 = vclamps-f32 %v5070_v58, 1.0  ;;  %v7631_v57 = vld [vmem:[#allocation30_spill] sm:$0xff] }
 0x2b1   :  { %v1152_v62 = vmul.f32 %v1151_v45, %v5827_v23  ;;  %v1767_v41 = vsel %vm5916_vm15, %v1766_v52, %v1762_v29  ;;  %v752_v26 = vmul.f32 0.5, %v5658_v18  ;;  %v1048_v5 = vmul.f32 %v1047_v35, %v1023_v50  ;;  %v7632_v45 = vld [vmem:[#allocation26_spill] sm:$0xff] }
 0x2b2   :  { %2224 = vmatpush.msra.mxu2 %v2132_v0  ;;  %v2109_v56 = vadd.f32 1.0, %v3832_v38  ;;  %v982_v55 = vadd.f32 1.1283791, %v981_v14  ;;  %v1140_v28 = vadd.f32 0.18741608, %v1139_v9  ;;  %v2108_v27 = vadd.f32 1.0, %v3831_v21 }
 0x2b3   :  { %v4002_v7 = vpop.eup %4001  ;;  %v5956_v49 = vadd.f32 1.0, %v1152_v62  ;;  %v3819_v24 = vclamps-f32 %v1048_v5, 1.0  ;;  %vm999_vm3 = vweird.f32 %v5905_v32  ;;  %v1003_v58 = vand.u32 2147483647, %v5905_v32  ;;  %v7634_v5 = vld [vmem:[#allocation23_spill] sm:$0xff] }
 0x2b4   :  { %v995_v46 = vmul.f32 %v4002_v7, %v5905_v32  ;;  %vm1000_vm4 = vweird.f32 %v4002_v7  ;;  %v1005_v53 = vand.u32 2147483648, %v5905_v32  ;;  %v2107_v18 = vadd.f32 1.0, %v3830_v59  ;;  %v7633_v59 = vld [vmem:[#allocation31_spill] sm:$0xff] }
 0x2b5   :  { %4003 = vrcp.f32 %v5956_v49  ;;  %v2096_v6 = vadd.f32 1.0, %v3819_v24  ;;  %v2141_v61 = vmul.f32 %v2109_v56, %v5366_v2  ;;  %v2140_v60 = vmul.f32 %v2108_v27, %v7624_v33  ;;  %v706_v2 = vpop.f32.mrf.mxu2  ;;  %vm5979_vm5 = vmor %vm999_vm3, %vm1000_vm4 }
 0x2b6   :  { %v996_v19 = vsub.f32 1.0, %v995_v46  ;;  %v5967_v42 = vmul.f32 %v5567_v39, %v5458_v54  ;;  %v1768_v4 = vmul.f32 %v1767_v41, %v5863_v17  ;;  %v1141_v36 = vmul.f32 %v1140_v28, %v5827_v23  ;;  %v7630_v17 = vld [vmem:[#allocation22_spill] sm:$0xff]  ;;  %v7635_v46 = vld [vmem:[#allocation28_spill] sm:$0xff] }
 0x2b7   :  { %v3828_v37 = vclamps-f32 %v5595_v1, 1.0  ;;  %v2128_v51 = vmul.f32 %v2096_v6, %v752_v26  ;;  %2269 = vmatpush.msrb.mxu0 %v2141_v61  ;;  %v3827_v20 = vclamps-f32 %v7625_v15, 1.0  ;;  %v3826_v13 = vclamps-f32 %v7626_v30, 1.0 }
 0x2b8   :  { %v997_v47 = vmul.f32 %v4002_v7, %v996_v19  ;;  %v1728_v10 = vmul.f32 %v1727_v8, %v7627_v25  ;;  %v983_v52 = vmul.f32 %v982_v55, %v5767_v48  ;;  %v1006_v39 = vor.u32 1.1754944e-38, %v1005_v53 }
 0x2b9   :  { %v2105_v1 = vadd.f32 1.0, %v3828_v37  ;;  %2201 = vmatpush.msra.mxu1 %v2128_v51  ;;  %vm1004_vm6 = vcmp.eq.f32.partialorder %v1003_v58, 8.507059e+37  ;;  %2270 = vmatpush.msrb.mxu0 %v2140_v60  ;;  %v2139_v50 = vmul.f32 %v2107_v18, %v7630_v17  ;;  %v2104_v12 = vadd.f32 1.0, %v3827_v20  ;;  %v7638_v60 = vld [vmem:[#allocation25_spill] sm:$0xff] }
 0x2ba   :  { %v998_v23 = vadd.f32 %v4002_v7, %v997_v47  ;;  %v3837_v16 = vclamps-f32 %v1768_v4, 1.0  ;;  %v2103_v43 = vadd.f32 1.0, %v3826_v13  ;;  %v5986_v32 = vadd.f32 %v706_v2, %v4837_v63  ;;  %v7639_v51 = vld [vmem:[#allocation29_spill] sm:$0xff] }
 0x2bb   :  { %v4004_v3 = vpop.eup %4003  ;;  %v2137_v48 = vmul.f32 %v2105_v1, %v7631_v57  ;;  %v1142_v14 = vadd.f32 1.1283791, %v1141_v36  ;;  %2271 = vmatpush.msrb.mxu0 %v2139_v50  ;;  %v2136_v8 = vmul.f32 %v2104_v12, %v7632_v45  ;;  %vm1159_vm7 = vweird.f32 %v5956_v49  ;;  %v7640_v2 = vld [vmem:[#allocation21_spill] sm:$0xff]  ;;  %v7641_v12 = vld [vmem:[#allocation19_spill] sm:$0xff] }
 0x2bc   :  { %v1002_v29 = vsel %vm5979_vm5, %v4002_v7, %v998_v23  ;;  %v1155_v9 = vmul.f32 %v4004_v3, %v5956_v49  ;;  %v1163_v0 = vand.u32 2147483647, %v5956_v49  ;;  %v1165_v38 = vand.u32 2147483648, %v5956_v49  ;;  %3854 = vmatmul.msk.f32.vlgmr.msrb.gmra.mxu0 %vm2157_vm8, %v5858_v22 }
 0x2bd   :  { %v1007_v40 = vsel %vm1004_vm6, %v1006_v39, %v1002_v29  ;;  %2246 = vmatpush.msra.mxu3 %v2137_v48  ;;  %vm1160_vm9 = vweird.f32 %v4004_v3  ;;  %v3836_v21 = vclamps-f32 %v1728_v10, 1.0  ;;  %v770_v41 = vmul.f32 0.5, %v7633_v59  ;;  %v709_v50 = vpop.f32.mrf.mxu2 }
 0x2be   :  { %v1008_v35 = vmul.f32 %v1007_v40, %v983_v52  ;;  %v1156_v62 = vsub.f32 1.0, %v1155_v9  ;;  %v2114_v26 = vadd.f32 1.0, %v3837_v16  ;;  %v2135_v56 = vmul.f32 %v2103_v43, %v7634_v5  ;;  %vm6008_vm10 = vmor %vm1159_vm7, %vm1160_vm9  ;;  %v7642_v5 = vld [vmem:[#allocation20_spill] sm:$0xff] }
 0x2bf   :  { %2247 = vmatpush.msra.mxu3 %v2136_v8  ;;  %v6000_v7 = vmul.f32 0.70710677, %v5986_v32  ;;  %v751_v55 = vmul.f32 0.5, %v5756_v44  ;;  %v3835_v24 = vclamps-f32 %v5967_v42, 1.0  ;;  %v769_v58 = vmul.f32 0.5, %v7635_v46 }
 0x2c0   :  { %v3818_v28 = vclamps-f32 %v1008_v35, 1.0  ;;  %v1157_v27 = vmul.f32 %v4004_v3, %v1156_v62  ;;  %v1143_v53 = vmul.f32 %v1142_v14, %v5795_v31  ;;  %v1166_v6 = vor.u32 1.1754944e-38, %v1165_v38  ;;  %v735_v35 = vpop.f32.mrf.mxu3 }
 0x2c1   :  { %2248 = vmatpush.msra.mxu3 %v2135_v56  ;;  %v1771_v19 = vmul.f32 %v6000_v7, %v6000_v7  ;;  %vm1164_vm11 = vcmp.eq.f32.partialorder %v1163_v0, 8.507059e+37  ;;  %v2113_v33 = vadd.f32 1.0, %v3836_v21  ;;  %v768_v31 = vmul.f32 0.5, %v7638_v60 }
 0x2c2   :  { %v2095_v44 = vadd.f32 1.0, %v3818_v28  ;;  %v1158_v61 = vadd.f32 %v4004_v3, %v1157_v27  ;;  %3852 = vmatmul.msk.f32.vlgmr.msra.gmra.mxu3 %vm2157_vm8, %v5858_v22  ;;  %v2146_v42 = vmul.f32 %v2114_v26, %v770_v41  ;;  %v2112_v37 = vadd.f32 1.0, %v3835_v24 }
 0x2c3   :  { %v6017_v49 = vmin.f32 %v1771_v19, 16.0  ;;  %v3834_v47 = vclamps-f32 %v7639_v51, 1.0  ;;  %v2145_v13 = vmul.f32 %v2113_v33, %v769_v58  ;;  %v767_v25 = vmul.f32 0.5, %v7640_v2 }
 0x2c4   :  { %v2127_v4 = vmul.f32 %v2095_v44, %v751_v55  ;;  %v1162_v36 = vsel %vm6008_vm10, %v4004_v3, %v1158_v61  ;;  %3855 = vmatmul.msk.f32.gmra.mxu0 %vm2157_vm8, %v5901_v11  ;;  %v755_v52 = vmul.f32 0.5, %v5772_v34  ;;  %v2144_v39 = vmul.f32 %v2112_v37, %v768_v31 }
 0x2c5   :  { %v1167_v15 = vsel %vm1164_vm11, %v1166_v6, %v1162_v36  ;;  %v1784_v20 = vmul.f32 3.8918573e-05, %v6017_v49  ;;  %v2111_v1 = vadd.f32 1.0, %v3834_v47  ;;  %v6033_v3 = vadd.f32 %v709_v50, %v7641_v12  ;;  %v712_v41 = vpop.f32.mrf.mxu2 }
 0x2c6   :  { %2202 = vmatpush.msra.mxu1 %v2127_v4  ;;  %v1168_v30 = vmul.f32 %v1167_v15, %v1143_v53  ;;  %v1773_v40 = vmul.f32 2.1237322e-06, %v6017_v49  ;;  %v6056_v59 = vadd.f32 %v735_v35, %v4837_v63  ;;  %v6059_v56 = vadd.f32 %v712_v41, %v7642_v5 }
 0x2c7   :  { %3848 = vmatmul.msk.f32.vlgmr.msra.gmra.mxu1 %vm2157_vm8, %v5858_v22  ;;  %v1785_v10 = vadd.f32 0.001143296, %v1784_v20  ;;  %v2143_v57 = vmul.f32 %v2111_v1, %v767_v25  ;;  %v6036_v34 = vmul.f32 0.70710677, %v6033_v3  ;;  %v7643_v1 = vld [vmem:[#allocation18_spill] sm:$0xff] }
 0x2c8   :  { %v3822_v54 = vclamps-f32 %v1168_v30, 1.0  ;;  %2291 = vmatpush.msrb.mxu1 %v2146_v42  ;;  %v1774_v62 = vadd.f32 0.00028619796, %v1773_v40  ;;  %v6067_v27 = vmul.f32 0.70710677, %v6056_v59  ;;  %v738_v53 = vpop.f32.mrf.mxu3 }
 0x2c9   :  { %v1786_v23 = vmul.f32 %v1785_v10, %v6017_v49  ;;  %v1811_v43 = vmul.f32 %v6036_v34, %v6036_v34  ;;  %v6070_v63 = vmul.f32 0.70710677, %v6059_v56  ;;  %v6084_v60 = vadd.f32 %v738_v53, %v7641_v12 }
 0x2ca   :  { %v2099_v17 = vadd.f32 1.0, %v3822_v54  ;;  %2292 = vmatpush.msrb.mxu1 %v2145_v13  ;;  %3853 = vmatmul.msk.f32.gmra.mxu3 %vm2157_vm8, %v5901_v11  ;;  %v1775_v55 = vmul.f32 %v1774_v62, %v6017_v49  ;;  %v1931_v6 = vmul.f32 %v6067_v27, %v6067_v27 }
 0x2cb   :  { %v1787_v48 = vadd.f32 0.014752088, %v1786_v23  ;;  %v6045_v14 = vmin.f32 %v1811_v43, 16.0  ;;  %v1851_v58 = vmul.f32 %v6070_v63, %v6070_v63  ;;  %v6092_v51 = vmul.f32 0.70710677, %v6084_v60 }
 0x2cc   :  { %v2131_v16 = vmul.f32 %v2099_v17, %v755_v52  ;;  %2293 = vmatpush.msrb.mxu1 %v2144_v39  ;;  %v6088_v42 = vmin.f32 %v1931_v6, 16.0 }
 0x2cd   :  { %v1788_v29 = vmul.f32 %v1787_v48, %v6017_v49  ;;  %v1824_v9 = vmul.f32 3.8918573e-05, %v6045_v14  ;;  %v6079_v19 = vmin.f32 %v1851_v58, 16.0  ;;  %v1971_v30 = vmul.f32 %v6092_v51, %v6092_v51  ;;  %v715_v13 = vpop.f32.mrf.mxu2 }
 0x2ce   :  { %2225 = vmatpush.msra.mxu2 %v2131_v16  ;;  %2294 = vmatpush.msrb.mxu1 %v2143_v57  ;;  %v1944_v20 = vmul.f32 3.8918573e-05, %v6088_v42  ;;  %v6105_v23 = vadd.f32 %v715_v13, %v7643_v1 }
 0x2cf   :  { %3849 = vmatmul.msk.f32.gmra.mxu1 %vm2157_vm8, %v5901_v11  ;;  %3850 = vmatmul.msk.f32.vlgmr.msra.gmra.mxu2 %vm2157_vm8, %v5858_v22  ;;  %v1789_v45 = vadd.f32 0.112945676, %v1788_v29  ;;  %v1825_v8 = vadd.f32 0.001143296, %v1824_v9  ;;  %v1864_v33 = vmul.f32 3.8918573e-05, %v6079_v19 }
 0x2d0   :  { %v6101_v54 = vmin.f32 %v1971_v30, 16.0  ;;  %v1945_v50 = vadd.f32 0.001143296, %v1944_v20  ;;  %v1933_v29 = vmul.f32 2.1237322e-06, %v6088_v42 }
 0x2d1   :  { %v1790_v0 = vmul.f32 %v1789_v45, %v6017_v49  ;;  %v1826_v38 = vmul.f32 %v1825_v8, %v6045_v14  ;;  %v1865_v36 = vadd.f32 0.001143296, %v1864_v33  ;;  %v1853_v9 = vmul.f32 2.1237322e-06, %v6079_v19 }
 0x2d2   :  { %v1984_v43 = vmul.f32 3.8918573e-05, %v6101_v54  ;;  %v6116_v8 = vmul.f32 0.70710677, %v6105_v23 }
 0x2d3   :  { %v1791_v21 = vadd.f32 0.4994258, %v1790_v0  ;;  %v1827_v26 = vadd.f32 0.014752088, %v1826_v38  ;;  %v1866_v47 = vmul.f32 %v1865_v36, %v6079_v19  ;;  %v1946_v0 = vmul.f32 %v1945_v50, %v6088_v42 }
 0x2d4   :  { %v1985_v38 = vadd.f32 0.001143296, %v1984_v43  ;;  %v1891_v41 = vmul.f32 %v6116_v8, %v6116_v8 }
 0x2d5   :  { %v1792_v28 = vmul.f32 %v1791_v21, %v6017_v49  ;;  %v1828_v24 = vmul.f32 %v1827_v26, %v6045_v14  ;;  %v1867_v25 = vadd.f32 0.014752088, %v1866_v47  ;;  %v741_v26 = vpop.f32.mrf.mxu3  ;;  %v1947_v58 = vadd.f32 0.014752088, %v1946_v0 }
 0x2d7   :  { %3851 = vmatmul.msk.f32.gmra.mxu2 %vm2157_vm8, %v5901_v11  ;;  %3856 = vmatmul.msk.f32.vlgmr.msrb.gmra.mxu1 %vm2157_vm8, %v5858_v22  ;;  %v1813_v22 = vmul.f32 2.1237322e-06, %v6045_v14  ;;  %v6075_v18 = vadd.f32 1.0, %v1792_v28  ;;  %v1829_v44 = vadd.f32 0.112945676, %v1828_v24  ;;  %v1868_v39 = vmul.f32 %v1867_v25, %v6079_v19 }
 0x2d8   :  { %v1934_v28 = vadd.f32 0.00028619796, %v1933_v29  ;;  %v1854_v24 = vadd.f32 0.00028619796, %v1853_v9 }
 0x2d9   :  { %v1814_v46 = vadd.f32 0.00028619796, %v1813_v22  ;;  %4005 = vrcp.f32 %v6075_v18  ;;  %v1830_v4 = vmul.f32 %v1829_v44, %v6045_v14  ;;  %v1869_v57 = vadd.f32 0.112945676, %v1868_v39 }
 0x2da   :  { %v6132_v44 = vmin.f32 %v1891_v41, 16.0  ;;  %v1803_v13 = vand.u32 2147483647, %v6075_v18  ;;  %vm1799_vm13 = vweird.f32 %v6075_v18  ;;  %v1805_v39 = vand.u32 2147483648, %v6075_v18 }
 0x2db   :  { %v1815_v61 = vmul.f32 %v1814_v46, %v6045_v14  ;;  %v1831_v2 = vadd.f32 0.4994258, %v1830_v4  ;;  %v1870_v45 = vmul.f32 %v1869_v57, %v6079_v19  ;;  %v1935_v4 = vmul.f32 %v1934_v28, %v6088_v42 }
 0x2dc   :  { %v1893_v36 = vmul.f32 2.1237322e-06, %v6132_v44  ;;  %vm6169_vm15 = vcmp.eq.f32.partialorder %v1803_v13, 8.507059e+37  ;;  %v6181_v41 = vmul.f32 0.5, %v6059_v56  ;;  %v1973_v56 = vmul.f32 2.1237322e-06, %v6101_v54 }
 0x2dd   :  { %v1816_v37 = vadd.f32 0.0036580483, %v1815_v61  ;;  %v1832_v16 = vmul.f32 %v1831_v2, %v6045_v14  ;;  %v1871_v21 = vadd.f32 0.4994258, %v1870_v45  ;;  %v1936_v50 = vadd.f32 0.0036580483, %v1935_v4 }
 0x2de   :  { %v1894_v2 = vadd.f32 0.00028619796, %v1893_v36  ;;  %v6174_v45 = vmul.f32 0.5, %v6033_v3 }
 0x2df   :  { %3857 = vmatmul.msk.f32.gmra.mxu1 %vm2157_vm8, %v5901_v11  ;;  %v1776_v11 = vadd.f32 0.0036580483, %v1775_v55  ;;  %v6098_v10 = vpop.eup %4005  ;;  %v1817_v52 = vmul.f32 %v1816_v37, %v6045_v14  ;;  %v6119_v62 = vadd.f32 1.0, %v1832_v16  ;;  %v1986_v55 = vmul.f32 %v1985_v38, %v6101_v54 }
 0x2e0   :  { %v1795_v12 = vmul.f32 %v6098_v10, %v6075_v18  ;;  %v1872_v53 = vmul.f32 %v1871_v21, %v6079_v19  ;;  %v1904_v37 = vmul.f32 3.8918573e-05, %v6132_v44  ;;  %vm1800_vm12 = vweird.f32 %v6098_v10 }
 0x2e1   :  { %v1777_v31 = vmul.f32 %v1776_v11, %v6017_v49  ;;  %v1818_v48 = vadd.f32 0.05243302, %v1817_v52  ;;  %v6128_v11 = vadd.f32 %v741_v26, %v7642_v5  ;;  %4007 = vrcp.f32 %v6119_v62  ;;  %vm6157_vm14 = vmor %vm1799_vm13, %vm1800_vm12  ;;  %v744_v26 = vpop.f32.mrf.mxu3 }
 0x2e2   :  { %v1796_v35 = vsub.f32 1.0, %v1795_v12  ;;  %v6134_v33 = vadd.f32 1.0, %v1872_v53  ;;  %v6141_v5 = vmul.f32 0.5, %v5986_v32  ;;  %v1905_v25 = vadd.f32 0.001143296, %v1904_v37 }
 0x2e3   :  { %v1778_v15 = vadd.f32 0.05243302, %v1777_v31  ;;  %v1819_v22 = vmul.f32 %v1818_v48, %v6045_v14  ;;  %v1987_v31 = vadd.f32 0.014752088, %v1986_v55  ;;  %v6145_v20 = vmul.f32 0.70710677, %v6128_v11 }
 0x2e4   :  { %v1797_v6 = vmul.f32 %v6098_v10, %v1796_v35  ;;  %4009 = vrcp.f32 %v6134_v33  ;;  %v1895_v48 = vmul.f32 %v1894_v2, %v6132_v44  ;;  %v1906_v43 = vmul.f32 %v1905_v25, %v6132_v44 }
 0x2e5   :  { %v1779_v17 = vmul.f32 %v1778_v15, %v6017_v49  ;;  %v1820_v61 = vadd.f32 0.18741608, %v1819_v22  ;;  %v1948_v15 = vmul.f32 %v1947_v58, %v6088_v42  ;;  %v1988_v32 = vmul.f32 %v1987_v31, %v6101_v54 }
 0x2e6   :  { %v1798_v30 = vadd.f32 %v6098_v10, %v1797_v6  ;;  %v2011_v29 = vmul.f32 %v6145_v20, %v6145_v20  ;;  %v1907_v38 = vadd.f32 0.014752088, %v1906_v43  ;;  %v1806_v21 = vor.u32 1.1754944e-38, %v1805_v39 }
 0x2e7   :  { %v1780_v40 = vadd.f32 0.18741608, %v1779_v17  ;;  %v6153_v52 = vpop.eup %4007  ;;  %v1821_v17 = vmul.f32 %v1820_v61, %v6045_v14  ;;  %v1949_v57 = vadd.f32 0.112945676, %v1948_v15  ;;  %v1989_v0 = vadd.f32 0.112945676, %v1988_v32 }
 0x2e8   :  { %v1802_v14 = vsel %vm6157_vm14, %v6098_v10, %v1798_v30  ;;  %v6178_v35 = vmin.f32 %v2011_v29, 16.0  ;;  %v1937_v3 = vmul.f32 %v1936_v50, %v6088_v42  ;;  %v1896_v28 = vadd.f32 0.0036580483, %v1895_v48 }
 0x2e9   :  { %v1781_v46 = vmul.f32 %v1780_v40, %v6017_v49  ;;  %v1855_v49 = vmul.f32 %v1854_v24, %v6079_v19  ;;  %v1835_v40 = vmul.f32 %v6153_v52, %v6119_v62  ;;  %v1950_v55 = vmul.f32 %v1949_v57, %v6088_v42 }
 0x2ea   :  { %v6184_v22 = vpop.eup %4009  ;;  %v1908_v24 = vmul.f32 %v1907_v38, %v6132_v44  ;;  %v1845_v58 = vand.u32 2147483648, %v6119_v62  ;;  %v2024_v53 = vmul.f32 3.8918573e-05, %v6178_v35  ;;  %v1990_v61 = vmul.f32 %v1989_v0, %v6101_v54 }
 0x2eb   :  { %v1782_v47 = vadd.f32 1.1283791, %v1781_v46  ;;  %v1856_v12 = vadd.f32 0.0036580483, %v1855_v49  ;;  %v1807_v46 = vsel %vm6169_vm15, %v1806_v21, %v1802_v14  ;;  %v1836_v6 = vsub.f32 1.0, %v1835_v40 }
 0x2ec   :  { %v1909_v31 = vadd.f32 0.112945676, %v1908_v24  ;;  %v6196_v4 = vadd.f32 %v744_v26, %v7643_v1  ;;  %v1843_v36 = vand.u32 2147483647, %v6119_v62  ;;  %vm1839_vm1 = vweird.f32 %v6119_v62 }
 0x2ed   :  { %v1783_v9 = vmul.f32 %v1782_v47, %v6000_v7  ;;  %v1822_v7 = vadd.f32 1.1283791, %v1821_v17  ;;  %v1857_v10 = vmul.f32 %v1856_v12, %v6079_v19  ;;  %v1875_v47 = vmul.f32 %v6184_v22, %v6134_v33 }
 0x2ee   :  { %v1938_v30 = vadd.f32 0.05243302, %v1937_v3  ;;  %v1951_v13 = vadd.f32 0.4994258, %v1950_v55  ;;  %v1897_v2 = vmul.f32 %v1896_v28, %v6132_v44  ;;  %v1974_v32 = vadd.f32 0.00028619796, %v1973_v56 }
 0x2ef   :  { %v6199_v49 = vmul.f32 %v1822_v7, %v6036_v34  ;;  %v1858_v37 = vadd.f32 0.05243302, %v1857_v10  ;;  %v6204_v15 = vmul.f32 %v1807_v46, %v1783_v9  ;;  %v1910_v1 = vmul.f32 %v1909_v31, %v6132_v44 }
 0x2f0   :  { %v2013_v34 = vmul.f32 2.1237322e-06, %v6178_v35  ;;  %v2025_v25 = vadd.f32 0.001143296, %v2024_v53  ;;  %v1837_v39 = vmul.f32 %v6153_v52, %v1836_v6  ;;  %v1846_v17 = vor.u32 1.1754944e-38, %v1845_v58 }
 0x2f1   :  { %v1991_v50 = vadd.f32 0.4994258, %v1990_v61  ;;  %v6212_v12 = vmul.f32 0.70710677, %v6196_v4  ;;  %v1859_v16 = vmul.f32 %v1858_v37, %v6079_v19  ;;  %v1876_v57 = vsub.f32 1.0, %v1875_v47 }
 0x2f2   :  { %v1911_v48 = vadd.f32 0.4994258, %v1910_v1  ;;  %v2026_v43 = vmul.f32 %v2025_v25, %v6178_v35  ;;  %v1939_v29 = vmul.f32 %v1938_v30, %v6088_v42  ;;  %v1952_v9 = vmul.f32 %v1951_v13, %v6088_v42 }
 0x2f3   :  { %v1898_v14 = vadd.f32 0.05243302, %v1897_v2  ;;  %v2051_v18 = vmul.f32 %v6212_v12, %v6212_v12  ;;  %v1975_v40 = vmul.f32 %v1974_v32, %v6101_v54  ;;  %v2014_v38 = vadd.f32 0.00028619796, %v2013_v34 }
 0x2f4   :  { %v1912_v0 = vmul.f32 %v1911_v48, %v6132_v44  ;;  %v2027_v21 = vadd.f32 0.014752088, %v2026_v43  ;;  %v1838_v7 = vadd.f32 %v6153_v52, %v1837_v39  ;;  %vm1840_vm2 = vweird.f32 %v6153_v52 }
 0x2f5   :  { %v1992_v10 = vmul.f32 %v1991_v50, %v6101_v54  ;;  %v6225_v26 = vmin.f32 %v2051_v18, 16.0  ;;  %vm6227_vm3 = vcmp.eq.f32.partialorder %v1843_v36, 8.507059e+37  ;;  %v1860_v55 = vadd.f32 0.18741608, %v1859_v16  ;;  %vm6242_vm4 = vmor %vm1839_vm1, %vm1840_vm2 }
 0x2f6   :  { %v1877_v28 = vmul.f32 %v6184_v22, %v1876_v57  ;;  %v6232_v24 = vadd.f32 1.0, %v1912_v0  ;;  %v2028_v46 = vmul.f32 %v2027_v21, %v6178_v35  ;;  %v6235_v58 = vadd.f32 1.0, %v1952_v9 }
 0x2f7   :  { %v1899_v56 = vmul.f32 %v1898_v14, %v6132_v44  ;;  %v2053_v53 = vmul.f32 2.1237322e-06, %v6225_v26  ;;  %v2064_v6 = vmul.f32 3.8918573e-05, %v6225_v26  ;;  %v1940_v31 = vadd.f32 0.18741608, %v1939_v29 }
 0x2f8   :  { %v1976_v36 = vadd.f32 0.0036580483, %v1975_v40  ;;  %4011 = vrcp.f32 %v6232_v24  ;;  %v2015_v37 = vmul.f32 %v2014_v38, %v6178_v35  ;;  %v1842_v47 = vsel %vm6242_vm4, %v6153_v52, %v1838_v7 }
 0x2f9   :  { %v6251_v30 = vadd.f32 1.0, %v1992_v10  ;;  %v2029_v13 = vadd.f32 0.112945676, %v2028_v46  ;;  %v2054_v2 = vadd.f32 0.00028619796, %v2053_v53  ;;  %v1861_v62 = vmul.f32 %v1860_v55, %v6079_v19  ;;  %v7654_v19 = vld [vmem:[#allocation3_spill] sm:$0xff] }
 0x2fa   :  { %v1878_v32 = vadd.f32 %v6184_v22, %v1877_v28  ;;  %vm1880_vm5 = vweird.f32 %v6184_v22  ;;  %v2065_v1 = vadd.f32 0.001143296, %v2064_v6  ;;  %4013 = vrcp.f32 %v6235_v58 }
 0x2fb   :  { %v1885_v34 = vand.u32 2147483648, %v6134_v33  ;;  %v1900_v25 = vadd.f32 0.18741608, %v1899_v56  ;;  %v2030_v39 = vmul.f32 %v2029_v13, %v6178_v35  ;;  %vm1879_vm6 = vweird.f32 %v6134_v33 }
 0x2fc   :  { %v1883_v52 = vand.u32 2147483647, %v6134_v33  ;;  %v2016_v50 = vadd.f32 0.0036580483, %v2015_v37  ;;  %v2066_v16 = vmul.f32 %v2065_v1, %v6225_v26  ;;  %vm6262_vm7 = vmor %vm1879_vm6, %vm1880_vm5  ;;  %v1977_v57 = vmul.f32 %v1976_v36, %v6101_v54 }
 0x2fd   :  { %4015 = vrcp.f32 %v6251_v30  ;;  %v2031_v48 = vadd.f32 0.4994258, %v2030_v39  ;;  %v2055_v43 = vmul.f32 %v2054_v2, %v6225_v26  ;;  %v1941_v9 = vmul.f32 %v1940_v31, %v6088_v42 }
 0x2fe   :  { %v4012_v29 = vpop.eup %4011  ;;  %v1862_v14 = vadd.f32 1.1283791, %v1861_v62  ;;  %v1882_v33 = vsel %vm6262_vm7, %v6184_v22, %v1878_v32  ;;  %v2067_v18 = vadd.f32 0.014752088, %v2066_v16  ;;  %v1847_v40 = vsel %vm6227_vm3, %v1846_v17, %v1842_v47 }
 0x2ff   :  { %v1886_v0 = vor.u32 1.1754944e-38, %v1885_v34  ;;  %v1901_v38 = vmul.f32 %v1900_v25, %v6132_v44  ;;  %v1915_v21 = vmul.f32 %v4012_v29, %v6232_v24  ;;  %vm1884_vm9 = vcmp.eq.f32.partialorder %v1883_v52, 8.507059e+37 }
 0x300   :  { %v2017_v7 = vmul.f32 %v2016_v50, %v6178_v35  ;;  %v2032_v10 = vmul.f32 %v2031_v48, %v6178_v35  ;;  %v2068_v42 = vmul.f32 %v2067_v18, %v6225_v26  ;;  %v6280_v55 = vpop.eup %4013  ;;  %v1978_v22 = vadd.f32 0.05243302, %v1977_v57 }
 0x301   :  { %v1887_v28 = vsel %vm1884_vm9, %v1886_v0, %v1882_v33  ;;  %v1916_v46 = vsub.f32 1.0, %v1915_v21  ;;  %v2056_v56 = vadd.f32 0.0036580483, %v2055_v43  ;;  %v1863_v17 = vmul.f32 %v1862_v14, %v6070_v63  ;;  %v6302_v43 = vpop.permute.xlu2 %2366 }
 0x302   :  { %v1925_v3 = vand.u32 2147483648, %v6232_v24  ;;  %v6284_v44 = vadd.f32 1.0, %v2032_v10  ;;  %v2069_v53 = vadd.f32 0.112945676, %v2068_v42  ;;  %v1902_v61 = vadd.f32 1.1283791, %v1901_v38 }
 0x303   :  { %v6286_v6 = vpop.eup %4015  ;;  %v1917_v31 = vmul.f32 %v4012_v29, %v1916_v46  ;;  %vm1920_vm10 = vweird.f32 %v4012_v29  ;;  %v1923_v36 = vand.u32 2147483647, %v6232_v24  ;;  %v1848_v37 = vmul.f32 %v1847_v40, %v6199_v49 }
 0x304   :  { %v1888_v47 = vmul.f32 %v1887_v28, %v1863_v17  ;;  %v2018_v13 = vadd.f32 0.05243302, %v2017_v7  ;;  %4017 = vrcp.f32 %v6284_v44  ;;  %vm1919_vm11 = vweird.f32 %v6232_v24 }
 0x305   :  { %v1918_v2 = vadd.f32 %v4012_v29, %v1917_v31  ;;  %v2057_v63 = vmul.f32 %v2056_v56, %v6225_v26  ;;  %v2070_v62 = vmul.f32 %v2069_v53, %v6225_v26  ;;  %v1955_v32 = vmul.f32 %v6280_v55, %v6235_v58  ;;  %vm1921_vm12 = vmor %vm1919_vm11, %vm1920_vm10 }
 0x306   :  { %v1979_v1 = vmul.f32 %v1978_v22, %v6101_v54  ;;  %v1995_v34 = vmul.f32 %v6286_v6, %v6251_v30  ;;  %v1926_v49 = vor.u32 1.1754944e-38, %v1925_v3  ;;  %v1903_v25 = vmul.f32 %v1902_v61, %v6116_v8 }
 0x307   :  { %v1922_v39 = vsel %vm1921_vm12, %v4012_v29, %v1918_v2  ;;  %vm1924_vm13 = vcmp.eq.f32.partialorder %v1923_v36, 8.507059e+37  ;;  %v2071_v52 = vadd.f32 0.4994258, %v2070_v62  ;;  %v2019_v16 = vmul.f32 %v2018_v13, %v6178_v35 }
 0x308   :  { %v1927_v50 = vsel %vm1924_vm13, %v1926_v49, %v1922_v39  ;;  %v3840_v48 = vclamps-f32 %v1888_v47, 1.0  ;;  %v774_v14 = vmul.f32 0.5, %v6105_v23  ;;  %v2058_v18 = vadd.f32 0.05243302, %v2057_v63 }
 0x309   :  { %v1928_v33 = vmul.f32 %v1927_v50, %v1903_v25  ;;  %v2072_v40 = vmul.f32 %v2071_v52, %v6225_v26  ;;  %v6308_v8 = vadd.f32 1.1283791, %v1941_v9  ;;  %v1956_v29 = vsub.f32 1.0, %v1955_v32  ;;  %v6320_v9 = vld [vmem:[%s7461_s1 + $0x2] ss:$0 sm:$0xff] }
 0x30a   :  { %v6306_v0 = vpop.eup %4017  ;;  %v1996_v38 = vsub.f32 1.0, %v1995_v34  ;;  %v1980_v7 = vadd.f32 0.18741608, %v1979_v1  ;;  %v3839_v28 = vclamps-f32 %v1848_v37, 1.0  ;;  %v2020_v23 = vadd.f32 0.18741608, %v2019_v16 }
 0x30b   :  { %v3841_v10 = vclamps-f32 %v1928_v33, 1.0  ;;  %v2035_v42 = vmul.f32 %v6306_v0, %v6284_v44  ;;  %v6315_v22 = vadd.f32 1.0, %v2072_v40  ;;  %v2117_v46 = vadd.f32 1.0, %v3840_v48 }
 0x30c   :  { %v2059_v53 = vmul.f32 %v2058_v18, %v6225_v26  ;;  %v3838_v61 = vclamps-f32 %v6204_v15, 1.0  ;;  %v1957_v31 = vmul.f32 %v6280_v55, %v1956_v29  ;;  %vm1959_vm14 = vweird.f32 %v6235_v58 }
 0x30d   :  { %v2118_v17 = vadd.f32 1.0, %v3841_v10  ;;  %v2036_v3 = vsub.f32 1.0, %v2035_v42  ;;  %v1997_v36 = vmul.f32 %v6286_v6, %v1996_v38  ;;  %4019 = vrcp.f32 %v6315_v22  ;;  %v4086_v10 = vld [vmem:[%s7465_s6] sm:$0xff] }
 0x30e   :  { %v2116_v13 = vadd.f32 1.0, %v3839_v28  ;;  %vm1960_vm15 = vweird.f32 %v6280_v55  ;;  %v1981_v63 = vmul.f32 %v1980_v7, %v6101_v54  ;;  %v2021_v15 = vmul.f32 %v2020_v23, %v6178_v35 }
 0x30f   :  { %v2150_v37 = vmul.f32 %v2118_v17, %v774_v14  ;;  %v2037_v47 = vmul.f32 %v6306_v0, %v2036_v3  ;;  %v2149_v62 = vmul.f32 %v2117_v46, %v6181_v41  ;;  %vm2040_vm1 = vweird.f32 %v6306_v0  ;;  %vm6359_vm6 = vmor %vm1959_vm14, %vm1960_vm15 }
 0x310   :  { %v2060_v1 = vadd.f32 0.18741608, %v2059_v53  ;;  %v2115_v34 = vadd.f32 1.0, %v3838_v61  ;;  %v1958_v49 = vadd.f32 %v6280_v55, %v1957_v31  ;;  %vm2000_vm2 = vweird.f32 %v6286_v6 }
 0x311   :  { %v2038_v32 = vadd.f32 %v6306_v0, %v2037_v47  ;;  %2314 = vmatpush.msrb.mxu2 %v2150_v37  ;;  %v2003_v25 = vand.u32 2147483647, %v6251_v30  ;;  %v2045_v54 = vand.u32 2147483648, %v6284_v44  ;;  %v1998_v35 = vadd.f32 %v6286_v6, %v1997_v36 }
 0x312   :  { %vm2039_vm3 = vweird.f32 %v6284_v44  ;;  %v2043_v41 = vand.u32 2147483647, %v6284_v44  ;;  %v2148_v39 = vmul.f32 %v2116_v13, %v6174_v45  ;;  %vm1999_vm4 = vweird.f32 %v6251_v30 }
 0x313   :  { %2315 = vmatpush.msrb.mxu2 %v2149_v62  ;;  %v4020_v52 = vpop.eup %4019  ;;  %v2005_v50 = vand.u32 2147483648, %v6251_v30  ;;  %v2022_v16 = vadd.f32 1.1283791, %v2021_v15  ;;  %vm6351_vm5 = vmor %vm2039_vm3, %vm2040_vm1  ;;  %v2061_v30 = vmul.f32 %v2060_v1, %v6225_v26  ;;  %v2147_v48 = vmul.f32 %v2115_v34, %v6141_v5  ;;  %v7663_v62 = vld [vmem:[#allocation10_spill] sm:$0xff] }
 0x314   :  { %v2042_v44 = vsel %vm6351_vm5, %v6306_v0, %v2038_v32  ;;  %v1962_v14 = vsel %vm6359_vm6, %v6280_v55, %v1958_v49  ;;  %v1965_v33 = vand.u32 2147483648, %v6235_v58  ;;  %v1982_v18 = vadd.f32 1.1283791, %v1981_v63  ;;  %vm6375_vm7 = vmor %vm1999_vm4, %vm2000_vm2 }
 0x315   :  { %2316 = vmatpush.msrb.mxu2 %v2148_v39  ;;  %v2046_v0 = vor.u32 1.1754944e-38, %v2045_v54  ;;  %v2002_v26 = vsel %vm6375_vm7, %v6286_v6, %v1998_v35  ;;  %vm6382_vm9 = vcmp.eq.f32.partialorder %v2003_v25, 8.507059e+37  ;;  %vm2044_vm10 = vcmp.eq.f32.partialorder %v2043_v41, 8.507059e+37 }
 0x316   :  { %v2023_v29 = vmul.f32 %v2022_v16, %v6145_v20  ;;  %v2085_v7 = vand.u32 2147483648, %v6315_v22  ;;  %v2062_v42 = vadd.f32 1.1283791, %v2061_v30  ;;  %vm2080_vm11 = vweird.f32 %v4020_v52  ;;  %v6416_v30 = vpop.permute.xlu1 %2371 }
 0x317   :  { %2317 = vmatpush.msrb.mxu2 %v2147_v48  ;;  %v2047_v38 = vsel %vm2044_vm10, %v2046_v0, %v2042_v44  ;;  %v2083_v23 = vand.u32 2147483647, %v6315_v22  ;;  %v1966_v46 = vor.u32 1.1754944e-38, %v1965_v33  ;;  %vm2079_vm13 = vweird.f32 %v6315_v22  ;;  %v7664_v44 = vld [vmem:[#allocation9_spill] sm:$0xff]  ;;  %v7665_v48 = vld [vmem:[#allocation2_spill] sm:$0xff] }
 0x318   :  { %3858 = vmatmul.msk.f32.vlgmr.msrb.gmra.mxu2 %vm2157_vm8, %v4086_v10  ;;  %v2048_v17 = vmul.f32 %v2047_v38, %v2023_v29  ;;  %v1943_v53 = vmul.f32 %v6308_v8, %v6067_v27  ;;  %vm2081_vm14 = vmor %vm2079_vm13, %vm2080_vm11  ;;  %v2086_v31 = vor.u32 1.1754944e-38, %v2085_v7  ;;  %v2063_v37 = vmul.f32 %v2062_v42, %v6212_v12  ;;  %v7666_v33 = vld [vmem:[#allocation6_spill] sm:$0xff] }
 0x319   :  { %vm2084_vm15 = vcmp.eq.f32.partialorder %v2083_v23, 8.507059e+37  ;;  %v778_v1 = vmul.f32 0.5, %v6196_v4  ;;  %v777_v54 = vmul.f32 0.5, %v6128_v11 }
 0x31a   :  { %v3844_v15 = vclamps-f32 %v2048_v17, 1.0 }
 0x31c   :  { %v2121_v34 = vadd.f32 1.0, %v3844_v15 }
 0x320   :  { %v2181_v24 = vpop.f32.mrf.mxu0 }
 0x321   :  { %v2348_v57 = vadd.f32 %v2181_v24, %v7654_v19  ;;  %v1963_v24 = vand.u32 2147483647, %v6235_v58  ;;  %v2006_v58 = vor.u32 1.1754944e-38, %v2005_v50  ;;  %v775_v19 = vmul.f32 0.5, %v6056_v59 }
 0x323   :  { %v6311_v21 = vadd.f32 %v6302_v43, %v2348_v57  ;;  %v2075_v57 = vmul.f32 %v4020_v52, %v6315_v22  ;;  %vm1964_vm12 = vcmp.eq.f32.partialorder %v1963_v24, 8.507059e+37  ;;  %v2007_v20 = vsel %vm6382_vm9, %v2006_v58, %v2002_v26 }
 0x324   :  { %v1967_v61 = vsel %vm1964_vm12, %v1966_v46, %v1962_v14  ;;  %v2153_v24 = vmul.f32 %v2121_v34, %v777_v54 }
 0x325   :  { %v2390_v56 = vmul.f32 %v6320_v9, %v6311_v21  ;;  %v2076_v55 = vsub.f32 1.0, %v2075_v57 }
 0x327   :  { %v2406_v2 = vsel %vm76_vm0, %v2390_v56, 0.0  ;;  %v2077_v28 = vmul.f32 %v4020_v52, %v2076_v55  ;;  %v1983_v56 = vmul.f32 %v1982_v18, %v6092_v51  ;;  %v4087_v51 = vld [vmem:[%s7465_s6 + $0x8] sm:$0xff] }
 0x328   :  { %2407 = vadd.xlane.f32.xlu0 %v2406_v2  ;;  %v2184_v6 = vpop.f32.mrf.mxu0  ;;  %v1968_v2 = vmul.f32 %v1967_v61, %v1943_v53  ;;  %3859 = vmatmul.msk.f32.gmra.mxu2 %vm2157_vm8, %v4087_v51 }
 0x329   :  { %v2078_v3 = vadd.f32 %v4020_v52, %v2077_v28  ;;  %v2008_v36 = vmul.f32 %v2007_v20, %v1983_v56  ;;  %v2349_v14 = vadd.f32 %v2184_v6, %v7665_v48  ;;  %v7667_v6 = vld [vmem:[#allocation13_spill] sm:$0xff]  ;;  %v7668_v56 = vld [vmem:[#allocation11_spill] sm:$0xff] }
 0x32a   :  { %v3842_v49 = vclamps-f32 %v1968_v2, 1.0 }
 0x32b   :  { %v2082_v47 = vsel %vm2081_vm14, %v4020_v52, %v2078_v3  ;;  %v3843_v8 = vclamps-f32 %v2008_v36, 1.0  ;;  %v776_v52 = vmul.f32 0.5, %v6084_v60  ;;  %v6430_v26 = vadd.f32 %v6416_v30, %v2349_v14  ;;  %v7669_v3 = vld [vmem:[#allocation4_spill] sm:$0xff] }
 0x32c   :  { %v2087_v13 = vsel %vm2084_vm15, %v2086_v31, %v2082_v47  ;;  %v2119_v50 = vadd.f32 1.0, %v3842_v49 }
 0x32d   :  { %v2088_v63 = vmul.f32 %v2087_v13, %v2063_v37  ;;  %v2120_v41 = vadd.f32 1.0, %v3843_v8  ;;  %v2391_v38 = vmul.f32 %v6320_v9, %v6430_v26  ;;  %v7671_v8 = vld [vmem:[#allocation8_spill] sm:$0xff] }
 0x32e   :  { %v2151_v18 = vmul.f32 %v2119_v50, %v775_v19  ;;  %v7673_v50 = vld [vmem:[#allocation7_spill] sm:$0xff] }
 0x32f   :  { %v3845_v27 = vclamps-f32 %v2088_v63, 1.0  ;;  %v2152_v45 = vmul.f32 %v2120_v41, %v776_v52  ;;  %v2409_v7 = vsel %vm76_vm0, %v2391_v38, 0.0  ;;  %v7672_v41 = vld [vmem:[#allocation15_spill] sm:$0xff] }
 0x331   :  { %v2122_v12 = vadd.f32 1.0, %v3845_v27 }
 0x333   :  { %v2154_v35 = vmul.f32 %v2122_v12, %v778_v1 }
 0x335   :  { %2337 = vmatpush.msrb.mxu3 %v2154_v35 }
 0x337   :  { %2338 = vmatpush.msrb.mxu3 %v2153_v24 }
 0x339   :  { %v2273_v22 = vpop.f32.mrf.mxu0  ;;  %2339 = vmatpush.msrb.mxu3 %v2152_v45 }
 0x33a   :  { %v2356_v32 = vadd.f32 %v2273_v22, %v7663_v62 }
 0x33b   :  { %2340 = vmatpush.msrb.mxu3 %v2151_v18 }
 0x33c   :  { %v6407_v25 = vadd.f32 %v6302_v43, %v2356_v32  ;;  %3860 = vmatmul.msk.f32.vlgmr.msrb.gmra.mxu3 %vm2157_vm8, %v4086_v10 }
 0x33e   :  { %v2398_v39 = vmul.f32 %v6320_v9, %v6407_v25 }
 0x340   :  { %v2430_v4 = vsel %vm76_vm0, %v2398_v39, 0.0 }
 0x341   :  { %2431 = vadd.xlane.f32.xlu2 %v2430_v4  ;;  %v2276_v16 = vpop.f32.mrf.mxu0 }
 0x342   :  { %v2357_v11 = vadd.f32 %v2276_v16, %v7664_v44 }
 0x344   :  { %v2204_v57 = vpop.f32.mrf.mxu1  ;;  %v6421_v40 = vadd.f32 %v6416_v30, %v2357_v11  ;;  %3861 = vmatmul.msk.f32.gmra.mxu3 %vm2157_vm8, %v4087_v51  ;;  %v7670_v51 = vld [vmem:[#allocation16_spill] sm:$0xff] }
 0x345   :  { %v2350_v60 = vadd.f32 %v2204_v57, %v7666_v33  ;;  %v2250_v1 = vpop.f32.mrf.mxu3 }
 0x346   :  { %v2399_v59 = vmul.f32 %v6320_v9, %v6421_v40 }
 0x347   :  { %v6424_v0 = vadd.f32 %v6302_v43, %v2350_v60 }
 0x348   :  { %v2433_v55 = vsel %vm76_vm0, %v2399_v59, 0.0  ;;  %v7674_v59 = vld [vmem:[#allocation12_spill] sm:$0xff] }
 0x349   :  { %v2392_v5 = vmul.f32 %v6320_v9, %v6424_v0  ;;  %2434 = vadd.xlane.f32.xlu1 %v2433_v55 }
 0x34b   :  { %v2412_v58 = vsel %vm76_vm0, %v2392_v5, 0.0  ;;  %v2354_v5 = vadd.f32 %v2250_v1, %v7674_v59 }
 0x34c   :  { %v2207_v29 = vpop.f32.mrf.mxu1  ;;  %2413 = vadd.xlane.f32.xlu0 %v2412_v58 }
 0x34d   :  { %v2351_v53 = vadd.f32 %v2207_v29, %v7669_v3  ;;  %v2253_v57 = vpop.f32.mrf.mxu3 }
 0x34f   :  { %v6455_v36 = vadd.f32 %v6416_v30, %v2351_v53 }
 0x351   :  { %2410 = vadd.xlane.f32.xlu1 %v2409_v7  ;;  %v2393_v47 = vmul.f32 %v6320_v9, %v6455_v36 }
 0x352   :  { %v2227_v2 = vpop.f32.mrf.mxu2 }
 0x353   :  { %v2415_v13 = vsel %vm76_vm0, %v2393_v47, 0.0  ;;  %v2352_v62 = vadd.f32 %v2227_v2, %v7671_v8 }
 0x354   :  { %v2296_v10 = vpop.f32.mrf.mxu1 }
 0x355   :  { %v2358_v42 = vadd.f32 %v2296_v10, %v7667_v6  ;;  %v6469_v49 = vadd.f32 %v6302_v43, %v2352_v62  ;;  %v6501_v10 = vadd.f32 %v6302_v43, %v2354_v5  ;;  %v7675_v6 = vld [vmem:[#allocation17_spill] sm:$0xff] }
 0x357   :  { %v6442_v28 = vadd.f32 %v6302_v43, %v2358_v42  ;;  %v2394_v19 = vmul.f32 %v6320_v9, %v6469_v49 }
 0x359   :  { %v2400_v23 = vmul.f32 %v6320_v9, %v6442_v28  ;;  %v2418_v33 = vsel %vm76_vm0, %v2394_v19, 0.0 }
 0x35a   :  { %v2230_v63 = vpop.f32.mrf.mxu2 }
 0x35b   :  { %v2436_v46 = vsel %vm76_vm0, %v2400_v23, 0.0  ;;  %v2353_v4 = vadd.f32 %v2230_v63, %v7673_v50 }
 0x35c   :  { %v2299_v20 = vpop.f32.mrf.mxu1  ;;  %2437 = vadd.xlane.f32.xlu2 %v2436_v46 }
 0x35d   :  { %v2359_v17 = vadd.f32 %v2299_v20, %v7668_v56  ;;  %v6486_v48 = vadd.f32 %v6416_v30, %v2353_v4  ;;  %v7676_v56 = vld [vmem:[#allocation5_spill] sm:$0xff] }
 0x35f   :  { %v6450_v61 = vadd.f32 %v6416_v30, %v2359_v17  ;;  %v2395_v55 = vmul.f32 %v6320_v9, %v6486_v48  ;;  %v2355_v17 = vadd.f32 %v2253_v57, %v7676_v56 }
 0x361   :  { %v2401_v31 = vmul.f32 %v6320_v9, %v6450_v61  ;;  %v2421_v23 = vsel %vm76_vm0, %v2395_v55, 0.0 }
 0x363   :  { %v2439_v37 = vsel %vm76_vm0, %v2401_v31, 0.0 }
 0x364   :  { %2440 = vadd.xlane.f32.xlu2 %v2439_v37  ;;  %v2396_v37 = vmul.f32 %v6320_v9, %v6501_v10 }
 0x366   :  { %v2424_v62 = vsel %vm76_vm0, %v2396_v37, 0.0 }
 0x36c   :  { %2416 = vadd.xlane.f32.xlu2 %v2415_v13 }
 0x39b   :  { %v2319_v15 = vpop.f32.mrf.mxu2  ;;  %v2408_v58 = vpop.xlane.xlu0 %2407 }
 0x39c   :  { %v2360_v22 = vadd.f32 %v2319_v15, %v7670_v51  ;;  %v2454_v13 = vmul.f32 0.071428575, %v2408_v58  ;;  %v6519_v15 = vadd.f32 %v6416_v30, %v2355_v17 }
 0x39e   :  { %v6464_v32 = vadd.f32 %v6302_v43, %v2360_v22 }
 0x3a0   :  { %v2402_v12 = vmul.f32 %v6320_v9, %v6464_v32 }
 0x3a2   :  { %v2442_v54 = vsel %vm76_vm0, %v2402_v12, 0.0  ;;  %v2470_v12 = vsub.f32 %v6311_v21, %v2454_v13 }
 0x3a3   :  { %2443 = vadd.xlane.f32.xlu1 %v2442_v54 }
 0x3ab   :  { %v2322_v35 = vpop.f32.mrf.mxu2  ;;  %2419 = vadd.xlane.f32.xlu1 %v2418_v33 }
 0x3ac   :  { %v2361_v39 = vadd.f32 %v2322_v35, %v7672_v41  ;;  %v2397_v41 = vmul.f32 %v6320_v9, %v6519_v15 }
 0x3ae   :  { %v6476_v16 = vadd.f32 %v6416_v30, %v2361_v39 }
 0x3b0   :  { %v2403_v45 = vmul.f32 %v6320_v9, %v6476_v16 }
 0x3b2   :  { %v2445_v14 = vsel %vm76_vm0, %v2403_v45, 0.0  ;;  %v6540_v45 = vmul.f32 %v6320_v9, %v2470_v12 }
 0x3b3   :  { %2446 = vadd.xlane.f32.xlu0 %v2445_v14  ;;  %2422 = vadd.xlane.f32.xlu1 %v2421_v23 }
 0x3b4   :  { %v2432_v27 = vpop.xlane.xlu2 %2431 }
 0x3b5   :  { %v2462_v34 = vmul.f32 0.071428575, %v2432_v27  ;;  %v7677_v27 = vld [vmem:[#allocation14_spill] sm:$0xff] }
 0x3b7   :  { %v2478_v52 = vsub.f32 %v6407_v25, %v2462_v34 }
 0x3b9   :  { %v6483_v11 = vmul.f32 %v6320_v9, %v2478_v52 }
 0x3bb   :  { %v2510_v18 = vmul.f32 %v6483_v11, %v6483_v11  ;;  %2425 = vadd.xlane.f32.xlu1 %v2424_v62 }
 0x3bc   :  { %v2435_v24 = vpop.xlane.xlu1 %2434 }
 0x3bd   :  { %v2463_v44 = vmul.f32 0.071428575, %v2435_v24  ;;  %v2542_v29 = vsel %vm76_vm0, %v2510_v18, 0.0  ;;  %v2502_v18 = vmul.f32 %v6540_v45, %v6540_v45 }
 0x3be   :  { %2543 = vadd.xlane.f32.xlu0 %v2542_v29 }
 0x3bf   :  { %v2479_v60 = vsub.f32 %v6421_v40, %v2463_v44  ;;  %v2342_v7 = vpop.f32.mrf.mxu3  ;;  %v2414_v47 = vpop.xlane.xlu0 %2413  ;;  %v2427_v44 = vsel %vm76_vm0, %v2397_v41, 0.0  ;;  %v2518_v29 = vsel %vm76_vm0, %v2502_v18, 0.0 }
 0x3c0   :  { %v2362_v42 = vadd.f32 %v2342_v7, %v7675_v6  ;;  %v2456_v22 = vmul.f32 0.071428575, %v2414_v47 }
 0x3c1   :  { %v6498_v38 = vmul.f32 %v6320_v9, %v2479_v60 }
 0x3c2   :  { %v6506_v46 = vadd.f32 %v6302_v43, %v2362_v42  ;;  %v2472_v39 = vsub.f32 %v6424_v0, %v2456_v22 }
 0x3c3   :  { %v2511_v20 = vmul.f32 %v6498_v38, %v6498_v38  ;;  %2428 = vadd.xlane.f32.xlu1 %v2427_v44 }
 0x3c4   :  { %v2404_v53 = vmul.f32 %v6320_v9, %v6506_v46  ;;  %v2411_v54 = vpop.xlane.xlu1 %2410  ;;  %v6545_v14 = vmul.f32 %v6320_v9, %v2472_v39 }
 0x3c5   :  { %v2545_v63 = vsel %vm76_vm0, %v2511_v20, 0.0  ;;  %v2455_v19 = vmul.f32 0.071428575, %v2411_v54 }
 0x3c6   :  { %v2448_v2 = vsel %vm76_vm0, %v2404_v53, 0.0  ;;  %2546 = vadd.xlane.f32.xlu0 %v2545_v63  ;;  %v2504_v55 = vmul.f32 %v6545_v14, %v6545_v14 }
 0x3c7   :  { %v2345_v51 = vpop.f32.mrf.mxu3  ;;  %2449 = vadd.xlane.f32.xlu2 %v2448_v2  ;;  %v2471_v60 = vsub.f32 %v6430_v26, %v2455_v19 }
 0x3c8   :  { %v2363_v8 = vadd.f32 %v2345_v51, %v7677_v27  ;;  %v2524_v42 = vsel %vm76_vm0, %v2504_v55, 0.0 }
 0x3c9   :  { %v6560_v6 = vmul.f32 %v6320_v9, %v2471_v60 }
 0x3ca   :  { %v6528_v34 = vadd.f32 %v6416_v30, %v2363_v8 }
 0x3cb   :  { %2525 = vadd.xlane.f32.xlu1 %v2524_v42  ;;  %v2503_v56 = vmul.f32 %v6560_v6, %v6560_v6 }
 0x3cc   :  { %v2405_v52 = vmul.f32 %v6320_v9, %v6528_v34 }
 0x3ce   :  { %v2451_v4 = vsel %vm76_vm0, %v2405_v52, 0.0 }
 0x3cf   :  { %v2438_v3 = vpop.xlane.xlu2 %2437  ;;  %2452 = vadd.xlane.f32.xlu2 %v2451_v4 }
 0x3d0   :  { %v2464_v31 = vmul.f32 0.071428575, %v2438_v3  ;;  %v2521_v3 = vsel %vm76_vm0, %v2503_v56, 0.0 }
 0x3d2   :  { %v2480_v43 = vsub.f32 %v6442_v28, %v2464_v31 }
 0x3d4   :  { %v6524_v1 = vmul.f32 %v6320_v9, %v2480_v43 }
 0x3d6   :  { %v2512_v50 = vmul.f32 %v6524_v1, %v6524_v1 }
 0x3d7   :  { %v2441_v35 = vpop.xlane.xlu2 %2440  ;;  %2519 = vadd.xlane.f32.xlu2 %v2518_v29 }
 0x3d8   :  { %v2465_v24 = vmul.f32 0.071428575, %v2441_v35  ;;  %v2548_v57 = vsel %vm76_vm0, %v2512_v50, 0.0 }
 0x3d9   :  { %2549 = vadd.xlane.f32.xlu0 %v2548_v57 }
 0x3da   :  { %v2481_v30 = vsub.f32 %v6450_v61, %v2465_v24 }
 0x3dc   :  { %v6548_v33 = vmul.f32 %v6320_v9, %v2481_v30 }
 0x3de   :  { %v2513_v58 = vmul.f32 %v6548_v33, %v6548_v33 }
 0x3df   :  { %v2417_v59 = vpop.xlane.xlu2 %2416  ;;  %2522 = vadd.xlane.f32.xlu2 %v2521_v3 }
 0x3e0   :  { %v2457_v5 = vmul.f32 0.071428575, %v2417_v59  ;;  %v2551_v23 = vsel %vm76_vm0, %v2513_v58, 0.0 }
 0x3e1   :  { %2552 = vadd.xlane.f32.xlu0 %v2551_v23 }
 0x3e2   :  { %v2473_v7 = vsub.f32 %v6455_v36, %v2457_v5 }
 0x3e4   :  { %v6565_v20 = vmul.f32 %v6320_v9, %v2473_v7 }
 0x3e6   :  { %v2505_v17 = vmul.f32 %v6565_v20, %v6565_v20 }
 0x3e8   :  { %v2527_v53 = vsel %vm76_vm0, %v2505_v17, 0.0 }
 0x3e9   :  { %2528 = vadd.xlane.f32.xlu0 %v2527_v53  ;;  %v2807_v53 = vld [vmem:[%s7466_s7 + $0x8] sm:$0xff] }
 0x3ea   :  { %3910 = vmatpush.msra.mxu2 %v2807_v53  ;;  %2873 = vmatpush.msra.mxu0 %v2807_v53 }
 0x416   :  { %v2444_v31 = vpop.xlane.xlu1 %2443 }
 0x417   :  { %v2466_v37 = vmul.f32 0.071428575, %v2444_v31 }
 0x419   :  { %v2482_v47 = vsub.f32 %v6464_v32, %v2466_v37 }
 0x41b   :  { %v6575_v13 = vmul.f32 %v6320_v9, %v2482_v47 }
 0x41d   :  { %v2514_v2 = vmul.f32 %v6575_v13, %v6575_v13 }
 0x41e   :  { %v2420_v63 = vpop.xlane.xlu1 %2419 }
 0x41f   :  { %v2458_v22 = vmul.f32 0.071428575, %v2420_v63  ;;  %v2554_v27 = vsel %vm76_vm0, %v2514_v2, 0.0  ;;  %v2806_v2 = vld [vmem:[%s7466_s7] sm:$0xff] }
 0x420   :  { %2555 = vadd.xlane.f32.xlu2 %v2554_v27  ;;  %3911 = vmatpush.msra.mxu2 %v2806_v2 }
 0x421   :  { %v2474_v62 = vsub.f32 %v6469_v49, %v2458_v22  ;;  %2874 = vmatpush.msra.mxu0 %v2806_v2 }
 0x423   :  { %v6586_v54 = vmul.f32 %v6320_v9, %v2474_v62 }
 0x425   :  { %v2506_v41 = vmul.f32 %v6586_v54, %v6586_v54 }
 0x426   :  { %v2447_v43 = vpop.xlane.xlu0 %2446  ;;  %v2423_v39 = vpop.xlane.xlu1 %2422 }
 0x427   :  { %v2467_v51 = vmul.f32 0.071428575, %v2447_v43  ;;  %v2459_v24 = vmul.f32 0.071428575, %v2423_v39  ;;  %v2530_v19 = vsel %vm76_vm0, %v2506_v41, 0.0 }
 0x428   :  { %2531 = vadd.xlane.f32.xlu2 %v2530_v19 }
 0x429   :  { %v2483_v8 = vsub.f32 %v6476_v16, %v2467_v51  ;;  %v2475_v30 = vsub.f32 %v6486_v48, %v2459_v24 }
 0x42b   :  { %v6583_v12 = vmul.f32 %v6320_v9, %v2483_v8  ;;  %v6596_v57 = vmul.f32 %v6320_v9, %v2475_v30 }
 0x42d   :  { %v2515_v35 = vmul.f32 %v6583_v12, %v6583_v12  ;;  %v2507_v59 = vmul.f32 %v6596_v57, %v6596_v57 }
 0x42e   :  { %v2426_v5 = vpop.xlane.xlu1 %2425 }
 0x42f   :  { %v2557_v4 = vsel %vm76_vm0, %v2515_v35, 0.0  ;;  %v2460_v29 = vmul.f32 0.071428575, %v2426_v5  ;;  %v2533_v42 = vsel %vm76_vm0, %v2507_v59, 0.0 }
 0x430   :  { %2558 = vadd.xlane.f32.xlu1 %v2557_v4 }
 0x431   :  { %v2544_v52 = vpop.xlane.xlu0 %2543  ;;  %v2476_v17 = vsub.f32 %v6501_v10, %v2460_v29 }
 0x432   :  { %v2574_v50 = vmul.f32 0.071428575, %v2544_v52 }
 0x433   :  { %v6615_v47 = vmul.f32 %v6320_v9, %v2476_v17 }
 0x434   :  { %v2590_v44 = vadd.f32 1e-05, %v2574_v50 }
 0x435   :  { %v2508_v52 = vmul.f32 %v6615_v47, %v6615_v47 }
 0x436   :  { %4021 = vrsqrt.f32 %v2590_v44  ;;  %v2429_v8 = vpop.xlane.xlu1 %2428  ;;  %vm2684_vm2 = vweird.f32 %v2590_v44 }
 0x437   :  { %v2461_v41 = vmul.f32 0.071428575, %v2429_v8  ;;  %v2536_v5 = vsel %vm76_vm0, %v2508_v52, 0.0 }
 0x438   :  { %2534 = vadd.xlane.f32.xlu1 %v2533_v42 }
 0x439   :  { %v2547_v55 = vpop.xlane.xlu0 %2546  ;;  %v2477_v19 = vsub.f32 %v6519_v15, %v2461_v41 }
 0x43a   :  { %v2450_v60 = vpop.xlane.xlu2 %2449  ;;  %v2575_v7 = vmul.f32 0.071428575, %v2547_v55 }
 0x43b   :  { %v2468_v18 = vmul.f32 0.071428575, %v2450_v60  ;;  %v6636_v55 = vmul.f32 %v6320_v9, %v2477_v19 }
 0x43c   :  { %v4022_v23 = vpop.eup %4021  ;;  %v6606_v3 = vadd.f32 1e-05, %v2575_v7 }
 0x43d   :  { %v2484_v58 = vsub.f32 %v6506_v46, %v2468_v18  ;;  %v2679_v31 = vmul.f32 %v4022_v23, %v2590_v44  ;;  %vm2685_vm1 = vweird.f32 %v4022_v23  ;;  %v2509_v53 = vmul.f32 %v6636_v55, %v6636_v55 }
 0x43e   :  { %4023 = vrsqrt.f32 %v6606_v3  ;;  %vm2686_vm3 = vmor %vm2684_vm2, %vm2685_vm1  ;;  %vm2694_vm5 = vweird.f32 %v6606_v3 }
 0x43f   :  { %v6603_v56 = vmul.f32 %v6320_v9, %v2484_v58  ;;  %v2680_v43 = vmul.f32 %v4022_v23, %v2679_v31 }
 0x441   :  { %v2516_v37 = vmul.f32 %v6603_v56, %v6603_v56  ;;  %v2681_v27 = vmul.f32 0.5, %v2680_v43 }
 0x442   :  { %v2453_v63 = vpop.xlane.xlu2 %2452 }
 0x443   :  { %v2469_v51 = vmul.f32 0.071428575, %v2453_v63  ;;  %v2560_v22 = vsel %vm76_vm0, %v2516_v37, 0.0  ;;  %v2682_v24 = vsub.f32 1.5, %v2681_v27  ;;  %v2526_v37 = vpop.xlane.xlu1 %2525 }
 0x444   :  { %2561 = vadd.xlane.f32.xlu0 %v2560_v22  ;;  %v4024_v50 = vpop.eup %4023  ;;  %v2539_v22 = vsel %vm76_vm0, %v2509_v53, 0.0 }
 0x445   :  { %v2485_v35 = vsub.f32 %v6528_v34, %v2469_v51  ;;  %v2683_v60 = vmul.f32 %v4022_v23, %v2682_v24  ;;  %v2689_v18 = vmul.f32 %v4024_v50, %v6606_v3  ;;  %vm2695_vm4 = vweird.f32 %v4024_v50  ;;  %2540 = vadd.xlane.f32.xlu1 %v2539_v22 }
 0x446   :  { %vm2696_vm6 = vmor %vm2694_vm5, %vm2695_vm4 }
 0x447   :  { %v6625_v4 = vmul.f32 %v6320_v9, %v2485_v35  ;;  %v2687_v58 = vsel %vm2686_vm3, %v4022_v23, %v2683_v60  ;;  %v2690_v29 = vmul.f32 %v4024_v50, %v2689_v18  ;;  %v6645_v9 = vld [vmem:[%s7461_s1] ss:$0 sm:$0xff] }
 0x448   :  { %v2766_v42 = vmul.f32 %v2687_v58, %v6483_v11  ;;  %v2568_v11 = vmul.f32 0.071428575, %v2526_v37 }
 0x449   :  { %v2517_v59 = vmul.f32 %v6625_v4, %v6625_v4  ;;  %v2691_v31 = vmul.f32 0.5, %v2690_v29 }
 0x44a   :  { %v2520_v7 = vpop.xlane.xlu2 %2519  ;;  %v2782_v23 = vmul.f32 %v6645_v9, %v2766_v42  ;;  %v6652_v8 = vadd.f32 1e-05, %v2568_v11 }
 0x44b   :  { %v2566_v17 = vmul.f32 0.071428575, %v2520_v7  ;;  %v2563_v44 = vsel %vm76_vm0, %v2517_v59, 0.0  ;;  %v2692_v51 = vsub.f32 1.5, %v2691_v31 }
 0x44c   :  { %v2550_v62 = vpop.xlane.xlu0 %2549  ;;  %2564 = vadd.xlane.f32.xlu2 %v2563_v44  ;;  %2537 = vadd.xlane.f32.xlu0 %v2536_v5 }
 0x44d   :  { %v2576_v39 = vmul.f32 0.071428575, %v2550_v62  ;;  %v6648_v43 = vadd.f32 1e-05, %v2566_v17  ;;  %v2693_v35 = vmul.f32 %v4024_v50, %v2692_v51 }
 0x44f   :  { %v6628_v30 = vadd.f32 1e-05, %v2576_v39  ;;  %v6661_v39 = vld [vmem:[%s7461_s1 + $0x1] ss:$0 sm:$0xff]  ;;  %v2697_v24 = vsel %vm2696_vm6, %v4024_v50, %v2693_v35  ;;  %vm2604_vm12 = vweird.f32 %v6648_v43  ;;  %vm2624_vm6 = vweird.f32 %v6652_v8 }
 0x450   :  { %v2798_v52 = vadd.f32 %v6661_v39, %v2782_v23  ;;  %v2767_v18 = vmul.f32 %v2697_v24, %v6498_v38 }
 0x451   :  { %4025 = vrsqrt.f32 %v6628_v30  ;;  %vm2704_vm9 = vweird.f32 %v6628_v30 }
 0x452   :  { %4027 = vrsqrt.f32 %v6648_v43  ;;  %v2523_v60 = vpop.xlane.xlu2 %2522  ;;  %3870 = vmatmul.msk.f32.vlgmr.msra.gmra.mxu2 %vm76_vm0, %v2798_v52  ;;  %v2783_v42 = vmul.f32 %v6645_v9, %v2767_v18 }
 0x453   :  { %4029 = vrsqrt.f32 %v6652_v8  ;;  %v2567_v3 = vmul.f32 0.071428575, %v2523_v60 }
 0x454   :  { %v2553_v2 = vpop.xlane.xlu0 %2552  ;;  %v2799_v31 = vadd.f32 %v6661_v39, %v2783_v42 }
 0x455   :  { %v2577_v63 = vmul.f32 0.071428575, %v2553_v2  ;;  %v2583_v29 = vadd.f32 1e-05, %v2567_v3 }
 0x457   :  { %v4026_v27 = vpop.eup %4025  ;;  %v6654_v62 = vadd.f32 1e-05, %v2577_v63  ;;  %vm2614_vm3 = vweird.f32 %v2583_v29 }
 0x458   :  { %v2699_v41 = vmul.f32 %v4026_v27, %v6628_v30  ;;  %v4028_v58 = vpop.eup %4027  ;;  %vm2705_vm7 = vweird.f32 %v4026_v27 }
 0x459   :  { %4031 = vrsqrt.f32 %v6654_v62  ;;  %v2599_v17 = vmul.f32 %v4028_v58, %v6648_v43  ;;  %v6670_v50 = vpop.eup %4029  ;;  %vm2706_vm10 = vmor %vm2704_vm9, %vm2705_vm7  ;;  %vm2605_vm11 = vweird.f32 %v4028_v58  ;;  %vm2714_vm15 = vweird.f32 %v6654_v62 }
 0x45a   :  { %v2700_v19 = vmul.f32 %v4026_v27, %v2699_v41  ;;  %4033 = vrsqrt.f32 %v2583_v29  ;;  %v2619_v23 = vmul.f32 %v6670_v50, %v6652_v8  ;;  %3871 = vmatmul.msk.f32.gmra.mxu2 %vm76_vm0, %v2799_v31  ;;  %vm2606_vm13 = vmor %vm2604_vm12, %vm2605_vm11  ;;  %vm2625_vm4 = vweird.f32 %v6670_v50 }
 0x45b   :  { %v2600_v38 = vmul.f32 %v4028_v58, %v2599_v17  ;;  %vm2626_vm7 = vmor %vm2624_vm6, %vm2625_vm4 }
 0x45c   :  { %v2701_v59 = vmul.f32 0.5, %v2700_v19  ;;  %v2529_v5 = vpop.xlane.xlu0 %2528  ;;  %v2620_v22 = vmul.f32 %v6670_v50, %v2619_v23 }
 0x45d   :  { %v2569_v7 = vmul.f32 0.071428575, %v2529_v5  ;;  %v2601_v63 = vmul.f32 0.5, %v2600_v38 }
 0x45e   :  { %v2702_v44 = vsub.f32 1.5, %v2701_v59  ;;  %v2621_v18 = vmul.f32 0.5, %v2620_v22 }
 0x45f   :  { %v6672_v53 = vadd.f32 1e-05, %v2569_v7  ;;  %v4032_v37 = vpop.eup %4031  ;;  %v2602_v52 = vsub.f32 1.5, %v2601_v63 }
 0x460   :  { %v2703_v2 = vmul.f32 %v4026_v27, %v2702_v44  ;;  %v2709_v11 = vmul.f32 %v4032_v37, %v6654_v62  ;;  %v4034_v30 = vpop.eup %4033  ;;  %vm2715_vm14 = vweird.f32 %v4032_v37  ;;  %v2622_v38 = vsub.f32 1.5, %v2621_v18 }
 0x461   :  { %4035 = vrsqrt.f32 %v6672_v53  ;;  %v2603_v60 = vmul.f32 %v4028_v58, %v2602_v52  ;;  %v2609_v3 = vmul.f32 %v4034_v30, %v2583_v29  ;;  %vm2716_vm1 = vmor %vm2714_vm15, %vm2715_vm14  ;;  %vm2615_vm2 = vweird.f32 %v4034_v30 }
 0x462   :  { %v2707_v51 = vsel %vm2706_vm10, %v4026_v27, %v2703_v2  ;;  %v2710_v35 = vmul.f32 %v4032_v37, %v2709_v11  ;;  %v2623_v62 = vmul.f32 %v6670_v50, %v2622_v38  ;;  %vm2616_vm5 = vmor %vm2614_vm3, %vm2615_vm2  ;;  %vm2634_vm10 = vweird.f32 %v6672_v53 }
 0x463   :  { %v2768_v41 = vmul.f32 %v2707_v51, %v6524_v1  ;;  %v2607_v7 = vsel %vm2606_vm13, %v4028_v58, %v2603_v60  ;;  %v2610_v42 = vmul.f32 %v4034_v30, %v2609_v3 }
 0x464   :  { %v2711_v24 = vmul.f32 0.5, %v2710_v35  ;;  %v2758_v17 = vmul.f32 %v2607_v7, %v6540_v45  ;;  %v2627_v29 = vsel %vm2626_vm7, %v6670_v50, %v2623_v62 }
 0x465   :  { %v2784_v19 = vmul.f32 %v6645_v9, %v2768_v41  ;;  %v2611_v31 = vmul.f32 0.5, %v2610_v42 }
 0x466   :  { %v2712_v27 = vsub.f32 1.5, %v2711_v24  ;;  %v2774_v2 = vmul.f32 %v6645_v9, %v2758_v17 }
 0x467   :  { %v4036_v59 = vpop.eup %4035  ;;  %v2800_v5 = vadd.f32 %v6661_v39, %v2784_v19  ;;  %v2612_v11 = vsub.f32 1.5, %v2611_v31  ;;  %v2760_v19 = vmul.f32 %v2627_v29, %v6545_v14 }
 0x468   :  { %v2629_v1 = vmul.f32 %v4036_v59, %v6672_v53  ;;  %v2713_v44 = vmul.f32 %v4032_v37, %v2712_v27  ;;  %v2790_v45 = vadd.f32 %v6661_v39, %v2774_v2  ;;  %vm2635_vm9 = vweird.f32 %v4036_v59 }
 0x469   :  { %3872 = vmatmul.msk.f32.gmra.mxu2 %vm76_vm0, %v2800_v5  ;;  %v2613_v63 = vmul.f32 %v4034_v30, %v2612_v11  ;;  %vm2636_vm11 = vmor %vm2634_vm10, %vm2635_vm9 }
 0x46a   :  { %v2630_v43 = vmul.f32 %v4036_v59, %v2629_v1  ;;  %v2717_v23 = vsel %vm2716_vm1, %v4032_v37, %v2713_v44  ;;  %3862 = vmatmul.msk.f32.vlgmr.msra.gmra.mxu0 %vm76_vm0, %v2790_v45 }
 0x46b   :  { %v2769_v58 = vmul.f32 %v2717_v23, %v6548_v33  ;;  %v2617_v35 = vsel %vm2616_vm5, %v4034_v30, %v2613_v63 }
 0x46c   :  { %v2631_v51 = vmul.f32 0.5, %v2630_v43  ;;  %v2759_v33 = vmul.f32 %v2617_v35, %v6560_v6  ;;  %v2776_v6 = vmul.f32 %v6645_v9, %v2760_v19 }
 0x46d   :  { %v2785_v22 = vmul.f32 %v6645_v9, %v2769_v58 }
 0x46e   :  { %v2632_v41 = vsub.f32 1.5, %v2631_v51  ;;  %v2775_v52 = vmul.f32 %v6645_v9, %v2759_v33  ;;  %v2792_v50 = vadd.f32 %v6661_v39, %v2776_v6 }
 0x46f   :  { %v2801_v37 = vadd.f32 %v6661_v39, %v2785_v22 }
 0x470   :  { %v2791_v24 = vadd.f32 %v6661_v39, %v2775_v52  ;;  %v2633_v60 = vmul.f32 %v4036_v59, %v2632_v41 }
 0x471   :  { %3873 = vmatmul.msk.f32.gmra.mxu2 %vm76_vm0, %v2801_v37 }
 0x472   :  { %3863 = vmatmul.msk.f32.gmra.mxu0 %vm76_vm0, %v2791_v24  ;;  %v2637_v8 = vsel %vm2636_vm11, %v4036_v59, %v2633_v60 }
 0x473   :  { %v2761_v30 = vmul.f32 %v2637_v8, %v6565_v20 }
 0x475   :  { %v2777_v3 = vmul.f32 %v6645_v9, %v2761_v30 }
 0x477   :  { %v2793_v14 = vadd.f32 %v6661_v39, %v2777_v3 }
 0x47a   :  { %3864 = vmatmul.msk.f32.gmra.mxu0 %vm76_vm0, %v2792_v50 }
 0x482   :  { %3865 = vmatmul.msk.f32.gmra.mxu0 %vm76_vm0, %v2793_v14 }
 0x493   :  { %v2556_v18 = vpop.xlane.xlu2 %2555 }
 0x494   :  { %v2578_v27 = vmul.f32 0.071428575, %v2556_v18 }
 0x496   :  { %v2594_v5 = vadd.f32 1e-05, %v2578_v27 }
 0x498   :  { %4037 = vrsqrt.f32 %v2594_v5  ;;  %vm2724_vm13 = vweird.f32 %v2594_v5 }
 0x49b   :  { %v2532_v53 = vpop.xlane.xlu2 %2531 }
 0x49c   :  { %v2570_v42 = vmul.f32 0.071428575, %v2532_v53 }
 0x49e   :  { %v4038_v1 = vpop.eup %4037  ;;  %v2586_v17 = vadd.f32 1e-05, %v2570_v42 }
 0x49f   :  { %v2719_v20 = vmul.f32 %v4038_v1, %v2594_v5  ;;  %vm2725_vm12 = vweird.f32 %v4038_v1 }
 0x4a0   :  { %4039 = vrsqrt.f32 %v2586_v17  ;;  %vm2726_vm14 = vmor %vm2724_vm13, %vm2725_vm12  ;;  %vm2644_vm2 = vweird.f32 %v2586_v17 }
 0x4a1   :  { %v2720_v31 = vmul.f32 %v4038_v1, %v2719_v20 }
 0x4a3   :  { %v2559_v7 = vpop.xlane.xlu1 %2558  ;;  %v2721_v38 = vmul.f32 0.5, %v2720_v31 }
 0x4a4   :  { %v2579_v59 = vmul.f32 0.071428575, %v2559_v7 }
 0x4a5   :  { %v2722_v23 = vsub.f32 1.5, %v2721_v38 }
 0x4a6   :  { %v2595_v44 = vadd.f32 1e-05, %v2579_v59  ;;  %v4040_v11 = vpop.eup %4039 }
 0x4a7   :  { %v2723_v63 = vmul.f32 %v4038_v1, %v2722_v23  ;;  %v2639_v62 = vmul.f32 %v4040_v11, %v2586_v17  ;;  %vm2645_vm15 = vweird.f32 %v4040_v11 }
 0x4a8   :  { %4041 = vrsqrt.f32 %v2595_v44  ;;  %vm2646_vm3 = vmor %vm2644_vm2, %vm2645_vm15  ;;  %vm2734_vm4 = vweird.f32 %v2595_v44 }
 0x4a9   :  { %v2727_v22 = vsel %vm2726_vm14, %v4038_v1, %v2723_v63  ;;  %v2640_v35 = vmul.f32 %v4040_v11, %v2639_v62 }
 0x4aa   :  { %v2770_v41 = vmul.f32 %v2727_v22, %v6575_v13 }
 0x4ab   :  { %v2535_v43 = vpop.xlane.xlu1 %2534  ;;  %v2641_v52 = vmul.f32 0.5, %v2640_v35 }
 0x4ac   :  { %v2571_v2 = vmul.f32 0.071428575, %v2535_v43  ;;  %v2786_v60 = vmul.f32 %v6645_v9, %v2770_v41 }
 0x4ad   :  { %v2642_v6 = vsub.f32 1.5, %v2641_v52 }
 0x4ae   :  { %v2587_v58 = vadd.f32 1e-05, %v2571_v2  ;;  %v4042_v45 = vpop.eup %4041  ;;  %v2802_v30 = vadd.f32 %v6661_v39, %v2786_v60 }
 0x4af   :  { %v2729_v51 = vmul.f32 %v4042_v45, %v2595_v44  ;;  %vm2735_vm1 = vweird.f32 %v4042_v45  ;;  %v2643_v3 = vmul.f32 %v4040_v11, %v2642_v6 }
 0x4b0   :  { %4043 = vrsqrt.f32 %v2587_v58  ;;  %3874 = vmatmul.msk.f32.gmra.mxu2 %vm76_vm0, %v2802_v30  ;;  %vm2736_vm5 = vmor %vm2734_vm4, %vm2735_vm1  ;;  %vm2654_vm7 = vweird.f32 %v2587_v58 }
 0x4b1   :  { %v2730_v33 = vmul.f32 %v4042_v45, %v2729_v51  ;;  %v2647_v13 = vsel %vm2646_vm3, %v4040_v11, %v2643_v3 }
 0x4b2   :  { %v2762_v1 = vmul.f32 %v2647_v13, %v6586_v54 }
 0x4b3   :  { %v2731_v24 = vmul.f32 0.5, %v2730_v33 }
 0x4b4   :  { %v2778_v44 = vmul.f32 %v6645_v9, %v2762_v1  ;;  %v6740_v1 = vld [vmem:[%s7467_s2] ss:$0 sm:$0xff] }
 0x4b5   :  { %v2732_v50 = vsub.f32 1.5, %v2731_v24 }
 0x4b6   :  { %v4044_v8 = vpop.eup %4043 }
 0x4b7   :  { %v2562_v37 = vpop.xlane.xlu0 %2561  ;;  %v2649_v14 = vmul.f32 %v4044_v8, %v2587_v58  ;;  %v2733_v18 = vmul.f32 %v4042_v45, %v2732_v50  ;;  %vm2655_vm6 = vweird.f32 %v4044_v8 }
 0x4b8   :  { %v2580_v29 = vmul.f32 0.071428575, %v2562_v37  ;;  %v2541_v43 = vpop.xlane.xlu1 %2540  ;;  %vm2656_vm9 = vmor %vm2654_vm7, %vm2655_vm6 }
 0x4b9   :  { %v2650_v27 = vmul.f32 %v4044_v8, %v2649_v14  ;;  %v2737_v7 = vsel %vm2736_vm5, %v4042_v45, %v2733_v18  ;;  %v2573_v63 = vmul.f32 0.071428575, %v2541_v43  ;;  %v2794_v45 = vadd.f32 %v6661_v39, %v2778_v44 }
 0x4ba   :  { %v2596_v19 = vadd.f32 1e-05, %v2580_v29  ;;  %v2771_v2 = vmul.f32 %v2737_v7, %v6583_v12 }
 0x4bb   :  { %v2651_v20 = vmul.f32 0.5, %v2650_v27  ;;  %v2589_v51 = vadd.f32 1e-05, %v2573_v63  ;;  %3866 = vmatmul.msk.f32.gmra.mxu0 %vm76_vm0, %v2794_v45 }
 0x4bc   :  { %4045 = vrsqrt.f32 %v2596_v19  ;;  %v2787_v22 = vmul.f32 %v6645_v9, %v2771_v2  ;;  %vm2744_vm11 = vweird.f32 %v2596_v19 }
 0x4bd   :  { %v2652_v11 = vsub.f32 1.5, %v2651_v20  ;;  %vm2674_vm5 = vweird.f32 %v2589_v51 }
 0x4be   :  { %v2803_v37 = vadd.f32 %v6661_v39, %v2787_v22 }
 0x4bf   :  { %v2565_v5 = vpop.xlane.xlu2 %2564  ;;  %v2538_v53 = vpop.xlane.xlu0 %2537  ;;  %v2653_v54 = vmul.f32 %v4044_v8, %v2652_v11 }
 0x4c0   :  { %v2581_v42 = vmul.f32 0.071428575, %v2565_v5  ;;  %v2572_v59 = vmul.f32 0.071428575, %v2538_v53  ;;  %3875 = vmatmul.msk.f32.gmra.mxu2 %vm76_vm0, %v2803_v37 }
 0x4c1   :  { %v2657_v12 = vsel %vm2656_vm9, %v4044_v8, %v2653_v54 }
 0x4c2   :  { %v4046_v31 = vpop.eup %4045  ;;  %v2597_v38 = vadd.f32 1e-05, %v2581_v42  ;;  %v6719_v17 = vadd.f32 1e-05, %v2572_v59  ;;  %v2763_v58 = vmul.f32 %v2657_v12, %v6596_v57 }
 0x4c3   :  { %v2739_v23 = vmul.f32 %v4046_v31, %v2596_v19  ;;  %vm2745_vm10 = vweird.f32 %v4046_v31 }
 0x4c4   :  { %4047 = vrsqrt.f32 %v2597_v38  ;;  %v2779_v41 = vmul.f32 %v6645_v9, %v2763_v58  ;;  %vm2746_vm12 = vmor %vm2744_vm11, %vm2745_vm10  ;;  %vm2754_vm15 = vweird.f32 %v2597_v38  ;;  %vm2664_vm2 = vweird.f32 %v6719_v17 }
 0x4c5   :  { %v2740_v62 = vmul.f32 %v4046_v31, %v2739_v23  ;;  %4049 = vrsqrt.f32 %v6719_v17 }
 0x4c6   :  { %4051 = vrsqrt.f32 %v2589_v51  ;;  %v2795_v8 = vadd.f32 %v6661_v39, %v2779_v41 }
 0x4c7   :  { %v2741_v35 = vmul.f32 0.5, %v2740_v62 }
 0x4c8   :  { %3867 = vmatmul.msk.f32.gmra.mxu0 %vm76_vm0, %v2795_v8 }
 0x4c9   :  { %v2742_v33 = vsub.f32 1.5, %v2741_v35 }
 0x4ca   :  { %v4048_v29 = vpop.eup %4047 }
 0x4cb   :  { %v4050_v52 = vpop.eup %4049  ;;  %v2743_v24 = vmul.f32 %v4046_v31, %v2742_v33  ;;  %v2749_v60 = vmul.f32 %v4048_v29, %v2597_v38  ;;  %vm2755_vm13 = vweird.f32 %v4048_v29 }
 0x4cc   :  { %v2659_v6 = vmul.f32 %v4050_v52, %v6719_v17  ;;  %v4052_v50 = vpop.eup %4051  ;;  %vm2665_vm14 = vweird.f32 %v4050_v52  ;;  %vm2756_vm1 = vmor %vm2754_vm15, %vm2755_vm13 }
 0x4cd   :  { %v2747_v30 = vsel %vm2746_vm12, %v4046_v31, %v2743_v24  ;;  %v2750_v3 = vmul.f32 %v4048_v29, %v2749_v60  ;;  %v2669_v14 = vmul.f32 %v4052_v50, %v2589_v51  ;;  %vm2675_vm3 = vweird.f32 %v4052_v50  ;;  %vm2666_vm4 = vmor %vm2664_vm2, %vm2665_vm14 }
 0x4ce   :  { %v2660_v57 = vmul.f32 %v4050_v52, %v2659_v6  ;;  %v2772_v18 = vmul.f32 %v2747_v30, %v6603_v56  ;;  %vm2676_vm6 = vmor %vm2674_vm5, %vm2675_vm3 }
 0x4cf   :  { %v2751_v13 = vmul.f32 0.5, %v2750_v3  ;;  %v2670_v5 = vmul.f32 %v4052_v50, %v2669_v14 }
 0x4d0   :  { %v2661_v27 = vmul.f32 0.5, %v2660_v57  ;;  %v2788_v19 = vmul.f32 %v6645_v9, %v2772_v18 }
 0x4d1   :  { %v2752_v53 = vsub.f32 1.5, %v2751_v13  ;;  %v2671_v42 = vmul.f32 0.5, %v2670_v5 }
 0x4d2   :  { %v2662_v7 = vsub.f32 1.5, %v2661_v27  ;;  %v2804_v59 = vadd.f32 %v6661_v39, %v2788_v19 }
 0x4d3   :  { %v2753_v20 = vmul.f32 %v4048_v29, %v2752_v53  ;;  %v2672_v31 = vsub.f32 1.5, %v2671_v42 }
 0x4d4   :  { %v2663_v56 = vmul.f32 %v4050_v52, %v2662_v7  ;;  %3876 = vmatmul.msk.f32.gmra.mxu2 %vm76_vm0, %v2804_v59 }
 0x4d5   :  { %v2757_v43 = vsel %vm2756_vm1, %v4048_v29, %v2753_v20  ;;  %v2900_v44 = vpop.f32.mrf.mxu2  ;;  %v2673_v23 = vmul.f32 %v4052_v50, %v2672_v31 }
 0x4d6   :  { %v2667_v2 = vsel %vm2666_vm4, %v4050_v52, %v2663_v56  ;;  %v6745_v11 = vadd.f32 %v6740_v1, %v2900_v44  ;;  %v2773_v63 = vmul.f32 %v2757_v43, %v6625_v4 }
 0x4d7   :  { %v2764_v38 = vmul.f32 %v2667_v2, %v6615_v47  ;;  %v2677_v45 = vsel %vm2676_vm6, %v4052_v50, %v2673_v23 }
 0x4d8   :  { %v6750_v17 = vmul.f32 0.70710677, %v6745_v11  ;;  %v2789_v62 = vmul.f32 %v6645_v9, %v2773_v63  ;;  %v2765_v51 = vmul.f32 %v2677_v45, %v6636_v55 }
 0x4d9   :  { %v2780_v54 = vmul.f32 %v6645_v9, %v2764_v38 }
 0x4da   :  { %v3276_v22 = vmul.f32 %v6750_v17, %v6750_v17  ;;  %v2805_v35 = vadd.f32 %v6661_v39, %v2789_v62  ;;  %v2781_v47 = vmul.f32 %v6645_v9, %v2765_v51 }
 0x4db   :  { %v2796_v4 = vadd.f32 %v6661_v39, %v2780_v54 }
 0x4dc   :  { %v6759_v12 = vmin.f32 %v3276_v22, 16.0  ;;  %3877 = vmatmul.msk.f32.gmra.mxu2 %vm76_vm0, %v2805_v35  ;;  %v2797_v52 = vadd.f32 %v6661_v39, %v2781_v47 }
 0x4dd   :  { %3868 = vmatmul.msk.f32.gmra.mxu0 %vm76_vm0, %v2796_v4  ;;  %v2903_v37 = vpop.f32.mrf.mxu2 }
 0x4de   :  { %v3278_v58 = vmul.f32 2.1237322e-06, %v6759_v12  ;;  %v3289_v55 = vmul.f32 3.8918573e-05, %v6759_v12  ;;  %v6767_v33 = vadd.f32 %v6740_v1, %v2903_v37 }
 0x4e0   :  { %v3279_v29 = vadd.f32 0.00028619796, %v3278_v58  ;;  %v3290_v41 = vadd.f32 0.001143296, %v3289_v55  ;;  %v6771_v24 = vmul.f32 0.70710677, %v6767_v33 }
 0x4e2   :  { %v3280_v60 = vmul.f32 %v3279_v29, %v6759_v12  ;;  %v3291_v6 = vmul.f32 %v3290_v41, %v6759_v12  ;;  %v3316_v9 = vmul.f32 %v6771_v24, %v6771_v24 }
 0x4e4   :  { %v3281_v8 = vadd.f32 0.0036580483, %v3280_v60  ;;  %v3292_v50 = vadd.f32 0.014752088, %v3291_v6  ;;  %v6781_v57 = vmin.f32 %v3316_v9, 16.0 }
 0x4e5   :  { %3869 = vmatmul.msk.f32.gmra.mxu0 %vm76_vm0, %v2797_v52 }
 0x4e6   :  { %v3293_v14 = vmul.f32 %v3292_v50, %v6759_v12  ;;  %v3282_v13 = vmul.f32 %v3281_v8, %v6759_v12  ;;  %v3318_v5 = vmul.f32 2.1237322e-06, %v6781_v57  ;;  %v3329_v53 = vmul.f32 3.8918573e-05, %v6781_v57 }
 0x4e7   :  { %v2876_v30 = vpop.f32.mrf.mxu0 }
 0x4e8   :  { %v6778_v3 = vadd.f32 %v6740_v1, %v2876_v30  ;;  %v3294_v19 = vadd.f32 0.112945676, %v3293_v14  ;;  %v3319_v42 = vadd.f32 0.00028619796, %v3318_v5  ;;  %v3330_v20 = vadd.f32 0.001143296, %v3329_v53 }
 0x4e9   :  { %v3283_v31 = vadd.f32 0.05243302, %v3282_v13 }
 0x4ea   :  { %v6789_v27 = vmul.f32 0.70710677, %v6778_v3  ;;  %v3295_v59 = vmul.f32 %v3294_v19, %v6759_v12  ;;  %v3320_v44 = vmul.f32 %v3319_v42, %v6781_v57  ;;  %v3331_v23 = vmul.f32 %v3330_v20, %v6781_v57 }
 0x4eb   :  { %v3284_v4 = vmul.f32 %v3283_v31, %v6759_v12 }
 0x4ec   :  { %v2906_v39 = vpop.f32.mrf.mxu2  ;;  %v2956_v7 = vmul.f32 %v6789_v27, %v6789_v27  ;;  %v3296_v2 = vadd.f32 0.4994258, %v3295_v59  ;;  %v3321_v62 = vadd.f32 0.0036580483, %v3320_v44  ;;  %v3332_v22 = vadd.f32 0.014752088, %v3331_v23 }
 0x4ed   :  { %v6785_v18 = vadd.f32 %v6740_v1, %v2906_v39  ;;  %v3285_v9 = vadd.f32 0.18741608, %v3284_v4 }
 0x4ee   :  { %v6799_v43 = vmin.f32 %v2956_v7, 16.0  ;;  %v3297_v51 = vmul.f32 %v3296_v2, %v6759_v12  ;;  %v3333_v55 = vmul.f32 %v3332_v22, %v6781_v57  ;;  %v3322_v60 = vmul.f32 %v3321_v62, %v6781_v57 }
 0x4ef   :  { %v6797_v56 = vmul.f32 0.70710677, %v6785_v18  ;;  %v2879_v63 = vpop.f32.mrf.mxu0  ;;  %v3286_v42 = vmul.f32 %v3285_v9, %v6759_v12 }
 0x4f0   :  { %v2958_v38 = vmul.f32 2.1237322e-06, %v6799_v43  ;;  %v2969_v45 = vmul.f32 3.8918573e-05, %v6799_v43  ;;  %v6806_v54 = vadd.f32 %v6740_v1, %v2879_v63  ;;  %v3298_v58 = vadd.f32 1.0, %v3297_v51 }
 0x4f1   :  { %v3356_v35 = vmul.f32 %v6797_v56, %v6797_v56  ;;  %v3334_v30 = vadd.f32 0.112945676, %v3333_v55  ;;  %v3323_v5 = vadd.f32 0.05243302, %v3322_v60  ;;  %v3287_v4 = vadd.f32 1.1283791, %v3286_v42 }
 0x4f2   :  { %v2959_v47 = vadd.f32 0.00028619796, %v2958_v38  ;;  %v2970_v37 = vadd.f32 0.001143296, %v2969_v45  ;;  %v6814_v29 = vmul.f32 0.70710677, %v6806_v54  ;;  %4053 = vrcp.f32 %v3298_v58 }
 0x4f3   :  { %v6819_v6 = vmin.f32 %v3356_v35, 16.0  ;;  %v3335_v19 = vmul.f32 %v3334_v30, %v6781_v57  ;;  %v3324_v45 = vmul.f32 %v3323_v5, %v6781_v57  ;;  %vm3304_vm9 = vweird.f32 %v3298_v58 }
 0x4f4   :  { %v2960_v41 = vmul.f32 %v2959_v47, %v6799_v43  ;;  %v2971_v52 = vmul.f32 %v2970_v37, %v6799_v43  ;;  %v2996_v39 = vmul.f32 %v6814_v29, %v6814_v29  ;;  %v3310_v47 = vand.u32 2147483648, %v3298_v58 }
 0x4f5   :  { %v3358_v7 = vmul.f32 2.1237322e-06, %v6819_v6  ;;  %v3336_v44 = vadd.f32 0.4994258, %v3335_v19 }
 0x4f6   :  { %v2961_v8 = vadd.f32 0.0036580483, %v2960_v41  ;;  %v2972_v50 = vadd.f32 0.014752088, %v2971_v52  ;;  %v6826_v53 = vmin.f32 %v2996_v39, 16.0  ;;  %v3311_v42 = vor.u32 1.1754944e-38, %v3310_v47 }
 0x4f7   :  { %v3337_v62 = vmul.f32 %v3336_v44, %v6781_v57  ;;  %v3359_v35 = vadd.f32 0.00028619796, %v3358_v7  ;;  %v2882_v30 = vpop.f32.mrf.mxu0  ;;  %v3325_v39 = vadd.f32 0.18741608, %v3324_v45  ;;  %v3369_v7 = vmul.f32 3.8918573e-05, %v6819_v6  ;;  %v2909_v45 = vpop.f32.mrf.mxu2 }
 0x4f8   :  { %v2962_v14 = vmul.f32 %v2961_v8, %v6799_v43  ;;  %v2973_v13 = vmul.f32 %v2972_v50, %v6799_v43  ;;  %v4054_v31 = vpop.eup %4053  ;;  %v2998_v2 = vmul.f32 2.1237322e-06, %v6826_v53  ;;  %v3009_v23 = vmul.f32 3.8918573e-05, %v6826_v53 }
 0x4f9   :  { %v3300_v63 = vmul.f32 %v4054_v31, %v3298_v58  ;;  %v6836_v41 = vadd.f32 1.0, %v3337_v62  ;;  %vm3305_vm7 = vweird.f32 %v4054_v31  ;;  %v3308_v8 = vand.u32 2147483647, %v3298_v58 }
 0x4fa   :  { %v2963_v59 = vadd.f32 0.05243302, %v2962_v14  ;;  %v2974_v20 = vadd.f32 0.112945676, %v2973_v13  ;;  %v2999_v51 = vadd.f32 0.00028619796, %v2998_v2  ;;  %v3360_v14 = vmul.f32 %v3359_v35, %v6819_v6  ;;  %vm3306_vm10 = vmor %vm3304_vm9, %vm3305_vm7 }
 0x4fb   :  { %v3010_v22 = vadd.f32 0.001143296, %v3009_v23  ;;  %v3301_v12 = vsub.f32 1.0, %v3300_v63  ;;  %4055 = vrcp.f32 %v6836_v41  ;;  %v6847_v44 = vadd.f32 %v6740_v1, %v2882_v30 }
 0x4fc   :  { %v2975_v38 = vmul.f32 %v2974_v20, %v6799_v43  ;;  %v2964_v55 = vmul.f32 %v2963_v59, %v6799_v43  ;;  %v3000_v52 = vmul.f32 %v2999_v51, %v6826_v53  ;;  %v3288_v58 = vmul.f32 %v3287_v4, %v6750_v17 }
 0x4fd   :  { %v3011_v60 = vmul.f32 %v3010_v22, %v6826_v53  ;;  %v3302_v9 = vmul.f32 %v4054_v31, %v3301_v12  ;;  %vm3309_vm11 = vcmp.eq.f32.partialorder %v3308_v8, 8.507059e+37  ;;  %v3326_v51 = vmul.f32 %v3325_v39, %v6781_v57 }
 0x4fe   :  { %v2976_v37 = vadd.f32 0.4994258, %v2975_v38  ;;  %v3001_v19 = vadd.f32 0.0036580483, %v3000_v52  ;;  %v2965_v59 = vadd.f32 0.18741608, %v2964_v55  ;;  %v6869_v52 = vadd.f32 %v6740_v1, %v2909_v45 }
 0x4ff   :  { %v3303_v13 = vadd.f32 %v4054_v31, %v3302_v9  ;;  %v3012_v20 = vadd.f32 0.014752088, %v3011_v60  ;;  %v3361_v38 = vadd.f32 0.0036580483, %v3360_v14  ;;  %v3370_v35 = vadd.f32 0.001143296, %v3369_v7 }
 0x500   :  { %v2977_v50 = vmul.f32 %v2976_v37, %v6799_v43  ;;  %v3002_v63 = vmul.f32 %v3001_v19, %v6826_v53  ;;  %v6857_v47 = vmul.f32 0.5, %v6745_v11  ;;  %v2966_v17 = vmul.f32 %v2965_v59, %v6799_v43 }
 0x501   :  { %v3307_v2 = vsel %vm3306_vm10, %v4054_v31, %v3303_v13  ;;  %v3013_v22 = vmul.f32 %v3012_v20, %v6826_v53  ;;  %v6854_v12 = vpop.eup %4055  ;;  %v6861_v4 = vmul.f32 0.70710677, %v6847_v44  ;;  %v6864_v37 = vmul.f32 0.5, %v6778_v3 }
 0x502   :  { %v6843_v5 = vadd.f32 1.0, %v2977_v50  ;;  %v3312_v23 = vsel %vm3309_vm11, %v3311_v42, %v3307_v2  ;;  %v3003_v31 = vadd.f32 0.05243302, %v3002_v63  ;;  %v3340_v57 = vmul.f32 %v6854_v12, %v6836_v41 }
 0x503   :  { %v3313_v62 = vmul.f32 %v3312_v23, %v3288_v58  ;;  %v3014_v55 = vadd.f32 0.112945676, %v3013_v22  ;;  %v3362_v11 = vmul.f32 %v3361_v38, %v6819_v6  ;;  %v3371_v9 = vmul.f32 %v3370_v35, %v6819_v6 }
 0x504   :  { %4057 = vrcp.f32 %v6843_v5  ;;  %v3036_v43 = vmul.f32 %v6861_v4, %v6861_v4  ;;  %v6875_v50 = vadd.f32 1.1283791, %v3326_v51  ;;  %v3341_v3 = vsub.f32 1.0, %v3340_v57 }
 0x505   :  { %v3886_v60 = vclamps-f32 %v3313_v62, 1.0  ;;  %v3348_v30 = vand.u32 2147483647, %v6836_v41  ;;  %v3015_v39 = vmul.f32 %v3014_v55, %v6826_v53  ;;  %v2967_v14 = vadd.f32 1.1283791, %v2966_v17 }
 0x506   :  { %v2988_v19 = vand.u32 2147483647, %v6843_v5  ;;  %v3004_v7 = vmul.f32 %v3003_v31, %v6826_v53  ;;  %v2990_v42 = vand.u32 2147483648, %v6843_v5  ;;  %vm3344_vm12 = vweird.f32 %v6836_v41 }
 0x507   :  { %v3350_v59 = vand.u32 2147483648, %v6836_v41  ;;  %v3016_v20 = vadd.f32 0.4994258, %v3015_v39  ;;  %v3372_v58 = vadd.f32 0.014752088, %v3371_v9  ;;  %v3604_v2 = vadd.f32 1.0, %v3886_v60 }
 0x508   :  { %v3363_v63 = vadd.f32 0.05243302, %v3362_v11  ;;  %v6885_v38 = vmin.f32 %v3036_v43, 16.0  ;;  %v3342_v45 = vmul.f32 %v6854_v12, %v3341_v3  ;;  %v3005_v35 = vadd.f32 0.18741608, %v3004_v7  ;;  %v3631_v43 = vld [vmem:[%s7468_s8 + $0x18] sm:$0xff] }
 0x509   :  { %v3017_v62 = vmul.f32 %v3016_v20, %v6826_v53  ;;  %v3373_v51 = vmul.f32 %v3372_v58, %v6819_v6  ;;  %v6892_v31 = vmul.f32 0.70710677, %v6869_v52  ;;  %v2968_v57 = vmul.f32 %v2967_v14, %v6789_v27  ;;  %3912 = vmatpush.msra.mxu3 %v3631_v43  ;;  %3693 = vmatpush.msra.mxu1 %v3631_v43  ;;  %v3629_v20 = vld [vmem:[%s7468_s8 + $0x8] sm:$0xff] }
 0x50a   :  { %v4058_v8 = vpop.eup %4057  ;;  %v3038_v17 = vmul.f32 2.1237322e-06, %v6885_v38  ;;  %vm6895_vm14 = vcmp.eq.f32.partialorder %v3348_v30, 8.507059e+37  ;;  %v3049_v9 = vmul.f32 3.8918573e-05, %v6885_v38  ;;  %vm2984_vm15 = vweird.f32 %v6843_v5  ;;  %v3630_v30 = vld [vmem:[%s7468_s8 + $0x10] sm:$0xff] }
 0x50b   :  { %v2980_v13 = vmul.f32 %v4058_v8, %v6843_v5  ;;  %vm2985_vm13 = vweird.f32 %v4058_v8  ;;  %v6899_v60 = vadd.f32 1.0, %v3017_v62  ;;  %v3374_v11 = vadd.f32 0.112945676, %v3373_v51  ;;  %3913 = vmatpush.msra.mxu3 %v3630_v30  ;;  %3694 = vmatpush.msra.mxu1 %v3630_v30  ;;  %v2885_v30 = vpop.f32.mrf.mxu0 }
 0x50c   :  { %vm6906_vm1 = vcmp.eq.f32.partialorder %v2988_v19, 8.507059e+37  ;;  %v2991_v27 = vor.u32 1.1754944e-38, %v2990_v42  ;;  %vm2986_vm2 = vmor %vm2984_vm15, %vm2985_vm13  ;;  %v3343_v14 = vadd.f32 %v6854_v12, %v3342_v45  ;;  %vm3345_vm3 = vweird.f32 %v6854_v12 }
 0x50d   :  { %v2981_v23 = vsub.f32 1.0, %v2980_v13  ;;  %4059 = vrcp.f32 %v6899_v60  ;;  %v3364_v5 = vmul.f32 %v3363_v63, %v6819_v6  ;;  %v3006_v19 = vmul.f32 %v3005_v35, %v6826_v53  ;;  %vm6932_vm4 = vmor %vm3344_vm12, %vm3345_vm3  ;;  %3914 = vmatpush.msra.mxu3 %v3629_v20  ;;  %3695 = vmatpush.msra.mxu1 %v3629_v20 }
 0x50e   :  { %v3375_v7 = vmul.f32 %v3374_v11, %v6819_v6  ;;  %v3039_v42 = vadd.f32 0.00028619796, %v3038_v17  ;;  %v3620_v58 = vmul.f32 %v3604_v2, %v6857_v47  ;;  %v3050_v45 = vadd.f32 0.001143296, %v3049_v9  ;;  %v3628_v2 = vld [vmem:[%s7468_s8] sm:$0xff] }
 0x50f   :  { %v2982_v22 = vmul.f32 %v4058_v8, %v2981_v23  ;;  %v3396_v63 = vmul.f32 %v6892_v31, %v6892_v31  ;;  %v3351_v62 = vor.u32 1.1754944e-38, %v3350_v59  ;;  %v3365_v35 = vadd.f32 0.18741608, %v3364_v5  ;;  %3915 = vmatpush.msra.mxu3 %v3628_v2  ;;  %3696 = vmatpush.msra.mxu1 %v3628_v2 }
 0x510   :  { %v3376_v51 = vadd.f32 0.4994258, %v3375_v7  ;;  %v3040_v47 = vmul.f32 %v3039_v42, %v6885_v38  ;;  %v3051_v41 = vmul.f32 %v3050_v45, %v6885_v38  ;;  %v3007_v59 = vadd.f32 1.1283791, %v3006_v19  ;;  %3902 = vmatmul.msk.f32.vlgmr.msra.gmra.mxu3 %vm2157_vm8, %v3620_v58 }
 0x511   :  { %v2983_v3 = vadd.f32 %v4058_v8, %v2982_v22  ;;  %v3347_v22 = vsel %vm6932_vm4, %v6854_v12, %v3343_v14  ;;  %v6944_v17 = vmin.f32 %v3396_v63, 16.0  ;;  %v3028_v7 = vand.u32 2147483647, %v6899_v60 }
 0x512   :  { %v3377_v11 = vmul.f32 %v3376_v51, %v6819_v6  ;;  %v3041_v9 = vadd.f32 0.0036580483, %v3040_v47  ;;  %v3052_v39 = vadd.f32 0.014752088, %v3051_v41  ;;  %v3352_v5 = vsel %vm6895_vm14, %v3351_v62, %v3347_v22 }
 0x513   :  { %v2987_v13 = vsel %vm2986_vm2, %v4058_v8, %v2983_v3  ;;  %v4060_v43 = vpop.eup %4059  ;;  %v3328_v3 = vmul.f32 %v6875_v50, %v6771_v24  ;;  %v3409_v12 = vmul.f32 3.8918573e-05, %v6944_v17  ;;  %v6962_v58 = vadd.f32 %v6740_v1, %v2885_v30 }
 0x514   :  { %v2992_v23 = vsel %vm6906_vm1, %v2991_v27, %v2987_v13  ;;  %v3398_v27 = vmul.f32 2.1237322e-06, %v6944_v17  ;;  %v3020_v13 = vmul.f32 %v4060_v43, %v6899_v60  ;;  %v6955_v19 = vadd.f32 1.0, %v3377_v11 }
 0x515   :  { %v2993_v8 = vmul.f32 %v2992_v23, %v2968_v57  ;;  %v3053_v24 = vmul.f32 %v3052_v39, %v6885_v38  ;;  %v3410_v42 = vadd.f32 0.001143296, %v3409_v12  ;;  %v3353_v55 = vmul.f32 %v3352_v5, %v3328_v3 }
 0x516   :  { %v3399_v50 = vadd.f32 0.00028619796, %v3398_v27  ;;  %v3021_v23 = vsub.f32 1.0, %v3020_v13  ;;  %4061 = vrcp.f32 %v6955_v19  ;;  %v3030_v45 = vand.u32 2147483648, %v6899_v60 }
 0x517   :  { %v3878_v57 = vclamps-f32 %v2993_v8, 1.0  ;;  %v3042_v63 = vmul.f32 %v3041_v9, %v6885_v38  ;;  %vm3025_vm5 = vweird.f32 %v4060_v43  ;;  %v3054_v62 = vadd.f32 0.112945676, %v3053_v24 }
 0x518   :  { %v3400_v8 = vmul.f32 %v3399_v50, %v6944_v17  ;;  %v3022_v53 = vmul.f32 %v4060_v43, %v3021_v23  ;;  %v3411_v51 = vmul.f32 %v3410_v42, %v6944_v17  ;;  %vm3024_vm6 = vweird.f32 %v6899_v60 }
 0x519   :  { %v3596_v14 = vadd.f32 1.0, %v3878_v57  ;;  %vm6971_vm7 = vcmp.eq.f32.partialorder %v3028_v7, 8.507059e+37  ;;  %v3366_v2 = vmul.f32 %v3365_v35, %v6819_v6  ;;  %v3055_v41 = vmul.f32 %v3054_v62, %v6885_v38  ;;  %vm3026_vm9 = vmor %vm3024_vm6, %vm3025_vm5 }
 0x51a   :  { %v3023_v22 = vadd.f32 %v4060_v43, %v3022_v53  ;;  %v3412_v57 = vadd.f32 0.014752088, %v3411_v51  ;;  %v6978_v11 = vmul.f32 0.70710677, %v6962_v58  ;;  %v3031_v9 = vor.u32 1.1754944e-38, %v3030_v45 }
 0x51b   :  { %v3612_v20 = vmul.f32 %v3596_v14, %v6864_v37  ;;  %v3008_v37 = vmul.f32 %v3007_v59, %v6814_v29  ;;  %v3043_v3 = vadd.f32 0.05243302, %v3042_v63  ;;  %v3401_v39 = vadd.f32 0.0036580483, %v3400_v8 }
 0x51c   :  { %v3887_v29 = vclamps-f32 %v3353_v55, 1.0  ;;  %v4062_v59 = vpop.eup %4061  ;;  %v3027_v60 = vsel %vm3026_vm9, %v4060_v43, %v3023_v22  ;;  %v3056_v27 = vadd.f32 0.4994258, %v3055_v41  ;;  %v3413_v12 = vmul.f32 %v3412_v57, %v6944_v17 }
 0x51d   :  { %3894 = vmatmul.msk.f32.vlgmr.msra.gmra.mxu1 %vm2157_vm8, %v3612_v20  ;;  %v3076_v6 = vmul.f32 %v6978_v11, %v6978_v11  ;;  %v2933_v35 = vmul.f32 0.5, %v6767_v33  ;;  %v3032_v30 = vsel %vm6971_vm7, %v3031_v9, %v3027_v60  ;;  %v3367_v14 = vadd.f32 1.1283791, %v3366_v2 }
 0x51e   :  { %v3380_v5 = vmul.f32 %v4062_v59, %v6955_v19  ;;  %v3033_v13 = vmul.f32 %v3032_v30, %v3008_v37  ;;  %v3388_v7 = vand.u32 2147483647, %v6955_v19  ;;  %v3057_v24 = vmul.f32 %v3056_v27, %v6885_v38 }
 0x51f   :  { %v3414_v43 = vadd.f32 0.112945676, %v3413_v12  ;;  %v3390_v42 = vand.u32 2147483648, %v6955_v19  ;;  %v3044_v20 = vmul.f32 %v3043_v3, %v6885_v38  ;;  %v6991_v23 = vmin.f32 %v3076_v6, 16.0 }
 0x520   :  { %v3381_v50 = vsub.f32 1.0, %v3380_v5  ;;  %v6993_v33 = vadd.f32 1.0, %v3057_v24  ;;  %v3402_v55 = vmul.f32 %v3401_v39, %v6944_v17  ;;  %v3605_v63 = vadd.f32 1.0, %v3887_v29 }
 0x521   :  { %v3415_v45 = vmul.f32 %v3414_v43, %v6944_v17  ;;  %vm3385_vm10 = vweird.f32 %v4062_v59  ;;  %v3078_v53 = vmul.f32 2.1237322e-06, %v6991_v23  ;;  %v3089_v62 = vmul.f32 3.8918573e-05, %v6991_v23 }
 0x522   :  { %v3382_v8 = vmul.f32 %v4062_v59, %v3381_v50  ;;  %v3368_v51 = vmul.f32 %v3367_v14, %v6797_v56  ;;  %vm3384_vm11 = vweird.f32 %v6955_v19  ;;  %4063 = vrcp.f32 %v6993_v33 }
 0x523   :  { %v3879_v37 = vclamps-f32 %v3033_v13, 1.0  ;;  %v3045_v2 = vadd.f32 0.18741608, %v3044_v20  ;;  %v3416_v22 = vadd.f32 0.4994258, %v3415_v45  ;;  %vm3386_vm12 = vmor %vm3384_vm11, %vm3385_vm10  ;;  %v3391_v57 = vor.u32 1.1754944e-38, %v3390_v42 }
 0x524   :  { %v3383_v47 = vadd.f32 %v4062_v59, %v3382_v8  ;;  %v3079_v41 = vadd.f32 0.00028619796, %v3078_v53  ;;  %v3403_v9 = vadd.f32 0.05243302, %v3402_v55  ;;  %v3090_v3 = vadd.f32 0.001143296, %v3089_v62 }
 0x525   :  { %v3621_v39 = vmul.f32 %v3605_v63, %v2933_v35  ;;  %vm3389_vm13 = vcmp.eq.f32.partialorder %v3388_v7, 8.507059e+37  ;;  %v3417_v60 = vmul.f32 %v3416_v22, %v6944_v17  ;;  %v2925_v19 = vmul.f32 0.5, %v6806_v54 }
 0x526   :  { %v3387_v29 = vsel %vm3386_vm12, %v4062_v59, %v3383_v47  ;;  %v3080_v56 = vmul.f32 %v3079_v41, %v6991_v23  ;;  %v3091_v12 = vmul.f32 %v3090_v3, %v6991_v23  ;;  %v3597_v6 = vadd.f32 1.0, %v3879_v37 }
 0x527   :  { %v3392_v27 = vsel %vm3389_vm13, %v3391_v57, %v3387_v29  ;;  %3903 = vmatmul.msk.f32.gmra.mxu3 %vm2157_vm8, %v3621_v39  ;;  %v3046_v14 = vmul.f32 %v3045_v2, %v6885_v38  ;;  %v3418_v5 = vadd.f32 1.0, %v3417_v60  ;;  %v3404_v59 = vmul.f32 %v3403_v9, %v6944_v17 }
 0x528   :  { %v3393_v30 = vmul.f32 %v3392_v27, %v3368_v51  ;;  %v4064_v13 = vpop.eup %4063  ;;  %v3092_v35 = vadd.f32 0.014752088, %v3091_v12  ;;  %v3613_v7 = vmul.f32 %v3597_v6, %v2925_v19  ;;  %v3081_v43 = vadd.f32 0.0036580483, %v3080_v56 }
 0x529   :  { %v3060_v24 = vmul.f32 %v4064_v13, %v6993_v33  ;;  %4065 = vrcp.f32 %v3418_v5  ;;  %v2934_v54 = vmul.f32 0.5, %v6785_v18  ;;  %v3047_v50 = vadd.f32 1.1283791, %v3046_v14 }
 0x52a   :  { %3895 = vmatmul.msk.f32.gmra.mxu1 %vm2157_vm8, %v3613_v7  ;;  %v3093_v20 = vmul.f32 %v3092_v35, %v6991_v23  ;;  %v3888_v55 = vclamps-f32 %v3393_v30, 1.0  ;;  %vm3065_vm14 = vweird.f32 %v4064_v13  ;;  %v3068_v38 = vand.u32 2147483647, %v6993_v33 }
 0x52b   :  { %v3061_v42 = vsub.f32 1.0, %v3060_v24  ;;  %v3070_v45 = vand.u32 2147483648, %v6993_v33  ;;  %v3405_v63 = vadd.f32 0.18741608, %v3404_v59  ;;  %v3082_v53 = vmul.f32 %v3081_v43, %v6991_v23 }
 0x52c   :  { %v3094_v62 = vadd.f32 0.112945676, %v3093_v20  ;;  %v3606_v51 = vadd.f32 1.0, %v3888_v55  ;;  %vm3064_vm15 = vweird.f32 %v6993_v33  ;;  %v3048_v22 = vmul.f32 %v3047_v50, %v6861_v4 }
 0x52d   :  { %v3062_v8 = vmul.f32 %v4064_v13, %v3061_v42  ;;  %vm3066_vm1 = vmor %vm3064_vm15, %vm3065_vm14  ;;  %v3071_v41 = vor.u32 1.1754944e-38, %v3070_v45  ;;  %v3406_v57 = vmul.f32 %v3405_v63, %v6944_v17  ;;  %vm3069_vm2 = vcmp.eq.f32.partialorder %v3068_v38, 8.507059e+37 }
 0x52e   :  { %v3095_v47 = vmul.f32 %v3094_v62, %v6991_v23  ;;  %v3622_v2 = vmul.f32 %v3606_v51, %v2934_v54  ;;  %v3083_v39 = vadd.f32 0.05243302, %v3082_v53  ;;  %v3430_v33 = vand.u32 2147483648, %v3418_v5 }
 0x52f   :  { %v4066_v37 = vpop.eup %4065  ;;  %v3063_v18 = vadd.f32 %v4064_v13, %v3062_v8  ;;  %v3407_v12 = vadd.f32 1.1283791, %v3406_v57  ;;  %v3428_v4 = vand.u32 2147483647, %v3418_v5  ;;  %vm3424_vm4 = vweird.f32 %v3418_v5 }
 0x530   :  { %v3420_v9 = vmul.f32 %v4066_v37, %v3418_v5  ;;  %v3096_v29 = vadd.f32 0.4994258, %v3095_v47  ;;  %3904 = vmatmul.msk.f32.gmra.mxu3 %vm2157_vm8, %v3622_v2  ;;  %vm3425_vm3 = vweird.f32 %v4066_v37  ;;  %v3084_v30 = vmul.f32 %v3083_v39, %v6991_v23 }
 0x531   :  { %v3067_v3 = vsel %vm3066_vm1, %v4064_v13, %v3063_v18  ;;  %v2926_v59 = vmul.f32 0.5, %v6847_v44  ;;  %vm3426_vm5 = vmor %vm3424_vm4, %vm3425_vm3  ;;  %v3431_v35 = vor.u32 1.1754944e-38, %v3430_v33  ;;  %v3408_v7 = vmul.f32 %v3407_v12, %v6892_v31 }
 0x532   :  { %v3072_v60 = vsel %vm3069_vm2, %v3071_v41, %v3067_v3  ;;  %v3421_v56 = vsub.f32 1.0, %v3420_v9  ;;  %v3097_v27 = vmul.f32 %v3096_v29, %v6991_v23  ;;  %vm3429_vm6 = vcmp.eq.f32.partialorder %v3428_v4, 8.507059e+37 }
 0x533   :  { %v3073_v19 = vmul.f32 %v3072_v60, %v3048_v22  ;;  %v3085_v50 = vadd.f32 0.18741608, %v3084_v30  ;;  %v2935_v44 = vmul.f32 0.5, %v6869_v52  ;;  %v2912_v8 = vpop.f32.mrf.mxu2 }
 0x534   :  { %v3422_v6 = vmul.f32 %v4066_v37, %v3421_v56  ;;  %v3098_v17 = vadd.f32 1.0, %v3097_v27  ;;  %v7029_v62 = vadd.f32 %v6740_v1, %v2912_v8 }
 0x535   :  { %v3880_v14 = vclamps-f32 %v3073_v19, 1.0  ;;  %v3086_v5 = vmul.f32 %v3085_v50, %v6991_v23 }
 0x536   :  { %v3423_v13 = vadd.f32 %v4066_v37, %v3422_v6  ;;  %4067 = vrcp.f32 %v3098_v17  ;;  %v3108_v47 = vand.u32 2147483647, %v3098_v17  ;;  %v7033_v2 = vmul.f32 0.70710677, %v7029_v62 }
 0x537   :  { %v3598_v43 = vadd.f32 1.0, %v3880_v14  ;;  %v3087_v51 = vadd.f32 1.1283791, %v3086_v5  ;;  %vm3104_vm9 = vweird.f32 %v3098_v17  ;;  %v2927_v6 = vmul.f32 0.5, %v6962_v58 }
 0x538   :  { %v3427_v24 = vsel %vm3426_vm5, %v4066_v37, %v3423_v13  ;;  %v3110_v37 = vand.u32 2147483648, %v3098_v17  ;;  %v3436_v52 = vmul.f32 %v7033_v2, %v7033_v2  ;;  %vm3109_vm11 = vcmp.eq.f32.partialorder %v3108_v47, 8.507059e+37  ;;  %v2888_v56 = vpop.f32.mrf.mxu0 }
 0x539   :  { %v3432_v54 = vsel %vm3429_vm6, %v3431_v35, %v3427_v24  ;;  %v3614_v20 = vmul.f32 %v3598_v43, %v2926_v59  ;;  %v3088_v41 = vmul.f32 %v3087_v51, %v6978_v11  ;;  %v7039_v12 = vadd.f32 %v6740_v1, %v2888_v56 }
 0x53a   :  { %v3433_v42 = vmul.f32 %v3432_v54, %v3408_v7  ;;  %v3111_v22 = vor.u32 1.1754944e-38, %v3110_v37  ;;  %v3437_v9 = vmin.f32 %v3436_v52, 16.0 }
 0x53b   :  { %3896 = vmatmul.msk.f32.gmra.mxu1 %vm2157_vm8, %v3614_v20  ;;  %v7043_v11 = vmul.f32 0.70710677, %v7039_v12 }
 0x53c   :  { %v3889_v55 = vclamps-f32 %v3433_v42, 1.0  ;;  %v4068_v38 = vpop.eup %4067  ;;  %v3438_v29 = vmul.f32 2.1237322e-06, %v3437_v9  ;;  %v3449_v60 = vmul.f32 3.8918573e-05, %v3437_v9 }
 0x53d   :  { %v3100_v45 = vmul.f32 %v4068_v38, %v3098_v17  ;;  %vm3105_vm7 = vweird.f32 %v4068_v38  ;;  %v3116_v35 = vmul.f32 %v7043_v11, %v7043_v11 }
 0x53e   :  { %v3607_v63 = vadd.f32 1.0, %v3889_v55  ;;  %vm3106_vm10 = vmor %vm3104_vm9, %vm3105_vm7  ;;  %v3439_v33 = vadd.f32 0.00028619796, %v3438_v29  ;;  %v3450_v27 = vadd.f32 0.001143296, %v3449_v60 }
 0x53f   :  { %v3101_v53 = vsub.f32 1.0, %v3100_v45  ;;  %v7051_v58 = vmin.f32 %v3116_v35, 16.0 }
 0x540   :  { %v3623_v31 = vmul.f32 %v3607_v63, %v2935_v44  ;;  %v3440_v30 = vmul.f32 %v3439_v33, %v3437_v9  ;;  %v3451_v17 = vmul.f32 %v3450_v27, %v3437_v9 }
 0x541   :  { %v3102_v18 = vmul.f32 %v4068_v38, %v3101_v53  ;;  %v3129_v5 = vmul.f32 3.8918573e-05, %v7051_v58 }
 0x542   :  { %3905 = vmatmul.msk.f32.gmra.mxu3 %vm2157_vm8, %v3623_v31  ;;  %v3441_v13 = vadd.f32 0.0036580483, %v3440_v30  ;;  %v3452_v59 = vadd.f32 0.014752088, %v3451_v17 }
 0x543   :  { %v3103_v23 = vadd.f32 %v4068_v38, %v3102_v18  ;;  %v2915_v7 = vpop.f32.mrf.mxu2  ;;  %v3130_v53 = vadd.f32 0.001143296, %v3129_v5 }
 0x544   :  { %v3442_v24 = vmul.f32 %v3441_v13, %v3437_v9  ;;  %v3453_v43 = vmul.f32 %v3452_v59, %v3437_v9  ;;  %v7049_v54 = vadd.f32 %v6740_v1, %v2915_v7 }
 0x545   :  { %v3107_v57 = vsel %vm3106_vm10, %v4068_v38, %v3103_v23  ;;  %v2891_v50 = vpop.f32.mrf.mxu0  ;;  %v3118_v38 = vmul.f32 2.1237322e-06, %v7051_v58  ;;  %v3131_v23 = vmul.f32 %v3130_v53, %v7051_v58 }
 0x546   :  { %v3112_v3 = vsel %vm3109_vm11, %v3111_v22, %v3107_v57  ;;  %v3443_v42 = vadd.f32 0.05243302, %v3442_v24  ;;  %v3454_v20 = vadd.f32 0.112945676, %v3453_v43  ;;  %v7054_v55 = vadd.f32 %v6740_v1, %v2891_v50 }
 0x547   :  { %v3113_v39 = vmul.f32 %v3112_v3, %v3088_v41  ;;  %v7059_v44 = vmul.f32 0.70710677, %v7049_v54  ;;  %v3119_v8 = vadd.f32 0.00028619796, %v3118_v38  ;;  %v3132_v3 = vadd.f32 0.014752088, %v3131_v23 }
 0x548   :  { %v3455_v45 = vmul.f32 %v3454_v20, %v3437_v9  ;;  %v7062_v63 = vmul.f32 0.70710677, %v7054_v55  ;;  %v3444_v18 = vmul.f32 %v3443_v42, %v3437_v9 }
 0x549   :  { %v3881_v19 = vclamps-f32 %v3113_v39, 1.0  ;;  %v3476_v31 = vmul.f32 %v7059_v44, %v7059_v44  ;;  %v3120_v47 = vmul.f32 %v3119_v8, %v7051_v58  ;;  %v3133_v33 = vmul.f32 %v3132_v3, %v7051_v58 }
 0x54a   :  { %v3456_v51 = vadd.f32 0.4994258, %v3455_v45  ;;  %v3156_v37 = vmul.f32 %v7062_v63, %v7062_v63 }
 0x54b   :  { %v3599_v4 = vadd.f32 1.0, %v3881_v19  ;;  %v7070_v52 = vmin.f32 %v3476_v31, 16.0  ;;  %v3121_v57 = vadd.f32 0.0036580483, %v3120_v47  ;;  %v3445_v19 = vadd.f32 0.18741608, %v3444_v18 }
 0x54c   :  { %v3457_v22 = vmul.f32 %v3456_v51, %v3437_v9  ;;  %v7072_v41 = vmin.f32 %v3156_v37, 16.0  ;;  %v3134_v17 = vadd.f32 0.112945676, %v3133_v33 }
 0x54d   :  { %v3615_v14 = vmul.f32 %v3599_v4, %v2927_v6  ;;  %v3478_v39 = vmul.f32 2.1237322e-06, %v7070_v52  ;;  %v3489_v56 = vmul.f32 3.8918573e-05, %v7070_v52  ;;  %v3122_v30 = vmul.f32 %v3121_v57, %v7051_v58 }
 0x54e   :  { %v7075_v60 = vadd.f32 1.0, %v3457_v22  ;;  %v3158_v6 = vmul.f32 2.1237322e-06, %v7072_v41  ;;  %v3446_v35 = vmul.f32 %v3445_v19, %v3437_v9  ;;  %v3135_v7 = vmul.f32 %v3134_v17, %v7051_v58 }
 0x54f   :  { %3897 = vmatmul.msk.f32.gmra.mxu1 %vm2157_vm8, %v3615_v14  ;;  %v3479_v27 = vadd.f32 0.00028619796, %v3478_v39  ;;  %v3490_v13 = vadd.f32 0.001143296, %v3489_v56  ;;  %v3169_v42 = vmul.f32 3.8918573e-05, %v7072_v41 }
 0x550   :  { %4069 = vrcp.f32 %v7075_v60  ;;  %v3159_v59 = vadd.f32 0.00028619796, %v3158_v6  ;;  %v3123_v20 = vadd.f32 0.05243302, %v3122_v30  ;;  %v3136_v38 = vadd.f32 0.4994258, %v3135_v7 }
 0x551   :  { %v3480_v14 = vmul.f32 %v3479_v27, %v7070_v52  ;;  %v3491_v43 = vmul.f32 %v3490_v13, %v7070_v52  ;;  %v3170_v53 = vadd.f32 0.001143296, %v3169_v42  ;;  %v3447_v51 = vadd.f32 1.1283791, %v3446_v35 }
 0x552   :  { %v3160_v50 = vmul.f32 %v3159_v59, %v7072_v41  ;;  %v3137_v18 = vmul.f32 %v3136_v38, %v7051_v58  ;;  %v3124_v39 = vmul.f32 %v3123_v20, %v7051_v58  ;;  %v7110_v6 = vmul.f32 0.5, %v7029_v62 }
 0x553   :  { %v3481_v24 = vadd.f32 0.0036580483, %v3480_v14  ;;  %v3492_v8 = vadd.f32 0.014752088, %v3491_v43  ;;  %v3171_v57 = vmul.f32 %v3170_v53, %v7072_v41  ;;  %v7116_v14 = vmul.f32 0.5, %v7039_v12 }
 0x554   :  { %v3161_v9 = vadd.f32 0.0036580483, %v3160_v50  ;;  %v7119_v13 = vmul.f32 0.5, %v7049_v54  ;;  %v3125_v35 = vadd.f32 0.18741608, %v3124_v39  ;;  %v7123_v7 = vmul.f32 0.5, %v7054_v55 }
 0x555   :  { %v3482_v5 = vmul.f32 %v3481_v24, %v7070_v52  ;;  %v3493_v23 = vmul.f32 %v3492_v8, %v7070_v52  ;;  %v3172_v27 = vadd.f32 0.014752088, %v3171_v57  ;;  %v3448_v43 = vmul.f32 %v3447_v51, %v7033_v2 }
 0x556   :  { %v7094_v45 = vpop.eup %4069  ;;  %v3162_v22 = vmul.f32 %v3161_v9, %v7072_v41  ;;  %v3468_v50 = vand.u32 2147483647, %v7075_v60  ;;  %vm3464_vm12 = vweird.f32 %v7075_v60  ;;  %v3470_v8 = vand.u32 2147483648, %v7075_v60 }
 0x557   :  { %v2918_v29 = vpop.f32.mrf.mxu2  ;;  %v3460_v37 = vmul.f32 %v7094_v45, %v7075_v60  ;;  %v3483_v47 = vadd.f32 0.05243302, %v3482_v5  ;;  %v3494_v19 = vadd.f32 0.112945676, %v3493_v23  ;;  %v3173_v62 = vmul.f32 %v3172_v27, %v7072_v41 }
 0x558   :  { %v7082_v4 = vadd.f32 %v6740_v1, %v2918_v29  ;;  %v7105_v29 = vadd.f32 1.0, %v3137_v18  ;;  %v3163_v33 = vadd.f32 0.05243302, %v3162_v22  ;;  %vm3465_vm13 = vweird.f32 %v7094_v45 }
 0x559   :  { %v3461_v3 = vsub.f32 1.0, %v3460_v37  ;;  %v3484_v30 = vmul.f32 %v3483_v47, %v7070_v52  ;;  %v3495_v59 = vmul.f32 %v3494_v19, %v7070_v52  ;;  %v3174_v38 = vadd.f32 0.112945676, %v3173_v62  ;;  %v7143_v37 = vld [vmem:[%s7467_s2] ss:$0 sm:$0xff]  ;;  %vm7155_vm14 = vmor %vm3464_vm12, %vm3465_vm13 }
 0x55a   :  { %v7091_v1 = vmul.f32 0.70710677, %v7082_v4  ;;  %4071 = vrcp.f32 %v7105_v29  ;;  %v3164_v12 = vmul.f32 %v3163_v33, %v7072_v41  ;;  %v2894_v20 = vpop.f32.mrf.mxu0  ;;  %v3126_v53 = vmul.f32 %v3125_v35, %v7051_v58 }
 0x55b   :  { %v3462_v17 = vmul.f32 %v7094_v45, %v3461_v3  ;;  %v3496_v42 = vadd.f32 0.4994258, %v3495_v59  ;;  %v3485_v54 = vadd.f32 0.18741608, %v3484_v30  ;;  %v7146_v18 = vadd.f32 %v7143_v37, %v2894_v20 }
 0x55c   :  { %v3516_v31 = vmul.f32 %v7091_v1, %v7091_v1  ;;  %v3165_v22 = vadd.f32 0.18741608, %v3164_v12  ;;  %vm7159_vm15 = vcmp.eq.f32.partialorder %v3468_v50, 8.507059e+37  ;;  %v3127_v60 = vadd.f32 1.1283791, %v3126_v53 }
 0x55d   :  { %v3463_v55 = vadd.f32 %v7094_v45, %v3462_v17  ;;  %v3497_v9 = vmul.f32 %v3496_v42, %v7070_v52  ;;  %v3486_v19 = vmul.f32 %v3485_v54, %v7070_v52  ;;  %v3471_v17 = vor.u32 1.1754944e-38, %v3470_v8 }
 0x55e   :  { %v7107_v56 = vmin.f32 %v3516_v31, 16.0  ;;  %v3175_v31 = vmul.f32 %v3174_v38, %v7072_v41  ;;  %v3150_v52 = vand.u32 2147483648, %v7105_v29  ;;  %v3166_v50 = vmul.f32 %v3165_v22, %v7072_v41 }
 0x55f   :  { %v7150_v23 = vadd.f32 1.0, %v3497_v9  ;;  %v2921_v57 = vpop.f32.mrf.mxu2  ;;  %v3467_v30 = vsel %vm7155_vm14, %v7094_v45, %v3463_v55  ;;  %v7176_v12 = vmul.f32 0.70710677, %v7146_v18  ;;  %v3148_v20 = vand.u32 2147483647, %v7105_v29 }
 0x560   :  { %v3518_v24 = vmul.f32 2.1237322e-06, %v7107_v56  ;;  %v7135_v2 = vpop.eup %4071  ;;  %v3529_v58 = vmul.f32 3.8918573e-05, %v7107_v56  ;;  %v3176_v33 = vadd.f32 0.4994258, %v3175_v31  ;;  %v3472_v45 = vsel %vm7159_vm15, %v3471_v17, %v3467_v30 }
 0x561   :  { %v3140_v47 = vmul.f32 %v7135_v2, %v7105_v29  ;;  %4073 = vrcp.f32 %v7150_v23  ;;  %v3487_v54 = vadd.f32 1.1283791, %v3486_v19  ;;  %v7188_v9 = vmul.f32 %v3127_v60, %v7043_v11 }
 0x562   :  { %v3519_v5 = vadd.f32 0.00028619796, %v3518_v24  ;;  %v3177_v35 = vmul.f32 %v3176_v33, %v7072_v41  ;;  %v7171_v24 = vadd.f32 %v7143_v37, %v2921_v57  ;;  %v3530_v42 = vadd.f32 0.001143296, %v3529_v58 }
 0x563   :  { %v3141_v59 = vsub.f32 1.0, %v3140_v47  ;;  %v3196_v41 = vmul.f32 %v7176_v12, %v7176_v12  ;;  %vm3144_vm1 = vweird.f32 %v7105_v29  ;;  %v3167_v47 = vadd.f32 1.1283791, %v3166_v50 }
 0x564   :  { %v3520_v51 = vmul.f32 %v3519_v5, %v7107_v56  ;;  %v7181_v38 = vadd.f32 1.0, %v3177_v35  ;;  %v3531_v8 = vmul.f32 %v3530_v42, %v7107_v56  ;;  %v7193_v53 = vmul.f32 0.70710677, %v7171_v24 }
 0x565   :  { %v3142_v5 = vmul.f32 %v7135_v2, %v3141_v59  ;;  %v7197_v58 = vmin.f32 %v3196_v41, 16.0  ;;  %v7199_v57 = vmul.f32 %v3472_v45, %v3448_v43  ;;  %vm3145_vm2 = vweird.f32 %v7135_v2 }
 0x566   :  { %v3521_v27 = vadd.f32 0.0036580483, %v3520_v51  ;;  %4075 = vrcp.f32 %v7181_v38  ;;  %v3151_v51 = vor.u32 1.1754944e-38, %v3150_v52  ;;  %v3532_v22 = vadd.f32 0.014752088, %v3531_v8  ;;  %vm7230_vm5 = vmor %vm3144_vm1, %vm3145_vm2 }
 0x567   :  { %v7195_v31 = vpop.eup %4073  ;;  %v7203_v11 = vmul.f32 %v3487_v54, %v7059_v44  ;;  %v3143_v39 = vadd.f32 %v7135_v2, %v3142_v5  ;;  %vm7208_vm3 = vcmp.eq.f32.partialorder %v3148_v20, 8.507059e+37  ;;  %v3510_v33 = vand.u32 2147483648, %v7150_v23 }
 0x568   :  { %v3522_v62 = vmul.f32 %v3521_v27, %v7107_v56  ;;  %v3500_v3 = vmul.f32 %v7195_v31, %v7150_v23  ;;  %v3533_v43 = vmul.f32 %v3532_v22, %v7107_v56  ;;  %v3198_v17 = vmul.f32 2.1237322e-06, %v7197_v58 }
 0x569   :  { %v3209_v44 = vmul.f32 3.8918573e-05, %v7197_v58  ;;  %v3556_v59 = vmul.f32 %v7193_v53, %v7193_v53  ;;  %vm3504_vm4 = vweird.f32 %v7150_v23  ;;  %v3508_v60 = vand.u32 2147483647, %v7150_v23 }
 0x56a   :  { %v3523_v55 = vadd.f32 0.05243302, %v3522_v62  ;;  %v3501_v30 = vsub.f32 1.0, %v3500_v3  ;;  %v7222_v35 = vmul.f32 %v3167_v47, %v7062_v63  ;;  %v3534_v62 = vadd.f32 0.112945676, %v3533_v43 }
 0x56b   :  { %v3199_v45 = vadd.f32 0.00028619796, %v3198_v17  ;;  %v3210_v20 = vadd.f32 0.001143296, %v3209_v44  ;;  %v7235_v54 = vmin.f32 %v3556_v59, 16.0  ;;  %v3147_v63 = vsel %vm7230_vm5, %v7135_v2, %v3143_v39 }
 0x56c   :  { %v3524_v27 = vmul.f32 %v3523_v55, %v7107_v56  ;;  %v7224_v52 = vpop.eup %4075  ;;  %v3502_v42 = vmul.f32 %v7195_v31, %v3501_v30  ;;  %v3511_v5 = vor.u32 1.1754944e-38, %v3510_v33  ;;  %v3535_v29 = vmul.f32 %v3534_v62, %v7107_v56 }
 0x56d   :  { %v3180_v55 = vmul.f32 %v7224_v52, %v7181_v38  ;;  %v3200_v41 = vmul.f32 %v3199_v45, %v7197_v58  ;;  %v3211_v47 = vmul.f32 %v3210_v20, %v7197_v58  ;;  %v3558_v22 = vmul.f32 2.1237322e-06, %v7235_v54 }
 0x56e   :  { %v3525_v8 = vadd.f32 0.18741608, %v3524_v27  ;;  %vm3505_vm6 = vweird.f32 %v7195_v31  ;;  %v3536_v43 = vadd.f32 0.4994258, %v3535_v29  ;;  %v3569_v30 = vmul.f32 3.8918573e-05, %v7235_v54 }
 0x56f   :  { %v3181_v3 = vsub.f32 1.0, %v3180_v55  ;;  %v3503_v2 = vadd.f32 %v7195_v31, %v3502_v42  ;;  %v3201_v39 = vadd.f32 0.0036580483, %v3200_v41  ;;  %v3212_v33 = vadd.f32 0.014752088, %v3211_v47  ;;  %v2897_v42 = vpop.f32.mrf.mxu0  ;;  %vm7261_vm7 = vmor %vm3504_vm4, %vm3505_vm6 }
 0x570   :  { %v3559_v17 = vadd.f32 0.00028619796, %v3558_v22  ;;  %v3190_v27 = vand.u32 2147483648, %v7181_v38  ;;  %v3537_v59 = vmul.f32 %v3536_v43, %v7107_v56  ;;  %v3570_v62 = vadd.f32 0.001143296, %v3569_v30 }
 0x571   :  { %v3182_v44 = vmul.f32 %v7224_v52, %v3181_v3  ;;  %v3152_v50 = vsel %vm7208_vm3, %v3151_v51, %v3147_v63  ;;  %v3202_v45 = vmul.f32 %v3201_v39, %v7197_v58  ;;  %v3213_v20 = vmul.f32 %v3212_v33, %v7197_v58 }
 0x572   :  { %v3560_v55 = vmul.f32 %v3559_v17, %v7235_v54  ;;  %vm3185_vm9 = vweird.f32 %v7224_v52  ;;  %v3526_v19 = vmul.f32 %v3525_v8, %v7107_v56  ;;  %v7267_v51 = vadd.f32 1.0, %v3537_v59 }
 0x573   :  { %v3571_v63 = vmul.f32 %v3570_v62, %v7235_v54  ;;  %v3507_v41 = vsel %vm7261_vm7, %v7195_v31, %v3503_v2  ;;  %v3183_v47 = vadd.f32 %v7224_v52, %v3182_v44  ;;  %v3203_v22 = vadd.f32 0.05243302, %v3202_v45 }
 0x574   :  { %v3214_v23 = vadd.f32 0.112945676, %v3213_v20  ;;  %v3153_v3 = vmul.f32 %v3152_v50, %v7188_v9  ;;  %4077 = vrcp.f32 %v7267_v51  ;;  %v3561_v43 = vadd.f32 0.0036580483, %v3560_v55 }
 0x575   :  { %v7277_v30 = vadd.f32 %v7143_v37, %v2897_v42  ;;  %vm3509_vm10 = vcmp.eq.f32.partialorder %v3508_v60, 8.507059e+37  ;;  %vm3184_vm11 = vweird.f32 %v7181_v38  ;;  %v3188_v56 = vand.u32 2147483647, %v7181_v38 }
 0x576   :  { %v3215_v8 = vmul.f32 %v3214_v23, %v7197_v58  ;;  %v3512_v31 = vsel %vm3509_vm10, %v3511_v5, %v3507_v41  ;;  %vm7284_vm12 = vmor %vm3184_vm11, %vm3185_vm9  ;;  %v3191_v9 = vor.u32 1.1754944e-38, %v3190_v27  ;;  %v3527_v39 = vadd.f32 1.1283791, %v3526_v19 }
 0x577   :  { %v3572_v33 = vadd.f32 0.014752088, %v3571_v63  ;;  %v3187_v37 = vsel %vm7284_vm12, %v7224_v52, %v3183_v47  ;;  %v3204_v60 = vmul.f32 %v3203_v22, %v7197_v58  ;;  %v3890_v38 = vclamps-f32 %v7199_v57, 1.0 }
 0x578   :  { %v3216_v17 = vadd.f32 0.4994258, %v3215_v8  ;;  %v3562_v5 = vmul.f32 %v3561_v43, %v7235_v54  ;;  %v7296_v59 = vmul.f32 0.70710677, %v7277_v30  ;;  %v3882_v62 = vclamps-f32 %v3153_v3, 1.0 }
 0x579   :  { %v3573_v44 = vmul.f32 %v3572_v33, %v7235_v54  ;;  %v3513_v27 = vmul.f32 %v3512_v31, %v7203_v11  ;;  %vm3189_vm13 = vcmp.eq.f32.partialorder %v3188_v56, 8.507059e+37  ;;  %v3608_v45 = vadd.f32 1.0, %v3890_v38 }
 0x57a   :  { %v3217_v50 = vmul.f32 %v3216_v17, %v7197_v58  ;;  %v4078_v52 = vpop.eup %4077  ;;  %v3192_v20 = vsel %vm3189_vm13, %v3191_v9, %v3187_v37  ;;  %v3528_v55 = vmul.f32 %v3527_v39, %v7091_v1  ;;  %v3236_v57 = vmul.f32 %v7296_v59, %v7296_v59 }
 0x57b   :  { %v3574_v42 = vadd.f32 0.112945676, %v3573_v44  ;;  %v3540_v29 = vmul.f32 %v4078_v52, %v7267_v51  ;;  %v3205_v19 = vadd.f32 0.18741608, %v3204_v60  ;;  %v3600_v41 = vadd.f32 1.0, %v3882_v62 }
 0x57c   :  { %v7304_v63 = vadd.f32 1.0, %v3217_v50  ;;  %v3563_v47 = vadd.f32 0.05243302, %v3562_v5  ;;  %v7307_v22 = vmin.f32 %v3236_v57, 16.0  ;;  %v3624_v23 = vmul.f32 %v3608_v45, %v7110_v6 }
 0x57d   :  { %v3575_v11 = vmul.f32 %v3574_v42, %v7235_v54  ;;  %v3541_v3 = vsub.f32 1.0, %v3540_v29  ;;  %v3548_v1 = vand.u32 2147483647, %v7267_v51  ;;  %v3891_v43 = vclamps-f32 %v3513_v27, 1.0 }
 0x57e   :  { %4079 = vrcp.f32 %v7304_v63  ;;  %v3193_v56 = vmul.f32 %v3192_v20, %v7222_v35  ;;  %vm3545_vm14 = vweird.f32 %v4078_v52  ;;  %v3550_v8 = vand.u32 2147483648, %v7267_v51  ;;  %3906 = vmatmul.msk.f32.gmra.mxu3 %vm2157_vm8, %v3624_v23 }
 0x57f   :  { %v3576_v31 = vadd.f32 0.4994258, %v3575_v11  ;;  %v3542_v2 = vmul.f32 %v4078_v52, %v3541_v3  ;;  %v3238_v9 = vmul.f32 2.1237322e-06, %v7307_v22  ;;  %v3249_v39 = vmul.f32 3.8918573e-05, %v7307_v22 }
 0x580   :  { %v3616_v6 = vmul.f32 %v3600_v41, %v7116_v14  ;;  %vm3544_vm15 = vweird.f32 %v7267_v51  ;;  %v3206_v33 = vmul.f32 %v3205_v19, %v7197_v58  ;;  %v3564_v37 = vmul.f32 %v3563_v47, %v7235_v54 }
 0x581   :  { %v3577_v35 = vmul.f32 %v3576_v31, %v7235_v54  ;;  %v3543_v60 = vadd.f32 %v4078_v52, %v3542_v2  ;;  %v3239_v17 = vadd.f32 0.00028619796, %v3238_v9  ;;  %v3250_v38 = vadd.f32 0.001143296, %v3249_v39  ;;  %vm3546_vm1 = vmor %vm3544_vm15, %vm3545_vm14 }
 0x582   :  { %3898 = vmatmul.msk.f32.gmra.mxu1 %vm2157_vm8, %v3616_v6  ;;  %v3609_v5 = vadd.f32 1.0, %v3891_v43  ;;  %vm3549_vm2 = vcmp.eq.f32.partialorder %v3548_v1, 8.507059e+37  ;;  %v3551_v44 = vor.u32 1.1754944e-38, %v3550_v8  ;;  %v3883_v14 = vclamps-f32 %v3193_v56, 1.0 }
 0x583   :  { %v7324_v62 = vadd.f32 1.0, %v3577_v35  ;;  %v3547_v27 = vsel %vm3546_vm1, %v4078_v52, %v3543_v60  ;;  %v3240_v58 = vmul.f32 %v3239_v17, %v7307_v22  ;;  %v3251_v50 = vmul.f32 %v3250_v38, %v7307_v22  ;;  %v7335_v52 = vld [vmem:[%s7461_s1 + $0x3] ss:$0 sm:$0xff] }
 0x584   :  { %v4080_v51 = vpop.eup %4079  ;;  %v3625_v45 = vmul.f32 %v3609_v5, %v7119_v13  ;;  %v2938_v20 = vmul.f32 0.5, %v7082_v4  ;;  %v3552_v42 = vsel %vm3549_vm2, %v3551_v44, %v3547_v27  ;;  %v3207_v19 = vadd.f32 1.1283791, %v3206_v33 }
 0x585   :  { %v3220_v57 = vmul.f32 %v4080_v51, %v7304_v63  ;;  %4081 = vrcp.f32 %v7324_v62  ;;  %v3553_v29 = vmul.f32 %v3552_v42, %v3528_v55  ;;  %v3565_v41 = vadd.f32 0.18741608, %v3564_v37 }
 0x586   :  { %v3230_v23 = vand.u32 2147483648, %v7304_v63  ;;  %v3252_v13 = vadd.f32 0.014752088, %v3251_v50  ;;  %3907 = vmatmul.msk.f32.gmra.mxu3 %vm2157_vm8, %v3625_v45  ;;  %v3601_v4 = vadd.f32 1.0, %v3883_v14  ;;  %v3228_v1 = vand.u32 2147483647, %v7304_v63 }
 0x587   :  { %v3221_v11 = vsub.f32 1.0, %v3220_v57  ;;  %v3241_v43 = vadd.f32 0.0036580483, %v3240_v58  ;;  %v3892_v55 = vclamps-f32 %v3553_v29, 1.0  ;;  %vm3225_vm3 = vweird.f32 %v4080_v51 }
 0x588   :  { %v3253_v31 = vmul.f32 %v3252_v13, %v7307_v22  ;;  %v3617_v2 = vmul.f32 %v3601_v4, %v7123_v7  ;;  %vm3224_vm4 = vweird.f32 %v7304_v63  ;;  %v3231_v35 = vor.u32 1.1754944e-38, %v3230_v23 }
 0x589   :  { %v3222_v8 = vmul.f32 %v4080_v51, %v3221_v11  ;;  %v3610_v9 = vadd.f32 1.0, %v3892_v55  ;;  %v3566_v60 = vmul.f32 %v3565_v41, %v7235_v54  ;;  %vm3226_vm5 = vmor %vm3224_vm4, %vm3225_vm3  ;;  %v3242_v7 = vmul.f32 %v3241_v43, %v7307_v22 }
 0x58a   :  { %v3254_v17 = vadd.f32 0.112945676, %v3253_v31  ;;  %3899 = vmatmul.msk.f32.gmra.mxu1 %vm2157_vm8, %v3617_v2  ;;  %v3208_v63 = vmul.f32 %v3207_v19, %v7176_v12  ;;  %vm3229_vm6 = vcmp.eq.f32.partialorder %v3228_v1, 8.507059e+37  ;;  %v3590_v45 = vand.u32 2147483648, %v7324_v62 }
 0x58b   :  { %v4082_v33 = vpop.eup %4081  ;;  %v3223_v37 = vadd.f32 %v4080_v51, %v3222_v8  ;;  %v3626_v5 = vmul.f32 %v3610_v9, %v2938_v20  ;;  %v3567_v50 = vadd.f32 1.1283791, %v3566_v60  ;;  %v3588_v12 = vand.u32 2147483647, %v7324_v62 }
 0x58c   :  { %v3580_v38 = vmul.f32 %v4082_v33, %v7324_v62  ;;  %v3255_v54 = vmul.f32 %v3254_v17, %v7307_v22  ;;  %vm3585_vm7 = vweird.f32 %v4082_v33  ;;  %vm3584_vm9 = vweird.f32 %v7324_v62 }
 0x58d   :  { %v3227_v44 = vsel %vm3226_vm5, %v4080_v51, %v3223_v37  ;;  %v3243_v51 = vadd.f32 0.05243302, %v3242_v7  ;;  %v2930_v19 = vmul.f32 0.5, %v7146_v18  ;;  %vm3586_vm10 = vmor %vm3584_vm9, %vm3585_vm7  ;;  %v3591_v41 = vor.u32 1.1754944e-38, %v3590_v45 }
 0x58e   :  { %v3232_v14 = vsel %vm3229_vm6, %v3231_v35, %v3227_v44  ;;  %v3581_v27 = vsub.f32 1.0, %v3580_v38  ;;  %v3256_v20 = vadd.f32 0.4994258, %v3255_v54  ;;  %3908 = vmatmul.msk.f32.gmra.mxu3 %vm2157_vm8, %v3626_v5  ;;  %v3568_v23 = vmul.f32 %v3567_v50, %v7193_v53 }
 0x58f   :  { %v3233_v58 = vmul.f32 %v3232_v14, %v3208_v63  ;;  %vm3589_vm11 = vcmp.eq.f32.partialorder %v3588_v12, 8.507059e+37  ;;  %v3244_v4 = vmul.f32 %v3243_v51, %v7307_v22  ;;  %v2939_v8 = vmul.f32 0.5, %v7171_v24 }
 0x590   :  { %v3257_v42 = vmul.f32 %v3256_v20, %v7307_v22 }
 0x591   :  { %v3884_v57 = vclamps-f32 %v3233_v58, 1.0  ;;  %v3245_v55 = vadd.f32 0.18741608, %v3244_v4  ;;  %v2931_v58 = vmul.f32 0.5, %v7277_v30 }
 0x593   :  { %v3722_v3 = vpop.f32.mrf.mxu3  ;;  %v3602_v11 = vadd.f32 1.0, %v3884_v57 }
 0x594   :  { %v3723_v6 = vadd.f32 %v7335_v52, %v3722_v3 }
 0x595   :  { %v3618_v43 = vmul.f32 %v3602_v11, %v2930_v19 }
 0x597   :  { %3900 = vmatmul.msk.f32.gmra.mxu1 %vm2157_vm8, %v3618_v43 }
 0x59a   :  { %v3698_v47 = vpop.f32.mrf.mxu1 }
 0x59b   :  { %v3699_v56 = vadd.f32 %v7335_v52, %v3698_v47  ;;  %v3258_v47 = vadd.f32 1.0, %v3257_v42 }
 0x59d   :  { %v3746_v39 = vadd.f32 %v3699_v56, %v6311_v21  ;;  %v3754_v21 = vadd.f32 %v3723_v6, %v6407_v25  ;;  %v3582_v25 = vmul.f32 %v4082_v33, %v3581_v27  ;;  %4083 = vrcp.f32 %v3258_v47 }
 0x59e   :  { %v3246_v6 = vmul.f32 %v3245_v55, %v7307_v22  ;;  %v3270_v24 = vand.u32 2147483648, %v3258_v47  ;;  %v3268_v17 = vand.u32 2147483647, %v3258_v47  ;;  %vm3264_vm13 = vweird.f32 %v3258_v47 }
 0x59f   :  { %3762 = vst.msk [vmem:[%s7469_s9] sm:$0xff] %vm76_vm0, %v3746_v39  ;;  %v3583_v29 = vadd.f32 %v4082_v33, %v3582_v25 }
 0x5a0   :  { %3770 = vst.msk [vmem:[%s7469_s9 + $0x40] sm:$0xff] %vm76_vm0, %v3754_v21  ;;  %v3271_v7 = vor.u32 1.1754944e-38, %v3270_v24  ;;  %vm3269_vm15 = vcmp.eq.f32.partialorder %v3268_v17, 8.507059e+37 }
 0x5a1   :  { %v3587_v13 = vsel %vm3586_vm10, %v4082_v33, %v3583_v29 }
 0x5a2   :  { %v3592_v3 = vsel %vm3589_vm11, %v3591_v41, %v3587_v13 }
 0x5a3   :  { %v3593_v1 = vmul.f32 %v3592_v3, %v3568_v23  ;;  %v4084_v53 = vpop.eup %4083 }
 0x5a4   :  { %v3260_v33 = vmul.f32 %v4084_v53, %v3258_v47  ;;  %vm3265_vm12 = vweird.f32 %v4084_v53 }
 0x5a5   :  { %v3893_v62 = vclamps-f32 %v3593_v1, 1.0  ;;  %vm3266_vm14 = vmor %vm3264_vm13, %vm3265_vm12 }
 0x5a6   :  { %v3261_v60 = vsub.f32 1.0, %v3260_v33 }
 0x5a7   :  { %v3701_v56 = vpop.f32.mrf.mxu1  ;;  %v3611_v31 = vadd.f32 1.0, %v3893_v62 }
 0x5a8   :  { %v3702_v18 = vadd.f32 %v7335_v52, %v3701_v56  ;;  %v3262_v22 = vmul.f32 %v4084_v53, %v3261_v60 }
 0x5a9   :  { %v3627_v37 = vmul.f32 %v3611_v31, %v2939_v8 }
 0x5aa   :  { %v3725_v2 = vpop.f32.mrf.mxu3  ;;  %v3747_v9 = vadd.f32 %v3702_v18, %v6430_v26  ;;  %v3247_v26 = vadd.f32 1.1283791, %v3246_v6  ;;  %v3263_v38 = vadd.f32 %v4084_v53, %v3262_v22 }
 0x5ab   :  { %v3726_v39 = vadd.f32 %v7335_v52, %v3725_v2  ;;  %3909 = vmatmul.msk.f32.gmra.mxu3 %vm2157_vm8, %v3627_v37 }
 0x5ac   :  { %3763 = vst.msk [vmem:[%s7469_s9 + $0x8] sm:$0xff] %vm76_vm0, %v3747_v9  ;;  %v3248_v5 = vmul.f32 %v3247_v26, %v7296_v59 }
 0x5ad   :  { %v3755_v35 = vadd.f32 %v3726_v39, %v6421_v40  ;;  %v3267_v40 = vsel %vm3266_vm14, %v4084_v53, %v3263_v38 }
 0x5ae   :  { %v3272_v21 = vsel %vm3269_vm15, %v3271_v7, %v3267_v40 }
 0x5af   :  { %3771 = vst.msk [vmem:[%s7469_s9 + $0x48] sm:$0xff] %vm76_vm0, %v3755_v35  ;;  %v3273_v44 = vmul.f32 %v3272_v21, %v3248_v5 }
 0x5b1   :  { %v3885_v14 = vclamps-f32 %v3273_v44, 1.0 }
 0x5b3   :  { %v3728_v63 = vpop.f32.mrf.mxu3  ;;  %v3603_v50 = vadd.f32 1.0, %v3885_v14 }
 0x5b4   :  { %v3729_v54 = vadd.f32 %v7335_v52, %v3728_v63 }
 0x5b5   :  { %v3619_v20 = vmul.f32 %v3603_v50, %v2931_v58 }
 0x5b6   :  { %v3756_v27 = vadd.f32 %v3729_v54, %v6442_v28 }
 0x5b7   :  { %3901 = vmatmul.msk.f32.gmra.mxu1 %vm2157_vm8, %v3619_v20 }
 0x5b8   :  { %v3704_v45 = vpop.f32.mrf.mxu1  ;;  %3772 = vst.msk [vmem:[%s7469_s9 + $0x50] sm:$0xff] %vm76_vm0, %v3756_v27 }
 0x5b9   :  { %v3705_v59 = vadd.f32 %v7335_v52, %v3704_v45 }
 0x5bb   :  { %v3748_v25 = vadd.f32 %v3705_v59, %v6424_v0 }
 0x5bd   :  { %3764 = vst.msk [vmem:[%s7469_s9 + $0x10] sm:$0xff] %vm76_vm0, %v3748_v25 }
 0x5c5   :  { %v3731_v28 = vpop.f32.mrf.mxu3 }
 0x5c6   :  { %v3732_v30 = vadd.f32 %v7335_v52, %v3731_v28 }
 0x5c8   :  { %v3757_v12 = vadd.f32 %v3732_v30, %v6450_v61 }
 0x5ca   :  { %3773 = vst.msk [vmem:[%s7469_s9 + $0x58] sm:$0xff] %vm76_vm0, %v3757_v12 }
 0x5cc   :  { %v3707_v51 = vpop.f32.mrf.mxu1 }
 0x5cd   :  { %v3708_v0 = vadd.f32 %v7335_v52, %v3707_v51 }
 0x5cf   :  { %v3749_v42 = vadd.f32 %v3708_v0, %v6455_v36 }
 0x5d1   :  { %3765 = vst.msk [vmem:[%s7469_s9 + $0x18] sm:$0xff] %vm76_vm0, %v3749_v42 }
 0x5ff   :  { %v3710_v57 = vpop.f32.mrf.mxu1 }
 0x600   :  { %v3711_v29 = vadd.f32 %v7335_v52, %v3710_v57 }
 0x601   :  { %v3734_v19 = vpop.f32.mrf.mxu3 }
 0x602   :  { %v3750_v61 = vadd.f32 %v3711_v29, %v6469_v49  ;;  %v3735_v41 = vadd.f32 %v7335_v52, %v3734_v19 }
 0x604   :  { %3766 = vst.msk [vmem:[%s7469_s9 + $0x20] sm:$0xff] %vm76_vm0, %v3750_v61  ;;  %v3758_v36 = vadd.f32 %v3735_v41, %v6464_v32 }
 0x606   :  { %3774 = vst.msk [vmem:[%s7469_s9 + $0x60] sm:$0xff] %vm76_vm0, %v3758_v36 }
 0x607   :  { %v3713_v47 = vpop.f32.mrf.mxu1 }
 0x608   :  { %v3714_v11 = vadd.f32 %v7335_v52, %v3713_v47 }
 0x609   :  { %v3737_v23 = vpop.f32.mrf.mxu3 }
 0x60a   :  { %v3751_v49 = vadd.f32 %v3714_v11, %v6486_v48  ;;  %v3738_v13 = vadd.f32 %v7335_v52, %v3737_v23 }
 0x60c   :  { %3767 = vst.msk [vmem:[%s7469_s9 + $0x28] sm:$0xff] %vm76_vm0, %v3751_v49  ;;  %v3759_v32 = vadd.f32 %v3738_v13, %v6476_v16 }
 0x60e   :  { %3775 = vst.msk [vmem:[%s7469_s9 + $0x68] sm:$0xff] %vm76_vm0, %v3759_v32 }
 0x611   :  { %v3740_v4 = vpop.f32.mrf.mxu3 }
 0x612   :  { %v3741_v3 = vadd.f32 %v7335_v52, %v3740_v4 }
 0x614   :  { %v3716_v1 = vpop.f32.mrf.mxu1  ;;  %v3760_v48 = vadd.f32 %v3741_v3, %v6506_v46 }
 0x615   :  { %v3717_v43 = vadd.f32 %v7335_v52, %v3716_v1 }
 0x616   :  { %3776 = vst.msk [vmem:[%s7469_s9 + $0x70] sm:$0xff] %vm76_vm0, %v3760_v48 }
 0x617   :  { %v3752_v16 = vadd.f32 %v3717_v43, %v6501_v10 }
 0x619   :  { %3768 = vst.msk [vmem:[%s7469_s9 + $0x30] sm:$0xff] %vm76_vm0, %v3752_v16 }
 0x62e   :  { %v3743_v55 = vpop.f32.mrf.mxu3 }
 0x62f   :  { %v3744_v62 = vadd.f32 %v7335_v52, %v3743_v55 }
 0x631   :  { %v3761_v56 = vadd.f32 %v3744_v62, %v6528_v34 }
 0x633   :  { %3777 = vst.msk [vmem:[%s7469_s9 + $0x78] sm:$0xff] %vm76_vm0, %v3761_v56 }
 0x634   :  { %v3719_v46 = vpop.f32.mrf.mxu1 }
 0x635   :  { %v3720_v18 = vadd.f32 %v7335_v52, %v3719_v46 }
 0x637   :  { %v3753_v10 = vadd.f32 %v3720_v18, %v6519_v15 }
 0x639   :  { %3769 = vst.msk [vmem:[%s7469_s9 + $0x38] sm:$0xff] %vm76_vm0, %v3753_v10 }

</bundles_post_ra>
